<compile_context>
chip_gen: v7x
topology: tpu7x:2x2x1
jax: 0.10.0
libtpu: 0.0.40
codegen_flags: <defaults>
</compile_context>

<pallas_src>
import functools

import jax
import jax.numpy as jnp
from jax import lax
from jax.experimental import pallas as pl
from jax.experimental.pallas import tpu as pltpu

KH = KW = 7
PAD = 3


def _spatial_attention_kernel(x_ref, w_ref, o_ref, max_acc, sum_acc, pad_ref,
                              *, C, H, W, Nb, Ct, nk, ragged):
    # x_ref:   (Nb, Ct, H*W)   flattened-spatial channel tile (lane-dense)
    # w_ref:   (2*7*7,) f32    conv weights, resident in SMEM (scalar reads)
    # o_ref:   (Nb, H, W)      output block (written on the last channel step)
    # max_acc: (Nb, H*W) f32   per-image running channel max   (VMEM scratch)
    # sum_acc: (Nb, H*W) f32   per-image running channel sum   (VMEM scratch)
    # pad_ref: (H+6, W+6) f32  zero-padded conv workspace      (VMEM scratch)
    HW = H * W
    k = pl.program_id(1)

    if nk > 1:
        @pl.when(k == 0)
        def _init():
            max_acc[...] = jnp.full_like(max_acc, -jnp.inf)
            sum_acc[...] = jnp.zeros_like(sum_acc)

    # ---- channel reduction: one lane-dense tile reduce per image ----------
    for b in range(Nb):
        xt = x_ref[b].astype(jnp.float32)                      # (Ct, HW)
        if ragged:
            # Last channel tile may read past C: mask the garbage rows.
            cidx = lax.broadcasted_iota(jnp.int32, (Ct, HW), 0)
            valid = (k * Ct + cidx) < C
            m = jnp.max(jnp.where(valid, xt, -jnp.inf), axis=0)
            s = jnp.sum(jnp.where(valid, xt, 0.0), axis=0)
        else:
            m = jnp.max(xt, axis=0)                            # (HW,)
            s = jnp.sum(xt, axis=0)                            # (HW,)
        if nk == 1:
            max_acc[b, :] = m
            sum_acc[b, :] = s
        else:
            max_acc[b, :] = jnp.maximum(max_acc[b, :], m)
            sum_acc[b, :] = sum_acc[b, :] + s

    # ---- finalize: 7x7 conv (+ sigmoid) on the two (H, W) maps ------------
    def _finalize():
        pad_ref[...] = jnp.zeros_like(pad_ref)   # halo stays 0 == conv zero pad
        inv_c = jnp.float32(1.0 / C)
        for b in range(Nb):
            acc = jnp.zeros((H, W), jnp.float32)
            for ci in range(2):                  # 0 -> max map, 1 -> mean map
                src = max_acc if ci == 0 else sum_acc
                for h in range(H):               # flat -> (H, W) via the ref
                    row = src[b, pl.ds(h * W, W)]
                    if ci == 1:
                        row = row * inv_c
                    pad_ref[PAD + h, pl.ds(PAD, W)] = row
                for kh in range(KH):             # 49 shift-MAC taps on the VPU
                    for kw in range(KW):
                        wt = w_ref[ci * (KH * KW) + kh * KW + kw]
                        acc = acc + wt * pad_ref[pl.ds(kh, H), pl.ds(kw, W)]
            o_ref[b] = jax.nn.sigmoid(acc).astype(o_ref.dtype)

    if nk == 1:
        _finalize()
    else:
        pl.when(k == nk - 1)(_finalize)


def spatial_attention(x, conv_weight):
    """x: (N, C, H, W); conv_weight: (1, 2, 7, 7). Returns (N, 1, H, W)."""
    N, C, H, W = x.shape
    HW = H * W
    itemsize = jnp.dtype(x.dtype).itemsize

    # Flattened-spatial view (metadata-only for contiguous NCHW) and flat conv
    # weights for SMEM scalar access.
    xf = x.reshape(N, C, HW)
    wf = conv_weight.astype(jnp.float32).reshape(2 * KH * KW)

    # ---- VMEM-budgeted block selection -------------------------------------
    try:
        vmem_cap = int(pltpu.get_tpu_info().vmem_capacity_bytes)
    except Exception:
        vmem_cap = 64 << 20                      # conservative (v7x physical)
    vmem_cap = max(vmem_cap, 32 << 20)
    budget = max(1 << 20, min(8 << 20, vmem_cap // 8))   # per x block (1 buffer)

    def _rup(a, m):
        return ((a + m - 1) // m) * m

    hw_pad = _rup(HW, 128)

    def _xblk_bytes(ct, nb):                     # VMEM footprint of one x block
        return nb * _rup(ct, 8) * hw_pad * itemsize

    if C <= 8 or _xblk_bytes(C, 1) <= budget:
        # Whole channel extent in one step (typical CBAM layer).
        Ct, nk = C, 1
        nb_cap = min(max(1, N // 2),                           # v7x: >=2 steps on the parallel axis
                     max(1, budget // max(1, _xblk_bytes(C, 1))),
                     16)                                       # bound unrolled code size
        Nb = 1
        for d in range(min(N, nb_cap), 0, -1):                 # largest divisor of N
            if N % d == 0:
                Nb = d
                break
    else:
        # Large C*H*W: tile channels in multiples of 8; ragged tail is masked.
        Nb = 1
        Ct = max(8, min((budget // (hw_pad * itemsize)) // 8 * 8, (C // 8) * 8))
        nk = pl.cdiv(C, Ct)
    ragged = (nk > 1) and (C % Ct != 0)
    grid = (N // Nb, nk)

    # Explicit VMEM limit: double-buffered x + out blocks + scratch + slack.
    oblk = Nb * _rup(H, 8) * _rup(W, 128) * itemsize
    scr = (2 * _rup(Nb, 8) * hw_pad * 4
           + _rup(H + 2 * PAD, 8) * _rup(W + 2 * PAD, 128) * 4)
    needed = 2 * _xblk_bytes(Ct, Nb) + 2 * oblk + scr
    vmem_limit = min(max(needed + (8 << 20), 32 << 20), int(vmem_cap * 3 // 4))
    vmem_limit = max(vmem_limit, needed + (2 << 20))

    kernel = functools.partial(_spatial_attention_kernel, C=C, H=H, W=W,
                               Nb=Nb, Ct=Ct, nk=nk, ragged=ragged)

    out = pl.pallas_call(
        kernel,
        out_shape=jax.ShapeDtypeStruct((N, H, W), x.dtype),
        grid=grid,
        in_specs=[
            # x read exactly once, lane-dense (Nb, Ct, HW) tile per grid step.
            pl.BlockSpec((Nb, Ct, HW), lambda n, k: (n, k, 0)),
            # 98 conv weights live in SMEM and are read as scalars.
            pl.BlockSpec(memory_space=pltpu.MemorySpace.SMEM),
        ],
        out_specs=pl.BlockSpec((Nb, H, W), lambda n, k: (n, 0, 0)),
        scratch_shapes=[
            pltpu.VMEM((Nb, HW), jnp.float32),                 # running channel max
            pltpu.VMEM((Nb, HW), jnp.float32),                 # running channel sum
            pltpu.VMEM((H + 2 * PAD, W + 2 * PAD), jnp.float32),  # padded conv map
        ],
        compiler_params=pltpu.CompilerParams(
            dimension_semantics=("parallel", "arbitrary"),
            vmem_limit_bytes=int(vmem_limit)),
    )(xf, wf)

    # Free metadata reshape back to PyTorch's (N, 1, H, W).
    return out.reshape(N, 1, H, W)


def _reference(x, conv_weight):
    mx = jnp.max(x, axis=1, keepdims=True)
    av = jnp.mean(x, axis=1, keepdims=True)
    cat = jnp.concatenate([mx, av], axis=1).astype(jnp.float32)
    conv = lax.conv_general_dilated(
        cat, conv_weight.astype(jnp.float32), window_strides=(1, 1),
        padding=[(PAD, PAD), (PAD, PAD)],
        dimension_numbers=("NCHW", "OIHW", "NCHW"),
        precision=lax.Precision.HIGHEST)
    return jax.nn.sigmoid(conv)


if __name__ == "__main__":
    key = jax.random.PRNGKey(0)
    kx, kw = jax.random.split(key)

    N, C, H, W = 2, 4, 16, 16
    x = jax.random.normal(kx, (N, C, H, W), dtype=jnp.float32)
    # Deterministic synthetic weight, shape as nn.Conv2d(2, 1, 7, bias=False).
    conv_weight = 0.1 * jax.random.normal(kw, (1, 2, KH, KW), dtype=jnp.float32)

    out = spatial_attention(x, conv_weight)
    out = jax.block_until_ready(out)

    ref = _reference(x, conv_weight)
    assert out.shape == (N, 1, H, W)
    assert jnp.allclose(out, ref.astype(out.dtype), atol=1e-5, rtol=1e-5), \
        "mismatch vs reference"

    print("KERNEL_OK")
</pallas_src>

<mosaic_0001>
module attributes {stable_mosaic.version = 11 : i64} {
  func.func @_spatial_attention_kernel(%arg0: i32, %arg1: i32, %arg2: memref<1x4x256xf32, #tpu.memory_space<vmem>>, %arg3: memref<98xf32, #tpu.memory_space<smem>>, %arg4: memref<1x16x16xf32, #tpu.memory_space<vmem>>, %arg5: memref<1x256xf32, #tpu.memory_space<vmem>>, %arg6: memref<1x256xf32, #tpu.memory_space<vmem>>, %arg7: memref<22x22xf32, #tpu.memory_space<vmem>>) attributes {dimension_semantics = [#tpu.dimension_semantics<parallel>, #tpu.dimension_semantics<arbitrary>], iteration_bounds = array<i64: 2, 1>, scalar_prefetch = 0 : i64, scratch_operands = 3 : i64, tpu.core_type = #tpu.core_type<tc>, window_params = [{transform_indices = @transform_0, window_bounds = array<i64: 1, 4, 256>}, {transform_indices = @transform_1, window_bounds = array<i64: 98>}, {transform_indices = @transform_2, window_bounds = array<i64: 1, 16, 16>}]} {
    %c0 = arith.constant 0 : index
    %c0_0 = arith.constant 0 : index
    %c0_1 = arith.constant 0 : index
    %0 = vector.load %arg2[%c0, %c0_0, %c0_1] : memref<1x4x256xf32, #tpu.memory_space<vmem>>, vector<1x4x256xf32>
    %1 = vector.shape_cast %0 : vector<1x4x256xf32> to vector<4x256xf32>
    %cst = arith.constant dense<0xFF800000> : vector<256xf32>
    %2 = vector.multi_reduction <maximumf>, %1, %cst [0] : vector<4x256xf32> to vector<256xf32>
    %cst_2 = arith.constant dense<0.000000e+00> : vector<256xf32>
    %3 = vector.multi_reduction <add>, %1, %cst_2 [0] : vector<4x256xf32> to vector<256xf32>
    %c0_3 = arith.constant 0 : index
    %c0_4 = arith.constant 0 : index
    %4 = vector.load %arg5[%c0_3, %c0_4] : memref<1x256xf32, #tpu.memory_space<vmem>>, vector<1x256xf32>
    %5 = vector.shape_cast %4 : vector<1x256xf32> to vector<256xf32>
    %6 = vector.shape_cast %2 : vector<256xf32> to vector<1x256xf32>
    tpu.vector_store %arg5[%c0_3, %c0_4], %6 {strides = array<i32>} : memref<1x256xf32, #tpu.memory_space<vmem>>, vector<1x256xf32>,
    %c0_5 = arith.constant 0 : index
    %c0_6 = arith.constant 0 : index
    %7 = vector.load %arg6[%c0_5, %c0_6] : memref<1x256xf32, #tpu.memory_space<vmem>>, vector<1x256xf32>
    %8 = vector.shape_cast %7 : vector<1x256xf32> to vector<256xf32>
    %9 = vector.shape_cast %3 : vector<256xf32> to vector<1x256xf32>
    tpu.vector_store %arg6[%c0_5, %c0_6], %9 {strides = array<i32>} : memref<1x256xf32, #tpu.memory_space<vmem>>, vector<1x256xf32>,
    %cst_7 = arith.constant 0.000000e+00 : f32
    %10 = vector.broadcast %cst_7 : f32 to vector<22x22xf32>
    %c0_8 = arith.constant 0 : index
    %c0_9 = arith.constant 0 : index
    %11 = vector.load %arg7[%c0_8, %c0_9] : memref<22x22xf32, #tpu.memory_space<vmem>>, vector<22x22xf32>
    tpu.vector_store %arg7[%c0_8, %c0_9], %10 {strides = array<i32>} : memref<22x22xf32, #tpu.memory_space<vmem>>, vector<22x22xf32>,
    %cst_10 = arith.constant 0.000000e+00 : f32
    %12 = vector.broadcast %cst_10 : f32 to vector<16x16xf32>
    %c0_11 = arith.constant 0 : index
    %c0_12 = arith.constant 0 : index
    %13 = vector.load %arg5[%c0_11, %c0_12] : memref<1x256xf32, #tpu.memory_space<vmem>>, vector<1x16xf32>
    %14 = vector.shape_cast %13 : vector<1x16xf32> to vector<16xf32>
    %c3 = arith.constant 3 : index
    %c3_13 = arith.constant 3 : index
    %15 = vector.load %arg7[%c3, %c3_13] : memref<22x22xf32, #tpu.memory_space<vmem>>, vector<1x16xf32>
    %16 = vector.shape_cast %15 : vector<1x16xf32> to vector<16xf32>
    %17 = vector.shape_cast %14 : vector<16xf32> to vector<1x16xf32>
    tpu.vector_store %arg7[%c3, %c3_13], %17 {strides = array<i32>} : memref<22x22xf32, #tpu.memory_space<vmem>>, vector<1x16xf32>,
    %c0_14 = arith.constant 0 : index
    %c16 = arith.constant 16 : index
    %18 = vector.load %arg5[%c0_14, %c16] : memref<1x256xf32, #tpu.memory_space<vmem>>, vector<1x16xf32>
    %19 = vector.shape_cast %18 : vector<1x16xf32> to vector<16xf32>
    %c4 = arith.constant 4 : index
    %c3_15 = arith.constant 3 : index
    %20 = vector.load %arg7[%c4, %c3_15] : memref<22x22xf32, #tpu.memory_space<vmem>>, vector<1x16xf32>
    %21 = vector.shape_cast %20 : vector<1x16xf32> to vector<16xf32>
    %22 = vector.shape_cast %19 : vector<16xf32> to vector<1x16xf32>
    tpu.vector_store %arg7[%c4, %c3_15], %22 {strides = array<i32>} : memref<22x22xf32, #tpu.memory_space<vmem>>, vector<1x16xf32>,
    %c0_16 = arith.constant 0 : index
    %c32 = arith.constant 32 : index
    %23 = vector.load %arg5[%c0_16, %c32] : memref<1x256xf32, #tpu.memory_space<vmem>>, vector<1x16xf32>
    %24 = vector.shape_cast %23 : vector<1x16xf32> to vector<16xf32>
    %c5 = arith.constant 5 : index
    %c3_17 = arith.constant 3 : index
    %25 = vector.load %arg7[%c5, %c3_17] : memref<22x22xf32, #tpu.memory_space<vmem>>, vector<1x16xf32>
    %26 = vector.shape_cast %25 : vector<1x16xf32> to vector<16xf32>
    %27 = vector.shape_cast %24 : vector<16xf32> to vector<1x16xf32>
    tpu.vector_store %arg7[%c5, %c3_17], %27 {strides = array<i32>} : memref<22x22xf32, #tpu.memory_space<vmem>>, vector<1x16xf32>,
    %c0_18 = arith.constant 0 : index
    %c48 = arith.constant 48 : index
    %28 = vector.load %arg5[%c0_18, %c48] : memref<1x256xf32, #tpu.memory_space<vmem>>, vector<1x16xf32>
    %29 = vector.shape_cast %28 : vector<1x16xf32> to vector<16xf32>
    %c6 = arith.constant 6 : index
    %c3_19 = arith.constant 3 : index
    %30 = vector.load %arg7[%c6, %c3_19] : memref<22x22xf32, #tpu.memory_space<vmem>>, vector<1x16xf32>
    %31 = vector.shape_cast %30 : vector<1x16xf32> to vector<16xf32>
    %32 = vector.shape_cast %29 : vector<16xf32> to vector<1x16xf32>
    tpu.vector_store %arg7[%c6, %c3_19], %32 {strides = array<i32>} : memref<22x22xf32, #tpu.memory_space<vmem>>, vector<1x16xf32>,
    %c0_20 = arith.constant 0 : index
    %c64 = arith.constant 64 : index
    %33 = vector.load %arg5[%c0_20, %c64] : memref<1x256xf32, #tpu.memory_space<vmem>>, vector<1x16xf32>
    %34 = vector.shape_cast %33 : vector<1x16xf32> to vector<16xf32>
    %c7 = arith.constant 7 : index
    %c3_21 = arith.constant 3 : index
    %35 = vector.load %arg7[%c7, %c3_21] : memref<22x22xf32, #tpu.memory_space<vmem>>, vector<1x16xf32>
    %36 = vector.shape_cast %35 : vector<1x16xf32> to vector<16xf32>
    %37 = vector.shape_cast %34 : vector<16xf32> to vector<1x16xf32>
    tpu.vector_store %arg7[%c7, %c3_21], %37 {strides = array<i32>} : memref<22x22xf32, #tpu.memory_space<vmem>>, vector<1x16xf32>,
    %c0_22 = arith.constant 0 : index
    %c80 = arith.constant 80 : index
    %38 = vector.load %arg5[%c0_22, %c80] : memref<1x256xf32, #tpu.memory_space<vmem>>, vector<1x16xf32>
    %39 = vector.shape_cast %38 : vector<1x16xf32> to vector<16xf32>
    %c8 = arith.constant 8 : index
    %c3_23 = arith.constant 3 : index
    %40 = vector.load %arg7[%c8, %c3_23] : memref<22x22xf32, #tpu.memory_space<vmem>>, vector<1x16xf32>
    %41 = vector.shape_cast %40 : vector<1x16xf32> to vector<16xf32>
    %42 = vector.shape_cast %39 : vector<16xf32> to vector<1x16xf32>
    tpu.vector_store %arg7[%c8, %c3_23], %42 {strides = array<i32>} : memref<22x22xf32, #tpu.memory_space<vmem>>, vector<1x16xf32>,
    %c0_24 = arith.constant 0 : index
    %c96 = arith.constant 96 : index
    %43 = vector.load %arg5[%c0_24, %c96] : memref<1x256xf32, #tpu.memory_space<vmem>>, vector<1x16xf32>
    %44 = vector.shape_cast %43 : vector<1x16xf32> to vector<16xf32>
    %c9 = arith.constant 9 : index
    %c3_25 = arith.constant 3 : index
    %45 = vector.load %arg7[%c9, %c3_25] : memref<22x22xf32, #tpu.memory_space<vmem>>, vector<1x16xf32>
    %46 = vector.shape_cast %45 : vector<1x16xf32> to vector<16xf32>
    %47 = vector.shape_cast %44 : vector<16xf32> to vector<1x16xf32>
    tpu.vector_store %arg7[%c9, %c3_25], %47 {strides = array<i32>} : memref<22x22xf32, #tpu.memory_space<vmem>>, vector<1x16xf32>,
    %c0_26 = arith.constant 0 : index
    %c112 = arith.constant 112 : index
    %48 = vector.load %arg5[%c0_26, %c112] : memref<1x256xf32, #tpu.memory_space<vmem>>, vector<1x16xf32>
    %49 = vector.shape_cast %48 : vector<1x16xf32> to vector<16xf32>
    %c10 = arith.constant 10 : index
    %c3_27 = arith.constant 3 : index
    %50 = vector.load %arg7[%c10, %c3_27] : memref<22x22xf32, #tpu.memory_space<vmem>>, vector<1x16xf32>
    %51 = vector.shape_cast %50 : vector<1x16xf32> to vector<16xf32>
    %52 = vector.shape_cast %49 : vector<16xf32> to vector<1x16xf32>
    tpu.vector_store %arg7[%c10, %c3_27], %52 {strides = array<i32>} : memref<22x22xf32, #tpu.memory_space<vmem>>, vector<1x16xf32>,
    %c0_28 = arith.constant 0 : index
    %c128 = arith.constant 128 : index
    %53 = vector.load %arg5[%c0_28, %c128] : memref<1x256xf32, #tpu.memory_space<vmem>>, vector<1x16xf32>
    %54 = vector.shape_cast %53 : vector<1x16xf32> to vector<16xf32>
    %c11 = arith.constant 11 : index
    %c3_29 = arith.constant 3 : index
    %55 = vector.load %arg7[%c11, %c3_29] : memref<22x22xf32, #tpu.memory_space<vmem>>, vector<1x16xf32>
    %56 = vector.shape_cast %55 : vector<1x16xf32> to vector<16xf32>
    %57 = vector.shape_cast %54 : vector<16xf32> to vector<1x16xf32>
    tpu.vector_store %arg7[%c11, %c3_29], %57 {strides = array<i32>} : memref<22x22xf32, #tpu.memory_space<vmem>>, vector<1x16xf32>,
    %c0_30 = arith.constant 0 : index
    %c144 = arith.constant 144 : index
    %58 = vector.load %arg5[%c0_30, %c144] : memref<1x256xf32, #tpu.memory_space<vmem>>, vector<1x16xf32>
    %59 = vector.shape_cast %58 : vector<1x16xf32> to vector<16xf32>
    %c12 = arith.constant 12 : index
    %c3_31 = arith.constant 3 : index
    %60 = vector.load %arg7[%c12, %c3_31] : memref<22x22xf32, #tpu.memory_space<vmem>>, vector<1x16xf32>
    %61 = vector.shape_cast %60 : vector<1x16xf32> to vector<16xf32>
    %62 = vector.shape_cast %59 : vector<16xf32> to vector<1x16xf32>
    tpu.vector_store %arg7[%c12, %c3_31], %62 {strides = array<i32>} : memref<22x22xf32, #tpu.memory_space<vmem>>, vector<1x16xf32>,
    %c0_32 = arith.constant 0 : index
    %c160 = arith.constant 160 : index
    %63 = vector.load %arg5[%c0_32, %c160] : memref<1x256xf32, #tpu.memory_space<vmem>>, vector<1x16xf32>
    %64 = vector.shape_cast %63 : vector<1x16xf32> to vector<16xf32>
    %c13 = arith.constant 13 : index
    %c3_33 = arith.constant 3 : index
    %65 = vector.load %arg7[%c13, %c3_33] : memref<22x22xf32, #tpu.memory_space<vmem>>, vector<1x16xf32>
    %66 = vector.shape_cast %65 : vector<1x16xf32> to vector<16xf32>
    %67 = vector.shape_cast %64 : vector<16xf32> to vector<1x16xf32>
    tpu.vector_store %arg7[%c13, %c3_33], %67 {strides = array<i32>} : memref<22x22xf32, #tpu.memory_space<vmem>>, vector<1x16xf32>,
    %c0_34 = arith.constant 0 : index
    %c176 = arith.constant 176 : index
    %68 = vector.load %arg5[%c0_34, %c176] : memref<1x256xf32, #tpu.memory_space<vmem>>, vector<1x16xf32>
    %69 = vector.shape_cast %68 : vector<1x16xf32> to vector<16xf32>
    %c14 = arith.constant 14 : index
    %c3_35 = arith.constant 3 : index
    %70 = vector.load %arg7[%c14, %c3_35] : memref<22x22xf32, #tpu.memory_space<vmem>>, vector<1x16xf32>
    %71 = vector.shape_cast %70 : vector<1x16xf32> to vector<16xf32>
    %72 = vector.shape_cast %69 : vector<16xf32> to vector<1x16xf32>
    tpu.vector_store %arg7[%c14, %c3_35], %72 {strides = array<i32>} : memref<22x22xf32, #tpu.memory_space<vmem>>, vector<1x16xf32>,
    %c0_36 = arith.constant 0 : index
    %c192 = arith.constant 192 : index
    %73 = vector.load %arg5[%c0_36, %c192] : memref<1x256xf32, #tpu.memory_space<vmem>>, vector<1x16xf32>
    %74 = vector.shape_cast %73 : vector<1x16xf32> to vector<16xf32>
    %c15 = arith.constant 15 : index
    %c3_37 = arith.constant 3 : index
    %75 = vector.load %arg7[%c15, %c3_37] : memref<22x22xf32, #tpu.memory_space<vmem>>, vector<1x16xf32>
    %76 = vector.shape_cast %75 : vector<1x16xf32> to vector<16xf32>
    %77 = vector.shape_cast %74 : vector<16xf32> to vector<1x16xf32>
    tpu.vector_store %arg7[%c15, %c3_37], %77 {strides = array<i32>} : memref<22x22xf32, #tpu.memory_space<vmem>>, vector<1x16xf32>,
    %c0_38 = arith.constant 0 : index
    %c208 = arith.constant 208 : index
    %78 = vector.load %arg5[%c0_38, %c208] : memref<1x256xf32, #tpu.memory_space<vmem>>, vector<1x16xf32>
    %79 = vector.shape_cast %78 : vector<1x16xf32> to vector<16xf32>
    %c16_39 = arith.constant 16 : index
    %c3_40 = arith.constant 3 : index
    %80 = vector.load %arg7[%c16_39, %c3_40] : memref<22x22xf32, #tpu.memory_space<vmem>>, vector<1x16xf32>
    %81 = vector.shape_cast %80 : vector<1x16xf32> to vector<16xf32>
    %82 = vector.shape_cast %79 : vector<16xf32> to vector<1x16xf32>
    tpu.vector_store %arg7[%c16_39, %c3_40], %82 {strides = array<i32>} : memref<22x22xf32, #tpu.memory_space<vmem>>, vector<1x16xf32>,
    %c0_41 = arith.constant 0 : index
    %c224 = arith.constant 224 : index
    %83 = vector.load %arg5[%c0_41, %c224] : memref<1x256xf32, #tpu.memory_space<vmem>>, vector<1x16xf32>
    %84 = vector.shape_cast %83 : vector<1x16xf32> to vector<16xf32>
    %c17 = arith.constant 17 : index
    %c3_42 = arith.constant 3 : index
    %85 = vector.load %arg7[%c17, %c3_42] : memref<22x22xf32, #tpu.memory_space<vmem>>, vector<1x16xf32>
    %86 = vector.shape_cast %85 : vector<1x16xf32> to vector<16xf32>
    %87 = vector.shape_cast %84 : vector<16xf32> to vector<1x16xf32>
    tpu.vector_store %arg7[%c17, %c3_42], %87 {strides = array<i32>} : memref<22x22xf32, #tpu.memory_space<vmem>>, vector<1x16xf32>,
    %c0_43 = arith.constant 0 : index
    %c240 = arith.constant 240 : index
    %88 = vector.load %arg5[%c0_43, %c240] : memref<1x256xf32, #tpu.memory_space<vmem>>, vector<1x16xf32>
    %89 = vector.shape_cast %88 : vector<1x16xf32> to vector<16xf32>
    %c18 = arith.constant 18 : index
    %c3_44 = arith.constant 3 : index
    %90 = vector.load %arg7[%c18, %c3_44] : memref<22x22xf32, #tpu.memory_space<vmem>>, vector<1x16xf32>
    %91 = vector.shape_cast %90 : vector<1x16xf32> to vector<16xf32>
    %92 = vector.shape_cast %89 : vector<16xf32> to vector<1x16xf32>
    tpu.vector_store %arg7[%c18, %c3_44], %92 {strides = array<i32>} : memref<22x22xf32, #tpu.memory_space<vmem>>, vector<1x16xf32>,
    %c0_45 = arith.constant 0 : index
    %93 = memref.load %arg3[%c0_45] : memref<98xf32, #tpu.memory_space<smem>>
    %c0_46 = arith.constant 0 : index
    %c0_47 = arith.constant 0 : index
    %94 = vector.load %arg7[%c0_46, %c0_47] : memref<22x22xf32, #tpu.memory_space<vmem>>, vector<16x16xf32>
    %95 = vector.broadcast %93 : f32 to vector<16x16xf32>
    %96 = arith.mulf %95, %94 : vector<16x16xf32>
    %97 = arith.addf %12, %96 : vector<16x16xf32>
    %c1 = arith.constant 1 : index
    %98 = memref.load %arg3[%c1] : memref<98xf32, #tpu.memory_space<smem>>
    %c0_48 = arith.constant 0 : index
    %c1_49 = arith.constant 1 : index
    %99 = vector.load %arg7[%c0_48, %c1_49] : memref<22x22xf32, #tpu.memory_space<vmem>>, vector<16x16xf32>
    %100 = vector.broadcast %98 : f32 to vector<16x16xf32>
    %101 = arith.mulf %100, %99 : vector<16x16xf32>
    %102 = arith.addf %97, %101 : vector<16x16xf32>
    %c2 = arith.constant 2 : index
    %103 = memref.load %arg3[%c2] : memref<98xf32, #tpu.memory_space<smem>>
    %c0_50 = arith.constant 0 : index
    %c2_51 = arith.constant 2 : index
    %104 = vector.load %arg7[%c0_50, %c2_51] : memref<22x22xf32, #tpu.memory_space<vmem>>, vector<16x16xf32>
    %105 = vector.broadcast %103 : f32 to vector<16x16xf32>
    %106 = arith.mulf %105, %104 : vector<16x16xf32>
    %107 = arith.addf %102, %106 : vector<16x16xf32>
    %c3_52 = arith.constant 3 : index
    %108 = memref.load %arg3[%c3_52] : memref<98xf32, #tpu.memory_space<smem>>
    %c0_53 = arith.constant 0 : index
    %c3_54 = arith.constant 3 : index
    %109 = vector.load %arg7[%c0_53, %c3_54] : memref<22x22xf32, #tpu.memory_space<vmem>>, vector<16x16xf32>
    %110 = vector.broadcast %108 : f32 to vector<16x16xf32>
    %111 = arith.mulf %110, %109 : vector<16x16xf32>
    %112 = arith.addf %107, %111 : vector<16x16xf32>
    %c4_55 = arith.constant 4 : index
    %113 = memref.load %arg3[%c4_55] : memref<98xf32, #tpu.memory_space<smem>>
    %c0_56 = arith.constant 0 : index
    %c4_57 = arith.constant 4 : index
    %114 = vector.load %arg7[%c0_56, %c4_57] : memref<22x22xf32, #tpu.memory_space<vmem>>, vector<16x16xf32>
    %115 = vector.broadcast %113 : f32 to vector<16x16xf32>
    %116 = arith.mulf %115, %114 : vector<16x16xf32>
    %117 = arith.addf %112, %116 : vector<16x16xf32>
    %c5_58 = arith.constant 5 : index
    %118 = memref.load %arg3[%c5_58] : memref<98xf32, #tpu.memory_space<smem>>
    %c0_59 = arith.constant 0 : index
    %c5_60 = arith.constant 5 : index
    %119 = vector.load %arg7[%c0_59, %c5_60] : memref<22x22xf32, #tpu.memory_space<vmem>>, vector<16x16xf32>
    %120 = vector.broadcast %118 : f32 to vector<16x16xf32>
    %121 = arith.mulf %120, %119 : vector<16x16xf32>
    %122 = arith.addf %117, %121 : vector<16x16xf32>
    %c6_61 = arith.constant 6 : index
    %123 = memref.load %arg3[%c6_61] : memref<98xf32, #tpu.memory_space<smem>>
    %c0_62 = arith.constant 0 : index
    %c6_63 = arith.constant 6 : index
    %124 = vector.load %arg7[%c0_62, %c6_63] : memref<22x22xf32, #tpu.memory_space<vmem>>, vector<16x16xf32>
    %125 = vector.broadcast %123 : f32 to vector<16x16xf32>
    %126 = arith.mulf %125, %124 : vector<16x16xf32>
    %127 = arith.addf %122, %126 : vector<16x16xf32>
    %c7_64 = arith.constant 7 : index
    %128 = memref.load %arg3[%c7_64] : memref<98xf32, #tpu.memory_space<smem>>
    %c1_65 = arith.constant 1 : index
    %c0_66 = arith.constant 0 : index
    %129 = vector.load %arg7[%c1_65, %c0_66] : memref<22x22xf32, #tpu.memory_space<vmem>>, vector<16x16xf32>
    %130 = vector.broadcast %128 : f32 to vector<16x16xf32>
    %131 = arith.mulf %130, %129 : vector<16x16xf32>
    %132 = arith.addf %127, %131 : vector<16x16xf32>
    %c8_67 = arith.constant 8 : index
    %133 = memref.load %arg3[%c8_67] : memref<98xf32, #tpu.memory_space<smem>>
    %c1_68 = arith.constant 1 : index
    %c1_69 = arith.constant 1 : index
    %134 = vector.load %arg7[%c1_68, %c1_69] : memref<22x22xf32, #tpu.memory_space<vmem>>, vector<16x16xf32>
    %135 = vector.broadcast %133 : f32 to vector<16x16xf32>
    %136 = arith.mulf %135, %134 : vector<16x16xf32>
    %137 = arith.addf %132, %136 : vector<16x16xf32>
    %c9_70 = arith.constant 9 : index
    %138 = memref.load %arg3[%c9_70] : memref<98xf32, #tpu.memory_space<smem>>
    %c1_71 = arith.constant 1 : index
    %c2_72 = arith.constant 2 : index
    %139 = vector.load %arg7[%c1_71, %c2_72] : memref<22x22xf32, #tpu.memory_space<vmem>>, vector<16x16xf32>
    %140 = vector.broadcast %138 : f32 to vector<16x16xf32>
    %141 = arith.mulf %140, %139 : vector<16x16xf32>
    %142 = arith.addf %137, %141 : vector<16x16xf32>
    %c10_73 = arith.constant 10 : index
    %143 = memref.load %arg3[%c10_73] : memref<98xf32, #tpu.memory_space<smem>>
    %c1_74 = arith.constant 1 : index
    %c3_75 = arith.constant 3 : index
    %144 = vector.load %arg7[%c1_74, %c3_75] : memref<22x22xf32, #tpu.memory_space<vmem>>, vector<16x16xf32>
    %145 = vector.broadcast %143 : f32 to vector<16x16xf32>
    %146 = arith.mulf %145, %144 : vector<16x16xf32>
    %147 = arith.addf %142, %146 : vector<16x16xf32>
    %c11_76 = arith.constant 11 : index
    %148 = memref.load %arg3[%c11_76] : memref<98xf32, #tpu.memory_space<smem>>
    %c1_77 = arith.constant 1 : index
    %c4_78 = arith.constant 4 : index
    %149 = vector.load %arg7[%c1_77, %c4_78] : memref<22x22xf32, #tpu.memory_space<vmem>>, vector<16x16xf32>
    %150 = vector.broadcast %148 : f32 to vector<16x16xf32>
    %151 = arith.mulf %150, %149 : vector<16x16xf32>
    %152 = arith.addf %147, %151 : vector<16x16xf32>
    %c12_79 = arith.constant 12 : index
    %153 = memref.load %arg3[%c12_79] : memref<98xf32, #tpu.memory_space<smem>>
    %c1_80 = arith.constant 1 : index
    %c5_81 = arith.constant 5 : index
    %154 = vector.load %arg7[%c1_80, %c5_81] : memref<22x22xf32, #tpu.memory_space<vmem>>, vector<16x16xf32>
    %155 = vector.broadcast %153 : f32 to vector<16x16xf32>
    %156 = arith.mulf %155, %154 : vector<16x16xf32>
    %157 = arith.addf %152, %156 : vector<16x16xf32>
    %c13_82 = arith.constant 13 : index
    %158 = memref.load %arg3[%c13_82] : memref<98xf32, #tpu.memory_space<smem>>
    %c1_83 = arith.constant 1 : index
    %c6_84 = arith.constant 6 : index
    %159 = vector.load %arg7[%c1_83, %c6_84] : memref<22x22xf32, #tpu.memory_space<vmem>>, vector<16x16xf32>
    %160 = vector.broadcast %158 : f32 to vector<16x16xf32>
    %161 = arith.mulf %160, %159 : vector<16x16xf32>
    %162 = arith.addf %157, %161 : vector<16x16xf32>
    %c14_85 = arith.constant 14 : index
    %163 = memref.load %arg3[%c14_85] : memref<98xf32, #tpu.memory_space<smem>>
    %c2_86 = arith.constant 2 : index
    %c0_87 = arith.constant 0 : index
    %164 = vector.load %arg7[%c2_86, %c0_87] : memref<22x22xf32, #tpu.memory_space<vmem>>, vector<16x16xf32>
    %165 = vector.broadcast %163 : f32 to vector<16x16xf32>
    %166 = arith.mulf %165, %164 : vector<16x16xf32>
    %167 = arith.addf %162, %166 : vector<16x16xf32>
    %c15_88 = arith.constant 15 : index
    %168 = memref.load %arg3[%c15_88] : memref<98xf32, #tpu.memory_space<smem>>
    %c2_89 = arith.constant 2 : index
    %c1_90 = arith.constant 1 : index
    %169 = vector.load %arg7[%c2_89, %c1_90] : memref<22x22xf32, #tpu.memory_space<vmem>>, vector<16x16xf32>
    %170 = vector.broadcast %168 : f32 to vector<16x16xf32>
    %171 = arith.mulf %170, %169 : vector<16x16xf32>
    %172 = arith.addf %167, %171 : vector<16x16xf32>
    %c16_91 = arith.constant 16 : index
    %173 = memref.load %arg3[%c16_91] : memref<98xf32, #tpu.memory_space<smem>>
    %c2_92 = arith.constant 2 : index
    %c2_93 = arith.constant 2 : index
    %174 = vector.load %arg7[%c2_92, %c2_93] : memref<22x22xf32, #tpu.memory_space<vmem>>, vector<16x16xf32>
    %175 = vector.broadcast %173 : f32 to vector<16x16xf32>
    %176 = arith.mulf %175, %174 : vector<16x16xf32>
    %177 = arith.addf %172, %176 : vector<16x16xf32>
    %c17_94 = arith.constant 17 : index
    %178 = memref.load %arg3[%c17_94] : memref<98xf32, #tpu.memory_space<smem>>
    %c2_95 = arith.constant 2 : index
    %c3_96 = arith.constant 3 : index
    %179 = vector.load %arg7[%c2_95, %c3_96] : memref<22x22xf32, #tpu.memory_space<vmem>>, vector<16x16xf32>
    %180 = vector.broadcast %178 : f32 to vector<16x16xf32>
    %181 = arith.mulf %180, %179 : vector<16x16xf32>
    %182 = arith.addf %177, %181 : vector<16x16xf32>
    %c18_97 = arith.constant 18 : index
    %183 = memref.load %arg3[%c18_97] : memref<98xf32, #tpu.memory_space<smem>>
    %c2_98 = arith.constant 2 : index
    %c4_99 = arith.constant 4 : index
    %184 = vector.load %arg7[%c2_98, %c4_99] : memref<22x22xf32, #tpu.memory_space<vmem>>, vector<16x16xf32>
    %185 = vector.broadcast %183 : f32 to vector<16x16xf32>
    %186 = arith.mulf %185, %184 : vector<16x16xf32>
    %187 = arith.addf %182, %186 : vector<16x16xf32>
    %c19 = arith.constant 19 : index
    %188 = memref.load %arg3[%c19] : memref<98xf32, #tpu.memory_space<smem>>
    %c2_100 = arith.constant 2 : index
    %c5_101 = arith.constant 5 : index
    %189 = vector.load %arg7[%c2_100, %c5_101] : memref<22x22xf32, #tpu.memory_space<vmem>>, vector<16x16xf32>
    %190 = vector.broadcast %188 : f32 to vector<16x16xf32>
    %191 = arith.mulf %190, %189 : vector<16x16xf32>
    %192 = arith.addf %187, %191 : vector<16x16xf32>
    %c20 = arith.constant 20 : index
    %193 = memref.load %arg3[%c20] : memref<98xf32, #tpu.memory_space<smem>>
    %c2_102 = arith.constant 2 : index
    %c6_103 = arith.constant 6 : index
    %194 = vector.load %arg7[%c2_102, %c6_103] : memref<22x22xf32, #tpu.memory_space<vmem>>, vector<16x16xf32>
    %195 = vector.broadcast %193 : f32 to vector<16x16xf32>
    %196 = arith.mulf %195, %194 : vector<16x16xf32>
    %197 = arith.addf %192, %196 : vector<16x16xf32>
    %c21 = arith.constant 21 : index
    %198 = memref.load %arg3[%c21] : memref<98xf32, #tpu.memory_space<smem>>
    %c3_104 = arith.constant 3 : index
    %c0_105 = arith.constant 0 : index
    %199 = vector.load %arg7[%c3_104, %c0_105] : memref<22x22xf32, #tpu.memory_space<vmem>>, vector<16x16xf32>
    %200 = vector.broadcast %198 : f32 to vector<16x16xf32>
    %201 = arith.mulf %200, %199 : vector<16x16xf32>
    %202 = arith.addf %197, %201 : vector<16x16xf32>
    %c22 = arith.constant 22 : index
    %203 = memref.load %arg3[%c22] : memref<98xf32, #tpu.memory_space<smem>>
    %c3_106 = arith.constant 3 : index
    %c1_107 = arith.constant 1 : index
    %204 = vector.load %arg7[%c3_106, %c1_107] : memref<22x22xf32, #tpu.memory_space<vmem>>, vector<16x16xf32>
    %205 = vector.broadcast %203 : f32 to vector<16x16xf32>
    %206 = arith.mulf %205, %204 : vector<16x16xf32>
    %207 = arith.addf %202, %206 : vector<16x16xf32>
    %c23 = arith.constant 23 : index
    %208 = memref.load %arg3[%c23] : memref<98xf32, #tpu.memory_space<smem>>
    %c3_108 = arith.constant 3 : index
    %c2_109 = arith.constant 2 : index
    %209 = vector.load %arg7[%c3_108, %c2_109] : memref<22x22xf32, #tpu.memory_space<vmem>>, vector<16x16xf32>
    %210 = vector.broadcast %208 : f32 to vector<16x16xf32>
    %211 = arith.mulf %210, %209 : vector<16x16xf32>
    %212 = arith.addf %207, %211 : vector<16x16xf32>
    %c24 = arith.constant 24 : index
    %213 = memref.load %arg3[%c24] : memref<98xf32, #tpu.memory_space<smem>>
    %c3_110 = arith.constant 3 : index
    %c3_111 = arith.constant 3 : index
    %214 = vector.load %arg7[%c3_110, %c3_111] : memref<22x22xf32, #tpu.memory_space<vmem>>, vector<16x16xf32>
    %215 = vector.broadcast %213 : f32 to vector<16x16xf32>
    %216 = arith.mulf %215, %214 : vector<16x16xf32>
    %217 = arith.addf %212, %216 : vector<16x16xf32>
    %c25 = arith.constant 25 : index
    %218 = memref.load %arg3[%c25] : memref<98xf32, #tpu.memory_space<smem>>
    %c3_112 = arith.constant 3 : index
    %c4_113 = arith.constant 4 : index
    %219 = vector.load %arg7[%c3_112, %c4_113] : memref<22x22xf32, #tpu.memory_space<vmem>>, vector<16x16xf32>
    %220 = vector.broadcast %218 : f32 to vector<16x16xf32>
    %221 = arith.mulf %220, %219 : vector<16x16xf32>
    %222 = arith.addf %217, %221 : vector<16x16xf32>
    %c26 = arith.constant 26 : index
    %223 = memref.load %arg3[%c26] : memref<98xf32, #tpu.memory_space<smem>>
    %c3_114 = arith.constant 3 : index
    %c5_115 = arith.constant 5 : index
    %224 = vector.load %arg7[%c3_114, %c5_115] : memref<22x22xf32, #tpu.memory_space<vmem>>, vector<16x16xf32>
    %225 = vector.broadcast %223 : f32 to vector<16x16xf32>
    %226 = arith.mulf %225, %224 : vector<16x16xf32>
    %227 = arith.addf %222, %226 : vector<16x16xf32>
    %c27 = arith.constant 27 : index
    %228 = memref.load %arg3[%c27] : memref<98xf32, #tpu.memory_space<smem>>
    %c3_116 = arith.constant 3 : index
    %c6_117 = arith.constant 6 : index
    %229 = vector.load %arg7[%c3_116, %c6_117] : memref<22x22xf32, #tpu.memory_space<vmem>>, vector<16x16xf32>
    %230 = vector.broadcast %228 : f32 to vector<16x16xf32>
    %231 = arith.mulf %230, %229 : vector<16x16xf32>
    %232 = arith.addf %227, %231 : vector<16x16xf32>
    %c28 = arith.constant 28 : index
    %233 = memref.load %arg3[%c28] : memref<98xf32, #tpu.memory_space<smem>>
    %c4_118 = arith.constant 4 : index
    %c0_119 = arith.constant 0 : index
    %234 = vector.load %arg7[%c4_118, %c0_119] : memref<22x22xf32, #tpu.memory_space<vmem>>, vector<16x16xf32>
    %235 = vector.broadcast %233 : f32 to vector<16x16xf32>
    %236 = arith.mulf %235, %234 : vector<16x16xf32>
    %237 = arith.addf %232, %236 : vector<16x16xf32>
    %c29 = arith.constant 29 : index
    %238 = memref.load %arg3[%c29] : memref<98xf32, #tpu.memory_space<smem>>
    %c4_120 = arith.constant 4 : index
    %c1_121 = arith.constant 1 : index
    %239 = vector.load %arg7[%c4_120, %c1_121] : memref<22x22xf32, #tpu.memory_space<vmem>>, vector<16x16xf32>
    %240 = vector.broadcast %238 : f32 to vector<16x16xf32>
    %241 = arith.mulf %240, %239 : vector<16x16xf32>
    %242 = arith.addf %237, %241 : vector<16x16xf32>
    %c30 = arith.constant 30 : index
    %243 = memref.load %arg3[%c30] : memref<98xf32, #tpu.memory_space<smem>>
    %c4_122 = arith.constant 4 : index
    %c2_123 = arith.constant 2 : index
    %244 = vector.load %arg7[%c4_122, %c2_123] : memref<22x22xf32, #tpu.memory_space<vmem>>, vector<16x16xf32>
    %245 = vector.broadcast %243 : f32 to vector<16x16xf32>
    %246 = arith.mulf %245, %244 : vector<16x16xf32>
    %247 = arith.addf %242, %246 : vector<16x16xf32>
    %c31 = arith.constant 31 : index
    %248 = memref.load %arg3[%c31] : memref<98xf32, #tpu.memory_space<smem>>
    %c4_124 = arith.constant 4 : index
    %c3_125 = arith.constant 3 : index
    %249 = vector.load %arg7[%c4_124, %c3_125] : memref<22x22xf32, #tpu.memory_space<vmem>>, vector<16x16xf32>
    %250 = vector.broadcast %248 : f32 to vector<16x16xf32>
    %251 = arith.mulf %250, %249 : vector<16x16xf32>
    %252 = arith.addf %247, %251 : vector<16x16xf32>
    %c32_126 = arith.constant 32 : index
    %253 = memref.load %arg3[%c32_126] : memref<98xf32, #tpu.memory_space<smem>>
    %c4_127 = arith.constant 4 : index
    %c4_128 = arith.constant 4 : index
    %254 = vector.load %arg7[%c4_127, %c4_128] : memref<22x22xf32, #tpu.memory_space<vmem>>, vector<16x16xf32>
    %255 = vector.broadcast %253 : f32 to vector<16x16xf32>
    %256 = arith.mulf %255, %254 : vector<16x16xf32>
    %257 = arith.addf %252, %256 : vector<16x16xf32>
    %c33 = arith.constant 33 : index
    %258 = memref.load %arg3[%c33] : memref<98xf32, #tpu.memory_space<smem>>
    %c4_129 = arith.constant 4 : index
    %c5_130 = arith.constant 5 : index
    %259 = vector.load %arg7[%c4_129, %c5_130] : memref<22x22xf32, #tpu.memory_space<vmem>>, vector<16x16xf32>
    %260 = vector.broadcast %258 : f32 to vector<16x16xf32>
    %261 = arith.mulf %260, %259 : vector<16x16xf32>
    %262 = arith.addf %257, %261 : vector<16x16xf32>
    %c34 = arith.constant 34 : index
    %263 = memref.load %arg3[%c34] : memref<98xf32, #tpu.memory_space<smem>>
    %c4_131 = arith.constant 4 : index
    %c6_132 = arith.constant 6 : index
    %264 = vector.load %arg7[%c4_131, %c6_132] : memref<22x22xf32, #tpu.memory_space<vmem>>, vector<16x16xf32>
    %265 = vector.broadcast %263 : f32 to vector<16x16xf32>
    %266 = arith.mulf %265, %264 : vector<16x16xf32>
    %267 = arith.addf %262, %266 : vector<16x16xf32>
    %c35 = arith.constant 35 : index
    %268 = memref.load %arg3[%c35] : memref<98xf32, #tpu.memory_space<smem>>
    %c5_133 = arith.constant 5 : index
    %c0_134 = arith.constant 0 : index
    %269 = vector.load %arg7[%c5_133, %c0_134] : memref<22x22xf32, #tpu.memory_space<vmem>>, vector<16x16xf32>
    %270 = vector.broadcast %268 : f32 to vector<16x16xf32>
    %271 = arith.mulf %270, %269 : vector<16x16xf32>
    %272 = arith.addf %267, %271 : vector<16x16xf32>
    %c36 = arith.constant 36 : index
    %273 = memref.load %arg3[%c36] : memref<98xf32, #tpu.memory_space<smem>>
    %c5_135 = arith.constant 5 : index
    %c1_136 = arith.constant 1 : index
    %274 = vector.load %arg7[%c5_135, %c1_136] : memref<22x22xf32, #tpu.memory_space<vmem>>, vector<16x16xf32>
    %275 = vector.broadcast %273 : f32 to vector<16x16xf32>
    %276 = arith.mulf %275, %274 : vector<16x16xf32>
    %277 = arith.addf %272, %276 : vector<16x16xf32>
    %c37 = arith.constant 37 : index
    %278 = memref.load %arg3[%c37] : memref<98xf32, #tpu.memory_space<smem>>
    %c5_137 = arith.constant 5 : index
    %c2_138 = arith.constant 2 : index
    %279 = vector.load %arg7[%c5_137, %c2_138] : memref<22x22xf32, #tpu.memory_space<vmem>>, vector<16x16xf32>
    %280 = vector.broadcast %278 : f32 to vector<16x16xf32>
    %281 = arith.mulf %280, %279 : vector<16x16xf32>
    %282 = arith.addf %277, %281 : vector<16x16xf32>
    %c38 = arith.constant 38 : index
    %283 = memref.load %arg3[%c38] : memref<98xf32, #tpu.memory_space<smem>>
    %c5_139 = arith.constant 5 : index
    %c3_140 = arith.constant 3 : index
    %284 = vector.load %arg7[%c5_139, %c3_140] : memref<22x22xf32, #tpu.memory_space<vmem>>, vector<16x16xf32>
    %285 = vector.broadcast %283 : f32 to vector<16x16xf32>
    %286 = arith.mulf %285, %284 : vector<16x16xf32>
    %287 = arith.addf %282, %286 : vector<16x16xf32>
    %c39 = arith.constant 39 : index
    %288 = memref.load %arg3[%c39] : memref<98xf32, #tpu.memory_space<smem>>
    %c5_141 = arith.constant 5 : index
    %c4_142 = arith.constant 4 : index
    %289 = vector.load %arg7[%c5_141, %c4_142] : memref<22x22xf32, #tpu.memory_space<vmem>>, vector<16x16xf32>
    %290 = vector.broadcast %288 : f32 to vector<16x16xf32>
    %291 = arith.mulf %290, %289 : vector<16x16xf32>
    %292 = arith.addf %287, %291 : vector<16x16xf32>
    %c40 = arith.constant 40 : index
    %293 = memref.load %arg3[%c40] : memref<98xf32, #tpu.memory_space<smem>>
    %c5_143 = arith.constant 5 : index
    %c5_144 = arith.constant 5 : index
    %294 = vector.load %arg7[%c5_143, %c5_144] : memref<22x22xf32, #tpu.memory_space<vmem>>, vector<16x16xf32>
    %295 = vector.broadcast %293 : f32 to vector<16x16xf32>
    %296 = arith.mulf %295, %294 : vector<16x16xf32>
    %297 = arith.addf %292, %296 : vector<16x16xf32>
    %c41 = arith.constant 41 : index
    %298 = memref.load %arg3[%c41] : memref<98xf32, #tpu.memory_space<smem>>
    %c5_145 = arith.constant 5 : index
    %c6_146 = arith.constant 6 : index
    %299 = vector.load %arg7[%c5_145, %c6_146] : memref<22x22xf32, #tpu.memory_space<vmem>>, vector<16x16xf32>
    %300 = vector.broadcast %298 : f32 to vector<16x16xf32>
    %301 = arith.mulf %300, %299 : vector<16x16xf32>
    %302 = arith.addf %297, %301 : vector<16x16xf32>
    %c42 = arith.constant 42 : index
    %303 = memref.load %arg3[%c42] : memref<98xf32, #tpu.memory_space<smem>>
    %c6_147 = arith.constant 6 : index
    %c0_148 = arith.constant 0 : index
    %304 = vector.load %arg7[%c6_147, %c0_148] : memref<22x22xf32, #tpu.memory_space<vmem>>, vector<16x16xf32>
    %305 = vector.broadcast %303 : f32 to vector<16x16xf32>
    %306 = arith.mulf %305, %304 : vector<16x16xf32>
    %307 = arith.addf %302, %306 : vector<16x16xf32>
    %c43 = arith.constant 43 : index
    %308 = memref.load %arg3[%c43] : memref<98xf32, #tpu.memory_space<smem>>
    %c6_149 = arith.constant 6 : index
    %c1_150 = arith.constant 1 : index
    %309 = vector.load %arg7[%c6_149, %c1_150] : memref<22x22xf32, #tpu.memory_space<vmem>>, vector<16x16xf32>
    %310 = vector.broadcast %308 : f32 to vector<16x16xf32>
    %311 = arith.mulf %310, %309 : vector<16x16xf32>
    %312 = arith.addf %307, %311 : vector<16x16xf32>
    %c44 = arith.constant 44 : index
    %313 = memref.load %arg3[%c44] : memref<98xf32, #tpu.memory_space<smem>>
    %c6_151 = arith.constant 6 : index
    %c2_152 = arith.constant 2 : index
    %314 = vector.load %arg7[%c6_151, %c2_152] : memref<22x22xf32, #tpu.memory_space<vmem>>, vector<16x16xf32>
    %315 = vector.broadcast %313 : f32 to vector<16x16xf32>
    %316 = arith.mulf %315, %314 : vector<16x16xf32>
    %317 = arith.addf %312, %316 : vector<16x16xf32>
    %c45 = arith.constant 45 : index
    %318 = memref.load %arg3[%c45] : memref<98xf32, #tpu.memory_space<smem>>
    %c6_153 = arith.constant 6 : index
    %c3_154 = arith.constant 3 : index
    %319 = vector.load %arg7[%c6_153, %c3_154] : memref<22x22xf32, #tpu.memory_space<vmem>>, vector<16x16xf32>
    %320 = vector.broadcast %318 : f32 to vector<16x16xf32>
    %321 = arith.mulf %320, %319 : vector<16x16xf32>
    %322 = arith.addf %317, %321 : vector<16x16xf32>
    %c46 = arith.constant 46 : index
    %323 = memref.load %arg3[%c46] : memref<98xf32, #tpu.memory_space<smem>>
    %c6_155 = arith.constant 6 : index
    %c4_156 = arith.constant 4 : index
    %324 = vector.load %arg7[%c6_155, %c4_156] : memref<22x22xf32, #tpu.memory_space<vmem>>, vector<16x16xf32>
    %325 = vector.broadcast %323 : f32 to vector<16x16xf32>
    %326 = arith.mulf %325, %324 : vector<16x16xf32>
    %327 = arith.addf %322, %326 : vector<16x16xf32>
    %c47 = arith.constant 47 : index
    %328 = memref.load %arg3[%c47] : memref<98xf32, #tpu.memory_space<smem>>
    %c6_157 = arith.constant 6 : index
    %c5_158 = arith.constant 5 : index
    %329 = vector.load %arg7[%c6_157, %c5_158] : memref<22x22xf32, #tpu.memory_space<vmem>>, vector<16x16xf32>
    %330 = vector.broadcast %328 : f32 to vector<16x16xf32>
    %331 = arith.mulf %330, %329 : vector<16x16xf32>
    %332 = arith.addf %327, %331 : vector<16x16xf32>
    %c48_159 = arith.constant 48 : index
    %333 = memref.load %arg3[%c48_159] : memref<98xf32, #tpu.memory_space<smem>>
    %c6_160 = arith.constant 6 : index
    %c6_161 = arith.constant 6 : index
    %334 = vector.load %arg7[%c6_160, %c6_161] : memref<22x22xf32, #tpu.memory_space<vmem>>, vector<16x16xf32>
    %335 = vector.broadcast %333 : f32 to vector<16x16xf32>
    %336 = arith.mulf %335, %334 : vector<16x16xf32>
    %337 = arith.addf %332, %336 : vector<16x16xf32>
    %c0_162 = arith.constant 0 : index
    %c0_163 = arith.constant 0 : index
    %338 = vector.load %arg6[%c0_162, %c0_163] : memref<1x256xf32, #tpu.memory_space<vmem>>, vector<1x16xf32>
    %339 = vector.shape_cast %338 : vector<1x16xf32> to vector<16xf32>
    %cst_164 = arith.constant 2.500000e-01 : f32
    %340 = vector.broadcast %cst_164 : f32 to vector<16xf32>
    %341 = arith.mulf %339, %340 : vector<16xf32>
    %c3_165 = arith.constant 3 : index
    %c3_166 = arith.constant 3 : index
    %342 = vector.load %arg7[%c3_165, %c3_166] : memref<22x22xf32, #tpu.memory_space<vmem>>, vector<1x16xf32>
    %343 = vector.shape_cast %342 : vector<1x16xf32> to vector<16xf32>
    %344 = vector.shape_cast %341 : vector<16xf32> to vector<1x16xf32>
    tpu.vector_store %arg7[%c3_165, %c3_166], %344 {strides = array<i32>} : memref<22x22xf32, #tpu.memory_space<vmem>>, vector<1x16xf32>,
    %c0_167 = arith.constant 0 : index
    %c16_168 = arith.constant 16 : index
    %345 = vector.load %arg6[%c0_167, %c16_168] : memref<1x256xf32, #tpu.memory_space<vmem>>, vector<1x16xf32>
    %346 = vector.shape_cast %345 : vector<1x16xf32> to vector<16xf32>
    %cst_169 = arith.constant 2.500000e-01 : f32
    %347 = vector.broadcast %cst_169 : f32 to vector<16xf32>
    %348 = arith.mulf %346, %347 : vector<16xf32>
    %c4_170 = arith.constant 4 : index
    %c3_171 = arith.constant 3 : index
    %349 = vector.load %arg7[%c4_170, %c3_171] : memref<22x22xf32, #tpu.memory_space<vmem>>, vector<1x16xf32>
    %350 = vector.shape_cast %349 : vector<1x16xf32> to vector<16xf32>
    %351 = vector.shape_cast %348 : vector<16xf32> to vector<1x16xf32>
    tpu.vector_store %arg7[%c4_170, %c3_171], %351 {strides = array<i32>} : memref<22x22xf32, #tpu.memory_space<vmem>>, vector<1x16xf32>,
    %c0_172 = arith.constant 0 : index
    %c32_173 = arith.constant 32 : index
    %352 = vector.load %arg6[%c0_172, %c32_173] : memref<1x256xf32, #tpu.memory_space<vmem>>, vector<1x16xf32>
    %353 = vector.shape_cast %352 : vector<1x16xf32> to vector<16xf32>
    %cst_174 = arith.constant 2.500000e-01 : f32
    %354 = vector.broadcast %cst_174 : f32 to vector<16xf32>
    %355 = arith.mulf %353, %354 : vector<16xf32>
    %c5_175 = arith.constant 5 : index
    %c3_176 = arith.constant 3 : index
    %356 = vector.load %arg7[%c5_175, %c3_176] : memref<22x22xf32, #tpu.memory_space<vmem>>, vector<1x16xf32>
    %357 = vector.shape_cast %356 : vector<1x16xf32> to vector<16xf32>
    %358 = vector.shape_cast %355 : vector<16xf32> to vector<1x16xf32>
    tpu.vector_store %arg7[%c5_175, %c3_176], %358 {strides = array<i32>} : memref<22x22xf32, #tpu.memory_space<vmem>>, vector<1x16xf32>,
    %c0_177 = arith.constant 0 : index
    %c48_178 = arith.constant 48 : index
    %359 = vector.load %arg6[%c0_177, %c48_178] : memref<1x256xf32, #tpu.memory_space<vmem>>, vector<1x16xf32>
    %360 = vector.shape_cast %359 : vector<1x16xf32> to vector<16xf32>
    %cst_179 = arith.constant 2.500000e-01 : f32
    %361 = vector.broadcast %cst_179 : f32 to vector<16xf32>
    %362 = arith.mulf %360, %361 : vector<16xf32>
    %c6_180 = arith.constant 6 : index
    %c3_181 = arith.constant 3 : index
    %363 = vector.load %arg7[%c6_180, %c3_181] : memref<22x22xf32, #tpu.memory_space<vmem>>, vector<1x16xf32>
    %364 = vector.shape_cast %363 : vector<1x16xf32> to vector<16xf32>
    %365 = vector.shape_cast %362 : vector<16xf32> to vector<1x16xf32>
    tpu.vector_store %arg7[%c6_180, %c3_181], %365 {strides = array<i32>} : memref<22x22xf32, #tpu.memory_space<vmem>>, vector<1x16xf32>,
    %c0_182 = arith.constant 0 : index
    %c64_183 = arith.constant 64 : index
    %366 = vector.load %arg6[%c0_182, %c64_183] : memref<1x256xf32, #tpu.memory_space<vmem>>, vector<1x16xf32>
    %367 = vector.shape_cast %366 : vector<1x16xf32> to vector<16xf32>
    %cst_184 = arith.constant 2.500000e-01 : f32
    %368 = vector.broadcast %cst_184 : f32 to vector<16xf32>
    %369 = arith.mulf %367, %368 : vector<16xf32>
    %c7_185 = arith.constant 7 : index
    %c3_186 = arith.constant 3 : index
    %370 = vector.load %arg7[%c7_185, %c3_186] : memref<22x22xf32, #tpu.memory_space<vmem>>, vector<1x16xf32>
    %371 = vector.shape_cast %370 : vector<1x16xf32> to vector<16xf32>
    %372 = vector.shape_cast %369 : vector<16xf32> to vector<1x16xf32>
    tpu.vector_store %arg7[%c7_185, %c3_186], %372 {strides = array<i32>} : memref<22x22xf32, #tpu.memory_space<vmem>>, vector<1x16xf32>,
    %c0_187 = arith.constant 0 : index
    %c80_188 = arith.constant 80 : index
    %373 = vector.load %arg6[%c0_187, %c80_188] : memref<1x256xf32, #tpu.memory_space<vmem>>, vector<1x16xf32>
    %374 = vector.shape_cast %373 : vector<1x16xf32> to vector<16xf32>
    %cst_189 = arith.constant 2.500000e-01 : f32
    %375 = vector.broadcast %cst_189 : f32 to vector<16xf32>
    %376 = arith.mulf %374, %375 : vector<16xf32>
    %c8_190 = arith.constant 8 : index
    %c3_191 = arith.constant 3 : index
    %377 = vector.load %arg7[%c8_190, %c3_191] : memref<22x22xf32, #tpu.memory_space<vmem>>, vector<1x16xf32>
    %378 = vector.shape_cast %377 : vector<1x16xf32> to vector<16xf32>
    %379 = vector.shape_cast %376 : vector<16xf32> to vector<1x16xf32>
    tpu.vector_store %arg7[%c8_190, %c3_191], %379 {strides = array<i32>} : memref<22x22xf32, #tpu.memory_space<vmem>>, vector<1x16xf32>,
    %c0_192 = arith.constant 0 : index
    %c96_193 = arith.constant 96 : index
    %380 = vector.load %arg6[%c0_192, %c96_193] : memref<1x256xf32, #tpu.memory_space<vmem>>, vector<1x16xf32>
    %381 = vector.shape_cast %380 : vector<1x16xf32> to vector<16xf32>
    %cst_194 = arith.constant 2.500000e-01 : f32
    %382 = vector.broadcast %cst_194 : f32 to vector<16xf32>
    %383 = arith.mulf %381, %382 : vector<16xf32>
    %c9_195 = arith.constant 9 : index
    %c3_196 = arith.constant 3 : index
    %384 = vector.load %arg7[%c9_195, %c3_196] : memref<22x22xf32, #tpu.memory_space<vmem>>, vector<1x16xf32>
    %385 = vector.shape_cast %384 : vector<1x16xf32> to vector<16xf32>
    %386 = vector.shape_cast %383 : vector<16xf32> to vector<1x16xf32>
    tpu.vector_store %arg7[%c9_195, %c3_196], %386 {strides = array<i32>} : memref<22x22xf32, #tpu.memory_space<vmem>>, vector<1x16xf32>,
    %c0_197 = arith.constant 0 : index
    %c112_198 = arith.constant 112 : index
    %387 = vector.load %arg6[%c0_197, %c112_198] : memref<1x256xf32, #tpu.memory_space<vmem>>, vector<1x16xf32>
    %388 = vector.shape_cast %387 : vector<1x16xf32> to vector<16xf32>
    %cst_199 = arith.constant 2.500000e-01 : f32
    %389 = vector.broadcast %cst_199 : f32 to vector<16xf32>
    %390 = arith.mulf %388, %389 : vector<16xf32>
    %c10_200 = arith.constant 10 : index
    %c3_201 = arith.constant 3 : index
    %391 = vector.load %arg7[%c10_200, %c3_201] : memref<22x22xf32, #tpu.memory_space<vmem>>, vector<1x16xf32>
    %392 = vector.shape_cast %391 : vector<1x16xf32> to vector<16xf32>
    %393 = vector.shape_cast %390 : vector<16xf32> to vector<1x16xf32>
    tpu.vector_store %arg7[%c10_200, %c3_201], %393 {strides = array<i32>} : memref<22x22xf32, #tpu.memory_space<vmem>>, vector<1x16xf32>,
    %c0_202 = arith.constant 0 : index
    %c128_203 = arith.constant 128 : index
    %394 = vector.load %arg6[%c0_202, %c128_203] : memref<1x256xf32, #tpu.memory_space<vmem>>, vector<1x16xf32>
    %395 = vector.shape_cast %394 : vector<1x16xf32> to vector<16xf32>
    %cst_204 = arith.constant 2.500000e-01 : f32
    %396 = vector.broadcast %cst_204 : f32 to vector<16xf32>
    %397 = arith.mulf %395, %396 : vector<16xf32>
    %c11_205 = arith.constant 11 : index
    %c3_206 = arith.constant 3 : index
    %398 = vector.load %arg7[%c11_205, %c3_206] : memref<22x22xf32, #tpu.memory_space<vmem>>, vector<1x16xf32>
    %399 = vector.shape_cast %398 : vector<1x16xf32> to vector<16xf32>
    %400 = vector.shape_cast %397 : vector<16xf32> to vector<1x16xf32>
    tpu.vector_store %arg7[%c11_205, %c3_206], %400 {strides = array<i32>} : memref<22x22xf32, #tpu.memory_space<vmem>>, vector<1x16xf32>,
    %c0_207 = arith.constant 0 : index
    %c144_208 = arith.constant 144 : index
    %401 = vector.load %arg6[%c0_207, %c144_208] : memref<1x256xf32, #tpu.memory_space<vmem>>, vector<1x16xf32>
    %402 = vector.shape_cast %401 : vector<1x16xf32> to vector<16xf32>
    %cst_209 = arith.constant 2.500000e-01 : f32
    %403 = vector.broadcast %cst_209 : f32 to vector<16xf32>
    %404 = arith.mulf %402, %403 : vector<16xf32>
    %c12_210 = arith.constant 12 : index
    %c3_211 = arith.constant 3 : index
    %405 = vector.load %arg7[%c12_210, %c3_211] : memref<22x22xf32, #tpu.memory_space<vmem>>, vector<1x16xf32>
    %406 = vector.shape_cast %405 : vector<1x16xf32> to vector<16xf32>
    %407 = vector.shape_cast %404 : vector<16xf32> to vector<1x16xf32>
    tpu.vector_store %arg7[%c12_210, %c3_211], %407 {strides = array<i32>} : memref<22x22xf32, #tpu.memory_space<vmem>>, vector<1x16xf32>,
    %c0_212 = arith.constant 0 : index
    %c160_213 = arith.constant 160 : index
    %408 = vector.load %arg6[%c0_212, %c160_213] : memref<1x256xf32, #tpu.memory_space<vmem>>, vector<1x16xf32>
    %409 = vector.shape_cast %408 : vector<1x16xf32> to vector<16xf32>
    %cst_214 = arith.constant 2.500000e-01 : f32
    %410 = vector.broadcast %cst_214 : f32 to vector<16xf32>
    %411 = arith.mulf %409, %410 : vector<16xf32>
    %c13_215 = arith.constant 13 : index
    %c3_216 = arith.constant 3 : index
    %412 = vector.load %arg7[%c13_215, %c3_216] : memref<22x22xf32, #tpu.memory_space<vmem>>, vector<1x16xf32>
    %413 = vector.shape_cast %412 : vector<1x16xf32> to vector<16xf32>
    %414 = vector.shape_cast %411 : vector<16xf32> to vector<1x16xf32>
    tpu.vector_store %arg7[%c13_215, %c3_216], %414 {strides = array<i32>} : memref<22x22xf32, #tpu.memory_space<vmem>>, vector<1x16xf32>,
    %c0_217 = arith.constant 0 : index
    %c176_218 = arith.constant 176 : index
    %415 = vector.load %arg6[%c0_217, %c176_218] : memref<1x256xf32, #tpu.memory_space<vmem>>, vector<1x16xf32>
    %416 = vector.shape_cast %415 : vector<1x16xf32> to vector<16xf32>
    %cst_219 = arith.constant 2.500000e-01 : f32
    %417 = vector.broadcast %cst_219 : f32 to vector<16xf32>
    %418 = arith.mulf %416, %417 : vector<16xf32>
    %c14_220 = arith.constant 14 : index
    %c3_221 = arith.constant 3 : index
    %419 = vector.load %arg7[%c14_220, %c3_221] : memref<22x22xf32, #tpu.memory_space<vmem>>, vector<1x16xf32>
    %420 = vector.shape_cast %419 : vector<1x16xf32> to vector<16xf32>
    %421 = vector.shape_cast %418 : vector<16xf32> to vector<1x16xf32>
    tpu.vector_store %arg7[%c14_220, %c3_221], %421 {strides = array<i32>} : memref<22x22xf32, #tpu.memory_space<vmem>>, vector<1x16xf32>,
    %c0_222 = arith.constant 0 : index
    %c192_223 = arith.constant 192 : index
    %422 = vector.load %arg6[%c0_222, %c192_223] : memref<1x256xf32, #tpu.memory_space<vmem>>, vector<1x16xf32>
    %423 = vector.shape_cast %422 : vector<1x16xf32> to vector<16xf32>
    %cst_224 = arith.constant 2.500000e-01 : f32
    %424 = vector.broadcast %cst_224 : f32 to vector<16xf32>
    %425 = arith.mulf %423, %424 : vector<16xf32>
    %c15_225 = arith.constant 15 : index
    %c3_226 = arith.constant 3 : index
    %426 = vector.load %arg7[%c15_225, %c3_226] : memref<22x22xf32, #tpu.memory_space<vmem>>, vector<1x16xf32>
    %427 = vector.shape_cast %426 : vector<1x16xf32> to vector<16xf32>
    %428 = vector.shape_cast %425 : vector<16xf32> to vector<1x16xf32>
    tpu.vector_store %arg7[%c15_225, %c3_226], %428 {strides = array<i32>} : memref<22x22xf32, #tpu.memory_space<vmem>>, vector<1x16xf32>,
    %c0_227 = arith.constant 0 : index
    %c208_228 = arith.constant 208 : index
    %429 = vector.load %arg6[%c0_227, %c208_228] : memref<1x256xf32, #tpu.memory_space<vmem>>, vector<1x16xf32>
    %430 = vector.shape_cast %429 : vector<1x16xf32> to vector<16xf32>
    %cst_229 = arith.constant 2.500000e-01 : f32
    %431 = vector.broadcast %cst_229 : f32 to vector<16xf32>
    %432 = arith.mulf %430, %431 : vector<16xf32>
    %c16_230 = arith.constant 16 : index
    %c3_231 = arith.constant 3 : index
    %433 = vector.load %arg7[%c16_230, %c3_231] : memref<22x22xf32, #tpu.memory_space<vmem>>, vector<1x16xf32>
    %434 = vector.shape_cast %433 : vector<1x16xf32> to vector<16xf32>
    %435 = vector.shape_cast %432 : vector<16xf32> to vector<1x16xf32>
    tpu.vector_store %arg7[%c16_230, %c3_231], %435 {strides = array<i32>} : memref<22x22xf32, #tpu.memory_space<vmem>>, vector<1x16xf32>,
    %c0_232 = arith.constant 0 : index
    %c224_233 = arith.constant 224 : index
    %436 = vector.load %arg6[%c0_232, %c224_233] : memref<1x256xf32, #tpu.memory_space<vmem>>, vector<1x16xf32>
    %437 = vector.shape_cast %436 : vector<1x16xf32> to vector<16xf32>
    %cst_234 = arith.constant 2.500000e-01 : f32
    %438 = vector.broadcast %cst_234 : f32 to vector<16xf32>
    %439 = arith.mulf %437, %438 : vector<16xf32>
    %c17_235 = arith.constant 17 : index
    %c3_236 = arith.constant 3 : index
    %440 = vector.load %arg7[%c17_235, %c3_236] : memref<22x22xf32, #tpu.memory_space<vmem>>, vector<1x16xf32>
    %441 = vector.shape_cast %440 : vector<1x16xf32> to vector<16xf32>
    %442 = vector.shape_cast %439 : vector<16xf32> to vector<1x16xf32>
    tpu.vector_store %arg7[%c17_235, %c3_236], %442 {strides = array<i32>} : memref<22x22xf32, #tpu.memory_space<vmem>>, vector<1x16xf32>,
    %c0_237 = arith.constant 0 : index
    %c240_238 = arith.constant 240 : index
    %443 = vector.load %arg6[%c0_237, %c240_238] : memref<1x256xf32, #tpu.memory_space<vmem>>, vector<1x16xf32>
    %444 = vector.shape_cast %443 : vector<1x16xf32> to vector<16xf32>
    %cst_239 = arith.constant 2.500000e-01 : f32
    %445 = vector.broadcast %cst_239 : f32 to vector<16xf32>
    %446 = arith.mulf %444, %445 : vector<16xf32>
    %c18_240 = arith.constant 18 : index
    %c3_241 = arith.constant 3 : index
    %447 = vector.load %arg7[%c18_240, %c3_241] : memref<22x22xf32, #tpu.memory_space<vmem>>, vector<1x16xf32>
    %448 = vector.shape_cast %447 : vector<1x16xf32> to vector<16xf32>
    %449 = vector.shape_cast %446 : vector<16xf32> to vector<1x16xf32>
    tpu.vector_store %arg7[%c18_240, %c3_241], %449 {strides = array<i32>} : memref<22x22xf32, #tpu.memory_space<vmem>>, vector<1x16xf32>,
    %c49 = arith.constant 49 : index
    %450 = memref.load %arg3[%c49] : memref<98xf32, #tpu.memory_space<smem>>
    %c0_242 = arith.constant 0 : index
    %c0_243 = arith.constant 0 : index
    %451 = vector.load %arg7[%c0_242, %c0_243] : memref<22x22xf32, #tpu.memory_space<vmem>>, vector<16x16xf32>
    %452 = vector.broadcast %450 : f32 to vector<16x16xf32>
    %453 = arith.mulf %452, %451 : vector<16x16xf32>
    %454 = arith.addf %337, %453 : vector<16x16xf32>
    %c50 = arith.constant 50 : index
    %455 = memref.load %arg3[%c50] : memref<98xf32, #tpu.memory_space<smem>>
    %c0_244 = arith.constant 0 : index
    %c1_245 = arith.constant 1 : index
    %456 = vector.load %arg7[%c0_244, %c1_245] : memref<22x22xf32, #tpu.memory_space<vmem>>, vector<16x16xf32>
    %457 = vector.broadcast %455 : f32 to vector<16x16xf32>
    %458 = arith.mulf %457, %456 : vector<16x16xf32>
    %459 = arith.addf %454, %458 : vector<16x16xf32>
    %c51 = arith.constant 51 : index
    %460 = memref.load %arg3[%c51] : memref<98xf32, #tpu.memory_space<smem>>
    %c0_246 = arith.constant 0 : index
    %c2_247 = arith.constant 2 : index
    %461 = vector.load %arg7[%c0_246, %c2_247] : memref<22x22xf32, #tpu.memory_space<vmem>>, vector<16x16xf32>
    %462 = vector.broadcast %460 : f32 to vector<16x16xf32>
    %463 = arith.mulf %462, %461 : vector<16x16xf32>
    %464 = arith.addf %459, %463 : vector<16x16xf32>
    %c52 = arith.constant 52 : index
    %465 = memref.load %arg3[%c52] : memref<98xf32, #tpu.memory_space<smem>>
    %c0_248 = arith.constant 0 : index
    %c3_249 = arith.constant 3 : index
    %466 = vector.load %arg7[%c0_248, %c3_249] : memref<22x22xf32, #tpu.memory_space<vmem>>, vector<16x16xf32>
    %467 = vector.broadcast %465 : f32 to vector<16x16xf32>
    %468 = arith.mulf %467, %466 : vector<16x16xf32>
    %469 = arith.addf %464, %468 : vector<16x16xf32>
    %c53 = arith.constant 53 : index
    %470 = memref.load %arg3[%c53] : memref<98xf32, #tpu.memory_space<smem>>
    %c0_250 = arith.constant 0 : index
    %c4_251 = arith.constant 4 : index
    %471 = vector.load %arg7[%c0_250, %c4_251] : memref<22x22xf32, #tpu.memory_space<vmem>>, vector<16x16xf32>
    %472 = vector.broadcast %470 : f32 to vector<16x16xf32>
    %473 = arith.mulf %472, %471 : vector<16x16xf32>
    %474 = arith.addf %469, %473 : vector<16x16xf32>
    %c54 = arith.constant 54 : index
    %475 = memref.load %arg3[%c54] : memref<98xf32, #tpu.memory_space<smem>>
    %c0_252 = arith.constant 0 : index
    %c5_253 = arith.constant 5 : index
    %476 = vector.load %arg7[%c0_252, %c5_253] : memref<22x22xf32, #tpu.memory_space<vmem>>, vector<16x16xf32>
    %477 = vector.broadcast %475 : f32 to vector<16x16xf32>
    %478 = arith.mulf %477, %476 : vector<16x16xf32>
    %479 = arith.addf %474, %478 : vector<16x16xf32>
    %c55 = arith.constant 55 : index
    %480 = memref.load %arg3[%c55] : memref<98xf32, #tpu.memory_space<smem>>
    %c0_254 = arith.constant 0 : index
    %c6_255 = arith.constant 6 : index
    %481 = vector.load %arg7[%c0_254, %c6_255] : memref<22x22xf32, #tpu.memory_space<vmem>>, vector<16x16xf32>
    %482 = vector.broadcast %480 : f32 to vector<16x16xf32>
    %483 = arith.mulf %482, %481 : vector<16x16xf32>
    %484 = arith.addf %479, %483 : vector<16x16xf32>
    %c56 = arith.constant 56 : index
    %485 = memref.load %arg3[%c56] : memref<98xf32, #tpu.memory_space<smem>>
    %c1_256 = arith.constant 1 : index
    %c0_257 = arith.constant 0 : index
    %486 = vector.load %arg7[%c1_256, %c0_257] : memref<22x22xf32, #tpu.memory_space<vmem>>, vector<16x16xf32>
    %487 = vector.broadcast %485 : f32 to vector<16x16xf32>
    %488 = arith.mulf %487, %486 : vector<16x16xf32>
    %489 = arith.addf %484, %488 : vector<16x16xf32>
    %c57 = arith.constant 57 : index
    %490 = memref.load %arg3[%c57] : memref<98xf32, #tpu.memory_space<smem>>
    %c1_258 = arith.constant 1 : index
    %c1_259 = arith.constant 1 : index
    %491 = vector.load %arg7[%c1_258, %c1_259] : memref<22x22xf32, #tpu.memory_space<vmem>>, vector<16x16xf32>
    %492 = vector.broadcast %490 : f32 to vector<16x16xf32>
    %493 = arith.mulf %492, %491 : vector<16x16xf32>
    %494 = arith.addf %489, %493 : vector<16x16xf32>
    %c58 = arith.constant 58 : index
    %495 = memref.load %arg3[%c58] : memref<98xf32, #tpu.memory_space<smem>>
    %c1_260 = arith.constant 1 : index
    %c2_261 = arith.constant 2 : index
    %496 = vector.load %arg7[%c1_260, %c2_261] : memref<22x22xf32, #tpu.memory_space<vmem>>, vector<16x16xf32>
    %497 = vector.broadcast %495 : f32 to vector<16x16xf32>
    %498 = arith.mulf %497, %496 : vector<16x16xf32>
    %499 = arith.addf %494, %498 : vector<16x16xf32>
    %c59 = arith.constant 59 : index
    %500 = memref.load %arg3[%c59] : memref<98xf32, #tpu.memory_space<smem>>
    %c1_262 = arith.constant 1 : index
    %c3_263 = arith.constant 3 : index
    %501 = vector.load %arg7[%c1_262, %c3_263] : memref<22x22xf32, #tpu.memory_space<vmem>>, vector<16x16xf32>
    %502 = vector.broadcast %500 : f32 to vector<16x16xf32>
    %503 = arith.mulf %502, %501 : vector<16x16xf32>
    %504 = arith.addf %499, %503 : vector<16x16xf32>
    %c60 = arith.constant 60 : index
    %505 = memref.load %arg3[%c60] : memref<98xf32, #tpu.memory_space<smem>>
    %c1_264 = arith.constant 1 : index
    %c4_265 = arith.constant 4 : index
    %506 = vector.load %arg7[%c1_264, %c4_265] : memref<22x22xf32, #tpu.memory_space<vmem>>, vector<16x16xf32>
    %507 = vector.broadcast %505 : f32 to vector<16x16xf32>
    %508 = arith.mulf %507, %506 : vector<16x16xf32>
    %509 = arith.addf %504, %508 : vector<16x16xf32>
    %c61 = arith.constant 61 : index
    %510 = memref.load %arg3[%c61] : memref<98xf32, #tpu.memory_space<smem>>
    %c1_266 = arith.constant 1 : index
    %c5_267 = arith.constant 5 : index
    %511 = vector.load %arg7[%c1_266, %c5_267] : memref<22x22xf32, #tpu.memory_space<vmem>>, vector<16x16xf32>
    %512 = vector.broadcast %510 : f32 to vector<16x16xf32>
    %513 = arith.mulf %512, %511 : vector<16x16xf32>
    %514 = arith.addf %509, %513 : vector<16x16xf32>
    %c62 = arith.constant 62 : index
    %515 = memref.load %arg3[%c62] : memref<98xf32, #tpu.memory_space<smem>>
    %c1_268 = arith.constant 1 : index
    %c6_269 = arith.constant 6 : index
    %516 = vector.load %arg7[%c1_268, %c6_269] : memref<22x22xf32, #tpu.memory_space<vmem>>, vector<16x16xf32>
    %517 = vector.broadcast %515 : f32 to vector<16x16xf32>
    %518 = arith.mulf %517, %516 : vector<16x16xf32>
    %519 = arith.addf %514, %518 : vector<16x16xf32>
    %c63 = arith.constant 63 : index
    %520 = memref.load %arg3[%c63] : memref<98xf32, #tpu.memory_space<smem>>
    %c2_270 = arith.constant 2 : index
    %c0_271 = arith.constant 0 : index
    %521 = vector.load %arg7[%c2_270, %c0_271] : memref<22x22xf32, #tpu.memory_space<vmem>>, vector<16x16xf32>
    %522 = vector.broadcast %520 : f32 to vector<16x16xf32>
    %523 = arith.mulf %522, %521 : vector<16x16xf32>
    %524 = arith.addf %519, %523 : vector<16x16xf32>
    %c64_272 = arith.constant 64 : index
    %525 = memref.load %arg3[%c64_272] : memref<98xf32, #tpu.memory_space<smem>>
    %c2_273 = arith.constant 2 : index
    %c1_274 = arith.constant 1 : index
    %526 = vector.load %arg7[%c2_273, %c1_274] : memref<22x22xf32, #tpu.memory_space<vmem>>, vector<16x16xf32>
    %527 = vector.broadcast %525 : f32 to vector<16x16xf32>
    %528 = arith.mulf %527, %526 : vector<16x16xf32>
    %529 = arith.addf %524, %528 : vector<16x16xf32>
    %c65 = arith.constant 65 : index
    %530 = memref.load %arg3[%c65] : memref<98xf32, #tpu.memory_space<smem>>
    %c2_275 = arith.constant 2 : index
    %c2_276 = arith.constant 2 : index
    %531 = vector.load %arg7[%c2_275, %c2_276] : memref<22x22xf32, #tpu.memory_space<vmem>>, vector<16x16xf32>
    %532 = vector.broadcast %530 : f32 to vector<16x16xf32>
    %533 = arith.mulf %532, %531 : vector<16x16xf32>
    %534 = arith.addf %529, %533 : vector<16x16xf32>
    %c66 = arith.constant 66 : index
    %535 = memref.load %arg3[%c66] : memref<98xf32, #tpu.memory_space<smem>>
    %c2_277 = arith.constant 2 : index
    %c3_278 = arith.constant 3 : index
    %536 = vector.load %arg7[%c2_277, %c3_278] : memref<22x22xf32, #tpu.memory_space<vmem>>, vector<16x16xf32>
    %537 = vector.broadcast %535 : f32 to vector<16x16xf32>
    %538 = arith.mulf %537, %536 : vector<16x16xf32>
    %539 = arith.addf %534, %538 : vector<16x16xf32>
    %c67 = arith.constant 67 : index
    %540 = memref.load %arg3[%c67] : memref<98xf32, #tpu.memory_space<smem>>
    %c2_279 = arith.constant 2 : index
    %c4_280 = arith.constant 4 : index
    %541 = vector.load %arg7[%c2_279, %c4_280] : memref<22x22xf32, #tpu.memory_space<vmem>>, vector<16x16xf32>
    %542 = vector.broadcast %540 : f32 to vector<16x16xf32>
    %543 = arith.mulf %542, %541 : vector<16x16xf32>
    %544 = arith.addf %539, %543 : vector<16x16xf32>
    %c68 = arith.constant 68 : index
    %545 = memref.load %arg3[%c68] : memref<98xf32, #tpu.memory_space<smem>>
    %c2_281 = arith.constant 2 : index
    %c5_282 = arith.constant 5 : index
    %546 = vector.load %arg7[%c2_281, %c5_282] : memref<22x22xf32, #tpu.memory_space<vmem>>, vector<16x16xf32>
    %547 = vector.broadcast %545 : f32 to vector<16x16xf32>
    %548 = arith.mulf %547, %546 : vector<16x16xf32>
    %549 = arith.addf %544, %548 : vector<16x16xf32>
    %c69 = arith.constant 69 : index
    %550 = memref.load %arg3[%c69] : memref<98xf32, #tpu.memory_space<smem>>
    %c2_283 = arith.constant 2 : index
    %c6_284 = arith.constant 6 : index
    %551 = vector.load %arg7[%c2_283, %c6_284] : memref<22x22xf32, #tpu.memory_space<vmem>>, vector<16x16xf32>
    %552 = vector.broadcast %550 : f32 to vector<16x16xf32>
    %553 = arith.mulf %552, %551 : vector<16x16xf32>
    %554 = arith.addf %549, %553 : vector<16x16xf32>
    %c70 = arith.constant 70 : index
    %555 = memref.load %arg3[%c70] : memref<98xf32, #tpu.memory_space<smem>>
    %c3_285 = arith.constant 3 : index
    %c0_286 = arith.constant 0 : index
    %556 = vector.load %arg7[%c3_285, %c0_286] : memref<22x22xf32, #tpu.memory_space<vmem>>, vector<16x16xf32>
    %557 = vector.broadcast %555 : f32 to vector<16x16xf32>
    %558 = arith.mulf %557, %556 : vector<16x16xf32>
    %559 = arith.addf %554, %558 : vector<16x16xf32>
    %c71 = arith.constant 71 : index
    %560 = memref.load %arg3[%c71] : memref<98xf32, #tpu.memory_space<smem>>
    %c3_287 = arith.constant 3 : index
    %c1_288 = arith.constant 1 : index
    %561 = vector.load %arg7[%c3_287, %c1_288] : memref<22x22xf32, #tpu.memory_space<vmem>>, vector<16x16xf32>
    %562 = vector.broadcast %560 : f32 to vector<16x16xf32>
    %563 = arith.mulf %562, %561 : vector<16x16xf32>
    %564 = arith.addf %559, %563 : vector<16x16xf32>
    %c72 = arith.constant 72 : index
    %565 = memref.load %arg3[%c72] : memref<98xf32, #tpu.memory_space<smem>>
    %c3_289 = arith.constant 3 : index
    %c2_290 = arith.constant 2 : index
    %566 = vector.load %arg7[%c3_289, %c2_290] : memref<22x22xf32, #tpu.memory_space<vmem>>, vector<16x16xf32>
    %567 = vector.broadcast %565 : f32 to vector<16x16xf32>
    %568 = arith.mulf %567, %566 : vector<16x16xf32>
    %569 = arith.addf %564, %568 : vector<16x16xf32>
    %c73 = arith.constant 73 : index
    %570 = memref.load %arg3[%c73] : memref<98xf32, #tpu.memory_space<smem>>
    %c3_291 = arith.constant 3 : index
    %c3_292 = arith.constant 3 : index
    %571 = vector.load %arg7[%c3_291, %c3_292] : memref<22x22xf32, #tpu.memory_space<vmem>>, vector<16x16xf32>
    %572 = vector.broadcast %570 : f32 to vector<16x16xf32>
    %573 = arith.mulf %572, %571 : vector<16x16xf32>
    %574 = arith.addf %569, %573 : vector<16x16xf32>
    %c74 = arith.constant 74 : index
    %575 = memref.load %arg3[%c74] : memref<98xf32, #tpu.memory_space<smem>>
    %c3_293 = arith.constant 3 : index
    %c4_294 = arith.constant 4 : index
    %576 = vector.load %arg7[%c3_293, %c4_294] : memref<22x22xf32, #tpu.memory_space<vmem>>, vector<16x16xf32>
    %577 = vector.broadcast %575 : f32 to vector<16x16xf32>
    %578 = arith.mulf %577, %576 : vector<16x16xf32>
    %579 = arith.addf %574, %578 : vector<16x16xf32>
    %c75 = arith.constant 75 : index
    %580 = memref.load %arg3[%c75] : memref<98xf32, #tpu.memory_space<smem>>
    %c3_295 = arith.constant 3 : index
    %c5_296 = arith.constant 5 : index
    %581 = vector.load %arg7[%c3_295, %c5_296] : memref<22x22xf32, #tpu.memory_space<vmem>>, vector<16x16xf32>
    %582 = vector.broadcast %580 : f32 to vector<16x16xf32>
    %583 = arith.mulf %582, %581 : vector<16x16xf32>
    %584 = arith.addf %579, %583 : vector<16x16xf32>
    %c76 = arith.constant 76 : index
    %585 = memref.load %arg3[%c76] : memref<98xf32, #tpu.memory_space<smem>>
    %c3_297 = arith.constant 3 : index
    %c6_298 = arith.constant 6 : index
    %586 = vector.load %arg7[%c3_297, %c6_298] : memref<22x22xf32, #tpu.memory_space<vmem>>, vector<16x16xf32>
    %587 = vector.broadcast %585 : f32 to vector<16x16xf32>
    %588 = arith.mulf %587, %586 : vector<16x16xf32>
    %589 = arith.addf %584, %588 : vector<16x16xf32>
    %c77 = arith.constant 77 : index
    %590 = memref.load %arg3[%c77] : memref<98xf32, #tpu.memory_space<smem>>
    %c4_299 = arith.constant 4 : index
    %c0_300 = arith.constant 0 : index
    %591 = vector.load %arg7[%c4_299, %c0_300] : memref<22x22xf32, #tpu.memory_space<vmem>>, vector<16x16xf32>
    %592 = vector.broadcast %590 : f32 to vector<16x16xf32>
    %593 = arith.mulf %592, %591 : vector<16x16xf32>
    %594 = arith.addf %589, %593 : vector<16x16xf32>
    %c78 = arith.constant 78 : index
    %595 = memref.load %arg3[%c78] : memref<98xf32, #tpu.memory_space<smem>>
    %c4_301 = arith.constant 4 : index
    %c1_302 = arith.constant 1 : index
    %596 = vector.load %arg7[%c4_301, %c1_302] : memref<22x22xf32, #tpu.memory_space<vmem>>, vector<16x16xf32>
    %597 = vector.broadcast %595 : f32 to vector<16x16xf32>
    %598 = arith.mulf %597, %596 : vector<16x16xf32>
    %599 = arith.addf %594, %598 : vector<16x16xf32>
    %c79 = arith.constant 79 : index
    %600 = memref.load %arg3[%c79] : memref<98xf32, #tpu.memory_space<smem>>
    %c4_303 = arith.constant 4 : index
    %c2_304 = arith.constant 2 : index
    %601 = vector.load %arg7[%c4_303, %c2_304] : memref<22x22xf32, #tpu.memory_space<vmem>>, vector<16x16xf32>
    %602 = vector.broadcast %600 : f32 to vector<16x16xf32>
    %603 = arith.mulf %602, %601 : vector<16x16xf32>
    %604 = arith.addf %599, %603 : vector<16x16xf32>
    %c80_305 = arith.constant 80 : index
    %605 = memref.load %arg3[%c80_305] : memref<98xf32, #tpu.memory_space<smem>>
    %c4_306 = arith.constant 4 : index
    %c3_307 = arith.constant 3 : index
    %606 = vector.load %arg7[%c4_306, %c3_307] : memref<22x22xf32, #tpu.memory_space<vmem>>, vector<16x16xf32>
    %607 = vector.broadcast %605 : f32 to vector<16x16xf32>
    %608 = arith.mulf %607, %606 : vector<16x16xf32>
    %609 = arith.addf %604, %608 : vector<16x16xf32>
    %c81 = arith.constant 81 : index
    %610 = memref.load %arg3[%c81] : memref<98xf32, #tpu.memory_space<smem>>
    %c4_308 = arith.constant 4 : index
    %c4_309 = arith.constant 4 : index
    %611 = vector.load %arg7[%c4_308, %c4_309] : memref<22x22xf32, #tpu.memory_space<vmem>>, vector<16x16xf32>
    %612 = vector.broadcast %610 : f32 to vector<16x16xf32>
    %613 = arith.mulf %612, %611 : vector<16x16xf32>
    %614 = arith.addf %609, %613 : vector<16x16xf32>
    %c82 = arith.constant 82 : index
    %615 = memref.load %arg3[%c82] : memref<98xf32, #tpu.memory_space<smem>>
    %c4_310 = arith.constant 4 : index
    %c5_311 = arith.constant 5 : index
    %616 = vector.load %arg7[%c4_310, %c5_311] : memref<22x22xf32, #tpu.memory_space<vmem>>, vector<16x16xf32>
    %617 = vector.broadcast %615 : f32 to vector<16x16xf32>
    %618 = arith.mulf %617, %616 : vector<16x16xf32>
    %619 = arith.addf %614, %618 : vector<16x16xf32>
    %c83 = arith.constant 83 : index
    %620 = memref.load %arg3[%c83] : memref<98xf32, #tpu.memory_space<smem>>
    %c4_312 = arith.constant 4 : index
    %c6_313 = arith.constant 6 : index
    %621 = vector.load %arg7[%c4_312, %c6_313] : memref<22x22xf32, #tpu.memory_space<vmem>>, vector<16x16xf32>
    %622 = vector.broadcast %620 : f32 to vector<16x16xf32>
    %623 = arith.mulf %622, %621 : vector<16x16xf32>
    %624 = arith.addf %619, %623 : vector<16x16xf32>
    %c84 = arith.constant 84 : index
    %625 = memref.load %arg3[%c84] : memref<98xf32, #tpu.memory_space<smem>>
    %c5_314 = arith.constant 5 : index
    %c0_315 = arith.constant 0 : index
    %626 = vector.load %arg7[%c5_314, %c0_315] : memref<22x22xf32, #tpu.memory_space<vmem>>, vector<16x16xf32>
    %627 = vector.broadcast %625 : f32 to vector<16x16xf32>
    %628 = arith.mulf %627, %626 : vector<16x16xf32>
    %629 = arith.addf %624, %628 : vector<16x16xf32>
    %c85 = arith.constant 85 : index
    %630 = memref.load %arg3[%c85] : memref<98xf32, #tpu.memory_space<smem>>
    %c5_316 = arith.constant 5 : index
    %c1_317 = arith.constant 1 : index
    %631 = vector.load %arg7[%c5_316, %c1_317] : memref<22x22xf32, #tpu.memory_space<vmem>>, vector<16x16xf32>
    %632 = vector.broadcast %630 : f32 to vector<16x16xf32>
    %633 = arith.mulf %632, %631 : vector<16x16xf32>
    %634 = arith.addf %629, %633 : vector<16x16xf32>
    %c86 = arith.constant 86 : index
    %635 = memref.load %arg3[%c86] : memref<98xf32, #tpu.memory_space<smem>>
    %c5_318 = arith.constant 5 : index
    %c2_319 = arith.constant 2 : index
    %636 = vector.load %arg7[%c5_318, %c2_319] : memref<22x22xf32, #tpu.memory_space<vmem>>, vector<16x16xf32>
    %637 = vector.broadcast %635 : f32 to vector<16x16xf32>
    %638 = arith.mulf %637, %636 : vector<16x16xf32>
    %639 = arith.addf %634, %638 : vector<16x16xf32>
    %c87 = arith.constant 87 : index
    %640 = memref.load %arg3[%c87] : memref<98xf32, #tpu.memory_space<smem>>
    %c5_320 = arith.constant 5 : index
    %c3_321 = arith.constant 3 : index
    %641 = vector.load %arg7[%c5_320, %c3_321] : memref<22x22xf32, #tpu.memory_space<vmem>>, vector<16x16xf32>
    %642 = vector.broadcast %640 : f32 to vector<16x16xf32>
    %643 = arith.mulf %642, %641 : vector<16x16xf32>
    %644 = arith.addf %639, %643 : vector<16x16xf32>
    %c88 = arith.constant 88 : index
    %645 = memref.load %arg3[%c88] : memref<98xf32, #tpu.memory_space<smem>>
    %c5_322 = arith.constant 5 : index
    %c4_323 = arith.constant 4 : index
    %646 = vector.load %arg7[%c5_322, %c4_323] : memref<22x22xf32, #tpu.memory_space<vmem>>, vector<16x16xf32>
    %647 = vector.broadcast %645 : f32 to vector<16x16xf32>
    %648 = arith.mulf %647, %646 : vector<16x16xf32>
    %649 = arith.addf %644, %648 : vector<16x16xf32>
    %c89 = arith.constant 89 : index
    %650 = memref.load %arg3[%c89] : memref<98xf32, #tpu.memory_space<smem>>
    %c5_324 = arith.constant 5 : index
    %c5_325 = arith.constant 5 : index
    %651 = vector.load %arg7[%c5_324, %c5_325] : memref<22x22xf32, #tpu.memory_space<vmem>>, vector<16x16xf32>
    %652 = vector.broadcast %650 : f32 to vector<16x16xf32>
    %653 = arith.mulf %652, %651 : vector<16x16xf32>
    %654 = arith.addf %649, %653 : vector<16x16xf32>
    %c90 = arith.constant 90 : index
    %655 = memref.load %arg3[%c90] : memref<98xf32, #tpu.memory_space<smem>>
    %c5_326 = arith.constant 5 : index
    %c6_327 = arith.constant 6 : index
    %656 = vector.load %arg7[%c5_326, %c6_327] : memref<22x22xf32, #tpu.memory_space<vmem>>, vector<16x16xf32>
    %657 = vector.broadcast %655 : f32 to vector<16x16xf32>
    %658 = arith.mulf %657, %656 : vector<16x16xf32>
    %659 = arith.addf %654, %658 : vector<16x16xf32>
    %c91 = arith.constant 91 : index
    %660 = memref.load %arg3[%c91] : memref<98xf32, #tpu.memory_space<smem>>
    %c6_328 = arith.constant 6 : index
    %c0_329 = arith.constant 0 : index
    %661 = vector.load %arg7[%c6_328, %c0_329] : memref<22x22xf32, #tpu.memory_space<vmem>>, vector<16x16xf32>
    %662 = vector.broadcast %660 : f32 to vector<16x16xf32>
    %663 = arith.mulf %662, %661 : vector<16x16xf32>
    %664 = arith.addf %659, %663 : vector<16x16xf32>
    %c92 = arith.constant 92 : index
    %665 = memref.load %arg3[%c92] : memref<98xf32, #tpu.memory_space<smem>>
    %c6_330 = arith.constant 6 : index
    %c1_331 = arith.constant 1 : index
    %666 = vector.load %arg7[%c6_330, %c1_331] : memref<22x22xf32, #tpu.memory_space<vmem>>, vector<16x16xf32>
    %667 = vector.broadcast %665 : f32 to vector<16x16xf32>
    %668 = arith.mulf %667, %666 : vector<16x16xf32>
    %669 = arith.addf %664, %668 : vector<16x16xf32>
    %c93 = arith.constant 93 : index
    %670 = memref.load %arg3[%c93] : memref<98xf32, #tpu.memory_space<smem>>
    %c6_332 = arith.constant 6 : index
    %c2_333 = arith.constant 2 : index
    %671 = vector.load %arg7[%c6_332, %c2_333] : memref<22x22xf32, #tpu.memory_space<vmem>>, vector<16x16xf32>
    %672 = vector.broadcast %670 : f32 to vector<16x16xf32>
    %673 = arith.mulf %672, %671 : vector<16x16xf32>
    %674 = arith.addf %669, %673 : vector<16x16xf32>
    %c94 = arith.constant 94 : index
    %675 = memref.load %arg3[%c94] : memref<98xf32, #tpu.memory_space<smem>>
    %c6_334 = arith.constant 6 : index
    %c3_335 = arith.constant 3 : index
    %676 = vector.load %arg7[%c6_334, %c3_335] : memref<22x22xf32, #tpu.memory_space<vmem>>, vector<16x16xf32>
    %677 = vector.broadcast %675 : f32 to vector<16x16xf32>
    %678 = arith.mulf %677, %676 : vector<16x16xf32>
    %679 = arith.addf %674, %678 : vector<16x16xf32>
    %c95 = arith.constant 95 : index
    %680 = memref.load %arg3[%c95] : memref<98xf32, #tpu.memory_space<smem>>
    %c6_336 = arith.constant 6 : index
    %c4_337 = arith.constant 4 : index
    %681 = vector.load %arg7[%c6_336, %c4_337] : memref<22x22xf32, #tpu.memory_space<vmem>>, vector<16x16xf32>
    %682 = vector.broadcast %680 : f32 to vector<16x16xf32>
    %683 = arith.mulf %682, %681 : vector<16x16xf32>
    %684 = arith.addf %679, %683 : vector<16x16xf32>
    %c96_338 = arith.constant 96 : index
    %685 = memref.load %arg3[%c96_338] : memref<98xf32, #tpu.memory_space<smem>>
    %c6_339 = arith.constant 6 : index
    %c5_340 = arith.constant 5 : index
    %686 = vector.load %arg7[%c6_339, %c5_340] : memref<22x22xf32, #tpu.memory_space<vmem>>, vector<16x16xf32>
    %687 = vector.broadcast %685 : f32 to vector<16x16xf32>
    %688 = arith.mulf %687, %686 : vector<16x16xf32>
    %689 = arith.addf %684, %688 : vector<16x16xf32>
    %c97 = arith.constant 97 : index
    %690 = memref.load %arg3[%c97] : memref<98xf32, #tpu.memory_space<smem>>
    %c6_341 = arith.constant 6 : index
    %c6_342 = arith.constant 6 : index
    %691 = vector.load %arg7[%c6_341, %c6_342] : memref<22x22xf32, #tpu.memory_space<vmem>>, vector<16x16xf32>
    %692 = vector.broadcast %690 : f32 to vector<16x16xf32>
    %693 = arith.mulf %692, %691 : vector<16x16xf32>
    %694 = arith.addf %689, %693 : vector<16x16xf32>
    %695 = arith.negf %694 : vector<16x16xf32>
    %696 = math.exp %695 : vector<16x16xf32>
    %cst_343 = arith.constant 1.000000e+00 : f32
    %697 = vector.broadcast %cst_343 : f32 to vector<16x16xf32>
    %698 = arith.addf %697, %696 : vector<16x16xf32>
    %699 = arith.divf %697, %698 : vector<16x16xf32>
    %c0_344 = arith.constant 0 : index
    %c0_345 = arith.constant 0 : index
    %c0_346 = arith.constant 0 : index
    %700 = vector.load %arg4[%c0_344, %c0_345, %c0_346] : memref<1x16x16xf32, #tpu.memory_space<vmem>>, vector<1x16x16xf32>
    %701 = vector.shape_cast %700 : vector<1x16x16xf32> to vector<16x16xf32>
    %702 = vector.shape_cast %699 : vector<16x16xf32> to vector<1x16x16xf32>
    tpu.vector_store %arg4[%c0_344, %c0_345, %c0_346], %702 {strides = array<i32>} : memref<1x16x16xf32, #tpu.memory_space<vmem>>, vector<1x16x16xf32>,
    return
  }
  func.func @transform_0(%arg0: i32, %arg1: i32) -> (i32, i32, i32) {
    %c0_i32 = arith.constant 0 : i32
    %c0_i32_0 = arith.constant 0 : i32
    return %arg0, %arg1, %c0_i32 : i32, i32, i32
  }
  func.func @transform_1(%arg0: i32, %arg1: i32) -> i32 {
    %c0_i32 = arith.constant 0 : i32
    %c0_i32_0 = arith.constant 0 : i32
    return %c0_i32 : i32
  }
  func.func @transform_2(%arg0: i32, %arg1: i32) -> (i32, i32, i32) {
    %c0_i32 = arith.constant 0 : i32
    %c0_i32_0 = arith.constant 0 : i32
    %c0_i32_1 = arith.constant 0 : i32
    return %arg0, %c0_i32, %c0_i32_0 : i32, i32, i32
  }
}

</mosaic_0001>

<bundles_post_ra>
// kernel: tpu_custom_call.1
= control target key start
LH: loop header
LB: loop body
LE: loop exit
PB: predicated region body
PF: predicated region fallthrough
CT: control target
= control target key end

     0   :  { %7 = vsyncpa [#allocation6], 0  ;;  %s3633_s0 = inlined_call_operand.hbm [shape: f32[2,4,256], index: 0, kind: input, shape index: {}]   ;;  %s3634_s1 = inlined_call_operand.vmem [shape: f32[98], index: 1, kind: input, shape index: {}]   ;;  %s3635_s2 = inlined_call_operand.hbm [shape: f32[2,16,16], index: 2, kind: output, shape index: {}]  }
   0x1   :  { %9 = vsyncpa [#allocation6 + $0x1], 0 }
   0x2   :  { %10 = vsyncpa [#allocation8], 0 }
   0x3   :  { %11 = vsyncpa [#allocation7], 0 }
   0x4   :  { %13 = vsyncpa [#allocation7 + $0x1], 0  ;;  %s2420_s9 = smov 0   ;;  %s2422_s10 = smov 0  }
   0x5   :  { %s2424_s11 = smov 0   ;;  %s2426_s12 = smov 0  }
   0x6   :  { %s2428_s13 = smov 0   ;;  %s2430_s14 = smov 0  }
   0x7 LB: > { %s2017_s15 = sadd.s32 4294967295, %s2382_s14   ;;  %s2018_s16 = sadd.s32 4294967294, %s2382_s14   ;;  %s2382_s14 = sphi %s2430_s14, %s19_s14   ;;  %s2378_s13 = sphi %s2428_s13, %s3659_s13   ;;  %s2374_s12 = sphi %s2426_s12, %s3658_s12   ;;  %s2370_s11 = sphi %s2424_s11, %s3657_s11   ;;  %s2366_s10 = sphi %s2422_s10, %s3656_s10   ;;  %s2362_s9 = sphi %s2420_s9, %s3655_s9  }
   0x8   : > { %p53_p0 = scmp.ne.s32.totalorder %s2366_s10, %s2362_s9  ;;  %p2454_p1 = scmp.eq.s32.totalorder %s2017_s15, 0 }
   0x9   : > { %p2458_p2 = scmp.eq.s32.totalorder %s2017_s15, 1  ;;  %p104_p3 = scmp.eq.s32.totalorder %s2018_s16, 1 }
   0xa   : > { %s3641_s17 = scalar_select %p2454_p1, 1, 0 }
   0xb   : > { %p2464_p4 = por %p2454_p1, %p53_p0  ;;  %p2019_p5 = scmp.ge.s32.totalorder %s2382_s14, 1 }
   0xc   : > { %p2469_p6 = por %p104_p3, %p53_p0  ;;  %p111_p7 = scmp.lt.s32.totalorder %s2382_s14, 3 }
   0xd   : > { %s3643_s19 = scalar_select %p2464_p4, 1, 0 }
   0xe   : > { %s3644_s20 = scalar_select %p2469_p6, 1, 0 }
   0xf   : > { %s124_s23 = sshll.u32 %s3634_s1, 4  ;;  %p2477_p8 = pnand %p2019_p5, %p111_p7  ;;  %s125_s23 = int_to_ptr.vmem [resolvable:$true] %s124_s23 }
  0x10   : > { %s31_s26 = sadd.s32 1, %s2378_s13  ;;  %s40_s27 = sadd.s32 1, %s2370_s11 }
  0x11   : > { %p2159_p10 = pneg %p2477_p8  ;;  %p33_p12 = scmp.ge.s32.totalorder %s31_s26, 2 }
  0x12   : > { %s2251_s28 = scalar_lea.vmem %s125_s23, 16  ;;  %p2259_p7 = scmp.lt.s32.totalorder %s125_s23, %s125_s23 }
  0x13   : > { %p2486_p11 = pnand %p2159_p10, %p2454_p1  ;;  %p2252_p13 = scmp.ne.s32.totalorder %s125_s23, %s2251_s28 }
  0x14   : > { %p2260_p6 = scmp.lt.s32.totalorder %s2251_s28, %s2251_s28 }
  0x15   : > { %p2253_p0 = pneg %p2486_p11 }
  0x16   : > { %p2261_p9 = por %p2260_p6, %p2259_p7 }
  0x17   : > { %p2254_p3 = pnand %p2253_p0, %p2252_p13 }
  0x19   : > { %p2255_p5 = pneg %p2254_p3 }
  0x1b   : > { %p2262_p4 = pnand %p2261_p9, %p2255_p5 }
  0x1d   : > { %2265 = shalt.err (!%p2262_p4)
}
  0x1e   : > { %s2384_s29 = smov [#allocation9]   ;;  %s3661_s26 = smov (%p33_p12, %s31_s26), 0 }
  0x1f   : > { %2162 = dma.vmem_to_smem (!%p2486_p11), %s125_s23, 16, %s2384_s29, [#allocation8]  }
  0x20   : > { %p47_p10 = scmp.ne.s32.totalorder %s2370_s11, %s2366_s10  ;;  %p48_p6 = scmp.eq.s32.totalorder %s2382_s14, 0 }
  0x21   : > { %s35_s30 = ssub.s32 %s2378_s13, %s3661_s26  ;;  %p2172_p4 = scmp.lt.s32.totalorder %s2382_s14, 2 }
  0x22   : > { %p38_p9 = scmp.eq.s32.totalorder %s35_s30, 0  ;;  %p49_p13 = por %p48_p6, %p47_p10 }
  0x23   : > { %p2506_p0 = por %p2458_p2, %p47_p10  ;;  %s135_s4 = sand.u32 1, %s2370_s11  }
  0x24   : > { %s2512_s5 = scalar_select %p38_p9, %s2370_s11, %s40_s27  }
  0x25   : > { %s3647_s3 = scalar_select %p2506_p0, 1, 0 }
  0x26   : > { %s2022_s6 = sshll.u32 %s135_s4, 3  ;;  %s2149_s7 = sshll.u32 %s2378_s13, 7 }
  0x27   : > { %s2518_s16 = scalar_lea.hbm %s3633_s0, %s2149_s7  ;;  %s139_s21 = scalar_lea.vmem [#allocation5], %s2022_s6 }
  0x28   : > { %s149_s18 = sshll.u32 %s139_s21, 4  ;;  %p2522_p2 = pnand %p2172_p4, %p49_p13  ;;  %s2520_s18 = int_to_ptr.vmem [resolvable:$true] %s149_s18 }
  0x29   : > { %s136_s23 = scalar_lea.sflag [#allocation6], %s135_s4  ;;  %s2266_s25 = scalar_lea.hbm %s2518_s16, 128 }
  0x2a   : > { %p2267_p11 = scmp.ne.s32.totalorder %s2518_s16, %s2266_s25  ;;  %p2268_p12 = pneg %p2522_p2 }
  0x2b   : > { %s2271_s29 = scalar_lea.hbm %s3633_s0, 256  ;;  %p2272_p7 = scmp.lt.u32.totalorder %s2518_s16, %s3633_s0 }
  0x2c   : > { %p2269_p3 = pnand %p2268_p12, %p2267_p11  ;;  %p2273_p10 = scmp.lt.u32.totalorder %s2271_s29, %s2266_s25 }
  0x2d   : > { %p2275_p4 = scmp.lt.u32.totalorder %s2266_s25, %s2518_s16 }
  0x2e   : > { %p2270_p5 = pneg %p2269_p3  ;;  %p2274_p6 = por %p2273_p10, %p2272_p7 }
  0x30   : > { %p2276_p9 = por %p2275_p4, %p2274_p6 }
  0x32   : > { %p2277_p13 = pnand %p2276_p9, %p2270_p5 }
  0x34   : > { %2280 = shalt.err (!%p2277_p13)
}
  0x35   : > { %s2281_s4 = scalar_lea.vmem %s2520_s18, 128  ;;  %s2385_s7 = smov [#allocation5]  }
  0x36   : > { %p2282_p11 = scmp.ne.s32.totalorder %s2520_s18, %s2281_s4  ;;  %s2286_s8 = sshll.u32 %s2385_s7, 4  ;;  %s2287_s8 = int_to_ptr.vmem [resolvable:$false] %s2286_s8 }
  0x37   : > { %s2288_s15 = scalar_lea.vmem %s2287_s8, 256  ;;  %p2289_p1 = scmp.lt.s32.totalorder %s2520_s18, %s2287_s8 }
  0x38   : > { %p2284_p3 = pnand %p2282_p11, %p2268_p12  ;;  %p2290_p7 = scmp.lt.s32.totalorder %s2288_s15, %s2281_s4 }
  0x3a   : > { %p2285_p0 = pneg %p2284_p3  ;;  %p2291_p10 = por %p2290_p7, %p2289_p1 }
  0x3c   : > { %p2292_p6 = pnand %p2291_p10, %p2285_p0 }
  0x3e   : > { %2295 = shalt.err (!%p2292_p6)
}
  0x3f   : > { %2166 = dma.hbm_to_vmem [thread:$0]  (!%p2522_p2), %s2518_s16, 128, %s2520_s18, %s136_s23  }
  0x40   : > { %158 = sbr.rel (%p2477_p8) target bundleno = 839 (0x347), region = 28  ;;  %s2554_s21 = sand.u32 (!%p2477_p8), 1, %s2366_s10  }
  0x41   : > { %s2026_s25 = sshll.u32 (!%p2477_p8), %s2554_s21, 3  ;;  %s161_s27 = scalar_lea.sflag (!%p2477_p8), [#allocation6], %s2554_s21 }
  0x42   : > { %s164_s28 = scalar_lea.vmem (!%p2477_p8), [#allocation5], %s2026_s25  ;;  %p3649_p1 = scmp.ne.s32.totalorder (!%p2477_p8), %s3643_s19, 0 }
  0x47   : > { %2349 = dma.done.wait (%p3649_p1), %s161_s27, 128  }
  0x48   : > { %2351 = vsyncadd (%p3649_p1), %s161_s27, 4294967168  ;;  %p3650_p0 = scmp.ne.s32.totalorder %s3641_s17, 0 }
  0x4a   : > { %2353 = dma.done.wait (%p3650_p0), [#allocation8], 16  }
  0x4b   : > { %2355 = vsyncadd (%p3650_p0), [#allocation8], 4294967280 }
  0x4c   : > { %173 = sfence }
  0x4d   : > { %v190_v0 = vld [vmem:[%s164_s28] sm:$0xff]  ;;  %vm194_vm0 = vcmask 1043456   ;;  %vm265_vm1 = vcmask 179200   ;;  %v2386_v12 = vmov 1966171168   ;;  %v229_v14 = vlaneseq  ;;  %s2388_s17 = smov 99  }
  0x4e   : > { %v192_v1 = vcombine.high %v190_v0, %v190_v0  ;;  %v195_v2 = vsel %vm194_vm0, %v190_v0, -inf  ;;  %v209_v3 = vsel %vm194_vm0, %v190_v0, 0.0  ;;  %v227_v13 = vunpack.c.l.s4 %v2386_v12  ;;  %s2389_s19 = smov 3   ;;  %s2390_s24 = smov 83  }
  0x4f   : > { %v196_v4 = vrot.slane %v195_v2, 4  ;;  %v210_v5 = vrot.slane %v209_v3, 4  ;;  %v2387_v19 = vmov 0.0   ;;  %v230_v25 = vshrl.u32 %v229_v14, 7  ;;  %s3640_s16 = smov 115   ;;  %s2392_s18 = smov 51  }
  0x50   : > { %v202_v6 = vsel %vm194_vm0, %v192_v1, -inf  ;;  %v216_v7 = vsel %vm194_vm0, %v192_v1, 0.0  ;;  %266 = vst.msk [vmem:[#allocation4] sm:$0xff] %vm265_vm1, %v2387_v19  ;;  %267 = vst.msk [vmem:[#allocation4 + $0x8] sm:$0xff] %vm265_vm1, %v2387_v19  ;;  %v228_v24 = vunpack.c.0.s8 %v227_v13  ;;  %vm243_vm2 = vcmp.lt.s32.totalorder %v229_v14, 256  ;;  %s2393_s22 = smov 67  }
  0x51   : > { %v197_v8 = vmax.f32 %v195_v2, %v196_v4  ;;  %v203_v9 = vrot.slane %v202_v6, 4  ;;  %v211_v10 = vadd.f32 %v210_v5, %v209_v3  ;;  %v217_v11 = vrot.slane %v216_v7, 4  ;;  %s2394_s23 = smov 19   ;;  %s2395_s29 = smov 35  }
  0x52   : > { %v231_v36 = vsub.s32 %v228_v24, %v230_v25  ;;  %vm268_vm3 = vcmask 177152   ;;  %v2578_v47 = vsub.s32 0, %v230_v25  ;;  %vm279_vm4 = vcmask 147480   ;;  %s2592_s30 = sld [smem:[#allocation9 + $0x1]]  ;;  %s2596_s6 = sld [smem:[#allocation9 + $0x2]] }
  0x53   : > { %v198_v15 = vrot.slane %v197_v8, 2  ;;  %v204_v16 = vmax.f32 %v202_v6, %v203_v9  ;;  %v212_v17 = vrot.slane %v211_v10, 2  ;;  %v218_v18 = vadd.f32 %v217_v11, %v216_v7  ;;  %269 = vst.msk [vmem:[#allocation4 + $0x10] sm:$0x3f] %vm268_vm3, %v2387_v19  ;;  %s2601_s4 = sld [smem:[#allocation9 + $0x3]]  ;;  %s2609_s7 = sld [smem:[#allocation9 + $0x4]] }
  0x54   : > { %s2396_s8 = smov 127   ;;  %s2616_s15 = sld [smem:[#allocation9 + $0x5]]  ;;  %vm1907_vm5 = vcmask 130048  }
  0x55   : > { %v199_v20 = vmax.f32 %v197_v8, %v198_v15  ;;  %v205_v21 = vrot.slane %v204_v16, 2  ;;  %v213_v22 = vadd.f32 %v212_v17, %v211_v10  ;;  %v219_v23 = vrot.slane %v218_v18, 2  ;;  %s2397_s25 = smov 126   ;;  %s2623_s27 = sld [smem:[#allocation9 + $0x6]] }
  0x56   : > { %s2398_s28 = smov 125   ;;  %p3652_p2 = scmp.ne.s32.totalorder %s3647_s3, 0 }
  0x57   : > { %v200_v26 = vrot.slane %v199_v20, 1  ;;  %v206_v27 = vmax.f32 %v204_v16, %v205_v21  ;;  %v214_v28 = vrot.slane %v213_v22, 1  ;;  %v220_v29 = vadd.f32 %v219_v23, %v218_v18 }
  0x58   : > { %v440_v60 = vstv %s2592_s30  ;;  %v454_v1 = vstv %s2596_s6  ;;  %s2630_s30 = sld [smem:[#allocation9 + $0x8]]  ;;  %s2399_s6 = smov 124  }
  0x59   : > { %v201_v30 = vmax.f32 %v199_v20, %v200_v26  ;;  %v207_v31 = vrot.slane %v206_v27, 1  ;;  %v215_v32 = vadd.f32 %v214_v28, %v213_v22  ;;  %v221_v33 = vrot.slane %v220_v29, 1 }
  0x5a   : > { %v468_v5 = vstv %s2601_s4  ;;  %v482_v9 = vstv %s2609_s7  ;;  %v496_v13 = vstv %s2616_s15  ;;  %s2648_s4 = sld [smem:[#allocation9 + $0x9]]  ;;  %s2400_s7 = smov 123  }
  0x5b   : > { %v208_v34 = vmax.f32 %v206_v27, %v207_v31  ;;  %v222_v35 = vadd.f32 %v221_v33, %v220_v29  ;;  %v510_v23 = vstv %s2623_s27  ;;  %s2655_s15 = sld [smem:[#allocation9 + $0xa]]  ;;  %s2662_s27 = sld [smem:[#allocation9 + $0xb]] }
  0x5d   : > { %v225_v37 = vcombine.low %v201_v30, %v208_v34  ;;  %v248_v38 = vcombine.low %v215_v32, %v222_v35 }
  0x5e   : > { %v532_v26 = vstv %s2630_s30  ;;  %s2669_s30 = sld [smem:[#allocation9 + $0xc]] }
  0x5f   : > { %v232_v39 = vrot.slane %v225_v37, %v231_v36  ;;  %v255_v40 = vrot.slane %v248_v38, %v231_v36 }
  0x60   : > { %v546_v29 = vstv %s2648_s4  ;;  %s2676_s4 = sld [smem:[#allocation9 + $0xd]] }
  0x61   : > { %v239_v41 = vrot.slane %v232_v39, %v231_v36  ;;  %v262_v42 = vrot.slane %v255_v40, %v231_v36  ;;  %v560_v32 = vstv %s2655_s15  ;;  %v574_v35 = vstv %s2662_s27  ;;  %s2685_s15 = sld [smem:[#allocation9 + $0xf]]  ;;  %s2692_s27 = sld [smem:[#allocation9 + $0x10]] }
  0x63   : > { %245 = vst.msk [vmem:[#allocation2] sm:$0x3] %vm243_vm2, %v239_v41  ;;  %264 = vst.msk [vmem:[#allocation3] sm:$0x3] %vm243_vm2, %v262_v42 }
  0x64   : > { %v588_v39 = vstv %s2669_s30  ;;  %s2699_s30 = sld [smem:[#allocation9 + $0x11]] }
  0x66   : > { %v602_v42 = vstv %s2676_s4  ;;  %s2706_s4 = sld [smem:[#allocation9 + $0x12]] }
  0x6a   : > { %v2031_v43 = vld [vmem:[#allocation2] ss:$0 sm:$0xff]  ;;  %v2038_v44 = vld [vmem:[#allocation2 + $0x1] ss:$0 sm:$0xff]  ;;  %v1075_v45 = vld [vmem:[#allocation3] sm:$0x1] }
  0x6b   : > { %297 = vrot.lane.b32.xlu1 %v2031_v43, %s2388_s17  ;;  %276 = vrot.lane.b32.xlu0 %v2031_v43, %s2389_s19  ;;  %v1086_v46 = vld [vmem:[#allocation3] sm:$0x1]  ;;  %v1076_v48 = vmul.f32 0.25, %v1075_v45  ;;  %v624_v45 = vstv %s2685_s15  ;;  %s2713_s15 = sld [smem:[#allocation9 + $0x13]] }
  0x6c   : > { %v1087_v49 = vmul.f32 0.25, %v1086_v46 }
  0x6d   : > { %v1081_v50 = vrot.slane %v1076_v48, %v2578_v47 }
  0x6e   : > { %v1092_v51 = vrot.slane %v1087_v49, %v2578_v47  ;;  %v638_v49 = vstv %s2692_s27  ;;  %s2720_s27 = sld [smem:[#allocation9 + $0x14]] }
  0x6f   : > { %307 = vrot.lane.b32.xlu1 %v2031_v43, %s2390_s24  ;;  %287 = vrot.lane.b32.xlu0 %v2031_v43, %s3640_s16 }
  0x73   : > { %327 = vrot.lane.b32.xlu1 %v2031_v43, %s2392_s18  ;;  %317 = vrot.lane.b32.xlu0 %v2031_v43, %s2393_s22 }
  0x77   : > { %347 = vrot.lane.b32.xlu1 %v2031_v43, %s2394_s23  ;;  %337 = vrot.lane.b32.xlu0 %v2031_v43, %s2395_s29 }
  0x7b   : > { %367 = vrot.lane.b32.xlu1 %v2038_v44, %s3640_s16  ;;  %357 = vrot.lane.b32.xlu0 %v2038_v44, %s2389_s19 }
  0x7f   : > { %387 = vrot.lane.b32.xlu1 %v2038_v44, %s2390_s24  ;;  %377 = vrot.lane.b32.xlu0 %v2038_v44, %s2388_s17 }
  0x83   : > { %407 = vrot.lane.b32.xlu1 %v2038_v44, %s2392_s18  ;;  %397 = vrot.lane.b32.xlu0 %v2038_v44, %s2393_s22 }
  0x87   : > { %427 = vrot.lane.b32.xlu1 %v2038_v44, %s2394_s23  ;;  %417 = vrot.lane.b32.xlu0 %v2038_v44, %s2395_s29 }
  0x8b   : > { %1082 = vrot.lane.b32.xlu0 %v1081_v50, %s2389_s19  ;;  %1093 = vrot.lane.b32.xlu1 %v1092_v51, %s3640_s16  ;;  %s2401_s16 = smov 122  }
  0xdd   : > { %v298_v52 = vpop.permute.xlu1 %297  ;;  %v277_v53 = vpop.permute.xlu0 %276 }
  0xde   : > { %300 = vst.msk [vmem:[#allocation4 + $0x5] sm:$0x1] %vm279_vm4, %v298_v52  ;;  %280 = vst.msk [vmem:[#allocation4 + $0x3] sm:$0x1] %vm279_vm4, %v277_v53  ;;  %v652_v52 = vstv %s2699_s30  ;;  %s2729_s30 = sld [smem:[#allocation9 + $0x16]] }
  0xe1   : > { %v308_v54 = vpop.permute.xlu1 %307  ;;  %v288_v55 = vpop.permute.xlu0 %287 }
  0xe2   : > { %310 = vst.msk [vmem:[#allocation4 + $0x6] sm:$0x1] %vm279_vm4, %v308_v54  ;;  %290 = vst.msk [vmem:[#allocation4 + $0x4] sm:$0x1] %vm279_vm4, %v288_v55  ;;  %v666_v55 = vstv %s2706_s4  ;;  %s2736_s4 = sld [smem:[#allocation9 + $0x17]] }
  0xe5   : > { %v328_v56 = vpop.permute.xlu1 %327  ;;  %v318_v57 = vpop.permute.xlu0 %317 }
  0xe6   : > { %330 = vst.msk [vmem:[#allocation4 + $0x8] sm:$0x1] %vm279_vm4, %v328_v56  ;;  %320 = vst.msk [vmem:[#allocation4 + $0x7] sm:$0x1] %vm279_vm4, %v318_v57 }
  0xe9   : > { %v348_v58 = vpop.permute.xlu1 %347  ;;  %v338_v59 = vpop.permute.xlu0 %337 }
  0xea   : > { %350 = vst.msk [vmem:[#allocation4 + $0xa] sm:$0x1] %vm279_vm4, %v348_v58  ;;  %340 = vst.msk [vmem:[#allocation4 + $0x9] sm:$0x1] %vm279_vm4, %v338_v59  ;;  %v680_v59 = vstv %s2713_s15  ;;  %s2743_s15 = sld [smem:[#allocation9 + $0x18]] }
  0xed   : > { %v2603_v61 = vld [vmem:[#allocation4] sm:$0xff]  ;;  %v368_v62 = vpop.permute.xlu1 %367  ;;  %v358_v63 = vpop.permute.xlu0 %357 }
  0xee   : > { %370 = vst.msk [vmem:[#allocation4 + $0xc] sm:$0x1] %vm279_vm4, %v368_v62  ;;  %360 = vst.msk [vmem:[#allocation4 + $0xb] sm:$0x1] %vm279_vm4, %v358_v63  ;;  %v441_v0 = vmul.f32 %v440_v60, %v2603_v61  ;;  %v455_v4 = vmul.f32 %v454_v1, %v2603_v61  ;;  %v469_v8 = vmul.f32 %v468_v5, %v2603_v61  ;;  %v2632_v14 = vld [vmem:[#allocation4 + $0x1] sm:$0xff]  ;;  %v694_v63 = vstv %s2720_s27  ;;  %s2750_s27 = sld [smem:[#allocation9 + $0x19]] }
  0xef   : > { %v483_v12 = vmul.f32 %v482_v9, %v2603_v61  ;;  %v497_v21 = vmul.f32 %v496_v13, %v2603_v61  ;;  %v511_v24 = vmul.f32 %v510_v23, %v2603_v61  ;;  %v533_v27 = vmul.f32 %v532_v26, %v2632_v14 }
  0xf0   : > { %445 = vrot.lane.b32.xlu0 %v441_v0, %s2396_s8  ;;  %v547_v30 = vmul.f32 %v546_v29, %v2632_v14  ;;  %v561_v33 = vmul.f32 %v560_v32, %v2632_v14  ;;  %v575_v36 = vmul.f32 %v574_v35, %v2632_v14  ;;  %v589_v40 = vmul.f32 %v588_v39, %v2632_v14 }
  0xf1   : > { %v388_v2 = vpop.permute.xlu1 %387  ;;  %v378_v3 = vpop.permute.xlu0 %377  ;;  %v2634_v15 = vld [vmem:[#allocation4 + $0x2] sm:$0xff]  ;;  %v603_v43 = vmul.f32 %v602_v42, %v2632_v14 }
  0xf2   : > { %390 = vst.msk [vmem:[#allocation4 + $0xe] sm:$0x1] %vm279_vm4, %v388_v2  ;;  %380 = vst.msk [vmem:[#allocation4 + $0xd] sm:$0x1] %vm279_vm4, %v378_v3  ;;  %v2637_v16 = vld [vmem:[#allocation4 + $0x3] sm:$0xff]  ;;  %v625_v46 = vmul.f32 %v624_v45, %v2634_v15  ;;  %v639_v50 = vmul.f32 %v638_v49, %v2634_v15  ;;  %v653_v53 = vmul.f32 %v652_v52, %v2634_v15  ;;  %v716_v2 = vstv %s2729_s30  ;;  %s2757_s30 = sld [smem:[#allocation9 + $0x1a]] }
  0xf3   : > { %v667_v56 = vmul.f32 %v666_v55, %v2634_v15  ;;  %v695_v0 = vmul.f32 %v694_v63, %v2634_v15  ;;  %v717_v3 = vmul.f32 %v716_v2, %v2637_v16 }
  0xf4   : > { %459 = vrot.lane.b32.xlu0 %v455_v4, %s2397_s25 }
  0xf5   : > { %v408_v6 = vpop.permute.xlu1 %407  ;;  %v398_v7 = vpop.permute.xlu0 %397  ;;  %v2639_v17 = vld [vmem:[#allocation4 + $0x4] sm:$0xff] }
  0xf6   : > { %410 = vst.msk [vmem:[#allocation4 + $0x10] sm:$0x1] %vm279_vm4, %v408_v6  ;;  %400 = vst.msk [vmem:[#allocation4 + $0xf] sm:$0x1] %vm279_vm4, %v398_v7 }
  0xf8   : > { %473 = vrot.lane.b32.xlu0 %v469_v8, %s2398_s28  ;;  %v744_v8 = vstv %s2743_s15  ;;  %s2773_s15 = sld [smem:[#allocation9 + $0x1d]] }
  0xf9   : > { %v428_v10 = vpop.permute.xlu1 %427  ;;  %v418_v11 = vpop.permute.xlu0 %417 }
  0xfa   : > { %430 = vst.msk [vmem:[#allocation4 + $0x12] sm:$0x1] %vm279_vm4, %v428_v10  ;;  %420 = vst.msk [vmem:[#allocation4 + $0x11] sm:$0x1] %vm279_vm4, %v418_v11  ;;  %v758_v11 = vstv %s2750_s27  ;;  %s2780_s27 = sld [smem:[#allocation9 + $0x1e]] }
  0xfc   : > { %487 = vrot.lane.b32.xlu0 %v483_v12, %s2399_s6  ;;  %v759_v12 = vmul.f32 %v758_v11, %v2637_v16 }
  0xfd   : > { %v2641_v18 = vld [vmem:[#allocation4 + $0x8] sm:$0xff]  ;;  %v1083_v19 = vpop.permute.xlu0 %1082  ;;  %v1094_v20 = vpop.permute.xlu1 %1093 }
  0xfe   : > { %v442_v22 = vmul.f32 %v440_v60, %v2641_v18  ;;  %1085 = vst.msk [vmem:[#allocation4 + $0x3] sm:$0x1] %vm279_vm4, %v1083_v19  ;;  %1096 = vst.msk [vmem:[#allocation4 + $0x4] sm:$0x1] %vm279_vm4, %v1094_v20  ;;  %v456_v25 = vmul.f32 %v454_v1, %v2641_v18  ;;  %v470_v28 = vmul.f32 %v468_v5, %v2641_v18  ;;  %v2682_v38 = vld [vmem:[#allocation4 + $0x9] sm:$0xff]  ;;  %v730_v5 = vstv %s2736_s4  ;;  %s2764_s4 = sld [smem:[#allocation9 + $0x1b]] }
  0xff   : > { %v484_v31 = vmul.f32 %v482_v9, %v2641_v18  ;;  %v498_v34 = vmul.f32 %v496_v13, %v2641_v18  ;;  %v512_v37 = vmul.f32 %v510_v23, %v2641_v18  ;;  %v534_v41 = vmul.f32 %v532_v26, %v2682_v38 }
 0x100   : > { %501 = vrot.lane.b32.xlu0 %v497_v21, %s2400_s7  ;;  %447 = vrot.lane.b32.xlu1 %v442_v22, %s2396_s8  ;;  %v548_v44 = vmul.f32 %v546_v29, %v2682_v38  ;;  %v562_v48 = vmul.f32 %v560_v32, %v2682_v38  ;;  %v576_v51 = vmul.f32 %v574_v35, %v2682_v38  ;;  %v772_v20 = vstv %s2757_s30  ;;  %s2787_s30 = sld [smem:[#allocation9 + $0x1f]] }
 0x101   : > { %v590_v54 = vmul.f32 %v588_v39, %v2682_v38  ;;  %v604_v57 = vmul.f32 %v602_v42, %v2682_v38  ;;  %v2726_v58 = vld [vmem:[#allocation4 + $0xa] sm:$0xff]  ;;  %v681_v60 = vmul.f32 %v680_v59, %v2634_v15  ;;  %v731_v6 = vmul.f32 %v730_v5, %v2637_v16 }
 0x102   : > { %v626_v62 = vmul.f32 %v624_v45, %v2726_v58  ;;  %v640_v1 = vmul.f32 %v638_v49, %v2726_v58  ;;  %v654_v4 = vmul.f32 %v652_v52, %v2726_v58  ;;  %v668_v7 = vmul.f32 %v666_v55, %v2726_v58  ;;  %v2770_v19 = vld [vmem:[#allocation4 + $0xb] sm:$0xff] }
 0x103   : > { %v745_v9 = vmul.f32 %v744_v8, %v2637_v16  ;;  %v682_v10 = vmul.f32 %v680_v59, %v2726_v58  ;;  %v696_v13 = vmul.f32 %v694_v63, %v2726_v58  ;;  %v773_v21 = vmul.f32 %v772_v20, %v2637_v16  ;;  %v2814_v39 = vld [vmem:[#allocation4 + $0xc] sm:$0xff]  ;;  %v1163_v59 = vld [vmem:[#allocation3 + $0x1] sm:$0x1] }
 0x104   : > { %515 = vrot.lane.b32.xlu0 %v511_v24, %s2401_s16  ;;  %461 = vrot.lane.b32.xlu1 %v456_v25, %s2397_s25  ;;  %v718_v22 = vmul.f32 %v716_v2, %v2770_v19  ;;  %v786_v23 = vstv %s2764_s4  ;;  %v732_v25 = vmul.f32 %v730_v5, %v2770_v19  ;;  %v808_v26 = vstv %s2773_s15  ;;  %s2794_s4 = sld [smem:[#allocation9 + $0x20]]  ;;  %s2801_s15 = sld [smem:[#allocation9 + $0x21]]  ;;  %v1108_v2 = vld [vmem:[#allocation3] sm:$0x1] }
 0x105   : > { %v787_v24 = vmul.f32 %v786_v23, %v2637_v16  ;;  %v822_v29 = vstv %s2780_s27  ;;  %s2808_s27 = sld [smem:[#allocation9 + $0x22]] }
 0x106   : > { %v836_v32 = vstv %s2787_s30  ;;  %s2895_s30 = sld [smem:[#allocation9 + $0x27]] }
 0x107   : > { %v838_v55 = vmul.f32 %v836_v32, %v2814_v39 }
 0x108   : > { %537 = vrot.lane.b32.xlu0 %v533_v27, %s2396_s8  ;;  %475 = vrot.lane.b32.xlu1 %v470_v28, %s2398_s28  ;;  %v809_v27 = vmul.f32 %v808_v26, %v2639_v17  ;;  %v746_v28 = vmul.f32 %v744_v8, %v2770_v19  ;;  %v1207_v8 = vld [vmem:[#allocation3 + $0x1] sm:$0x1] }
 0x10a   : > { %v850_v35 = vstv %s2794_s4  ;;  %s2906_s4 = sld [smem:[#allocation9 + $0x28]] }
 0x10c   : > { %551 = vrot.lane.b32.xlu0 %v547_v30, %s2397_s25  ;;  %489 = vrot.lane.b32.xlu1 %v484_v31, %s2399_s6  ;;  %v823_v30 = vmul.f32 %v822_v29, %v2639_v17  ;;  %v760_v31 = vmul.f32 %v758_v11, %v2770_v19 }
 0x110   : > { %565 = vrot.lane.b32.xlu0 %v561_v33, %s2398_s28  ;;  %503 = vrot.lane.b32.xlu1 %v498_v34, %s2400_s7  ;;  %v837_v33 = vmul.f32 %v836_v32, %v2639_v17  ;;  %v774_v34 = vmul.f32 %v772_v20, %v2770_v19 }
 0x114   : > { %579 = vrot.lane.b32.xlu0 %v575_v36, %s2399_s6  ;;  %517 = vrot.lane.b32.xlu1 %v512_v37, %s2401_s16  ;;  %v851_v36 = vmul.f32 %v850_v35, %v2639_v17  ;;  %v788_v37 = vmul.f32 %v786_v23, %v2770_v19  ;;  %v1229_v23 = vld [vmem:[#allocation3 + $0x1] sm:$0x1] }
 0x118   : > { %593 = vrot.lane.b32.xlu0 %v589_v40, %s2400_s7  ;;  %539 = vrot.lane.b32.xlu1 %v534_v41, %s2396_s8  ;;  %v864_v40 = vstv %s2801_s15  ;;  %v1097_v41 = vld [vmem:[#allocation3] sm:$0x1]  ;;  %s2920_s15 = sld [smem:[#allocation9 + $0x29]] }
 0x119   : > { %v865_v42 = vmul.f32 %v864_v40, %v2639_v17  ;;  %v1098_v45 = vmul.f32 0.25, %v1097_v41 }
 0x11c   : > { %607 = vrot.lane.b32.xlu0 %v603_v43, %s2401_s16  ;;  %553 = vrot.lane.b32.xlu1 %v548_v44, %s2397_s25  ;;  %v810_v43 = vmul.f32 %v808_v26, %v2814_v39  ;;  %v878_v44 = vstv %s2808_s27  ;;  %s2955_s27 = sld [smem:[#allocation9 + $0x2d]] }
 0x11d   : > { %v879_v49 = vmul.f32 %v878_v44, %v2639_v17 }
 0x120   : > { %629 = vrot.lane.b32.xlu0 %v625_v46, %s2396_s8  ;;  %567 = vrot.lane.b32.xlu1 %v562_v48, %s2398_s28  ;;  %v1119_v46 = vld [vmem:[#allocation3] sm:$0x1] }
 0x121   : > { %v1120_v52 = vmul.f32 0.25, %v1119_v46  ;;  %v1218_v46 = vld [vmem:[#allocation3 + $0x1] sm:$0x1] }
 0x124   : > { %643 = vrot.lane.b32.xlu0 %v639_v50, %s2397_s25  ;;  %581 = vrot.lane.b32.xlu1 %v576_v51, %s2399_s6  ;;  %v824_v50 = vmul.f32 %v822_v29, %v2814_v39  ;;  %v1103_v51 = vrot.slane %v1098_v45, %v2578_v47  ;;  %v1230_v29 = vmul.f32 0.25, %v1229_v23 }
 0x128   : > { %657 = vrot.lane.b32.xlu0 %v653_v53, %s2398_s28  ;;  %595 = vrot.lane.b32.xlu1 %v590_v54, %s2400_s7  ;;  %v1141_v53 = vld [vmem:[#allocation3] sm:$0x1] }
 0x12c   : > { %671 = vrot.lane.b32.xlu0 %v667_v56, %s2399_s6  ;;  %609 = vrot.lane.b32.xlu1 %v604_v57, %s2401_s16  ;;  %v1125_v56 = vrot.slane %v1120_v52, %v2578_v47  ;;  %v1142_v57 = vmul.f32 0.25, %v1141_v53  ;;  %v1219_v53 = vmul.f32 0.25, %v1218_v46 }
 0x12e   : > { %v1147_v63 = vrot.slane %v1142_v57, %v2578_v47 }
 0x130   : > { %685 = vrot.lane.b32.xlu0 %v681_v60, %s2400_s7  ;;  %631 = vrot.lane.b32.xlu1 %v626_v62, %s2396_s8  ;;  %v852_v62 = vmul.f32 %v850_v35, %v2814_v39 }
 0x134   : > { %699 = vrot.lane.b32.xlu0 %v695_v0, %s2401_s16  ;;  %645 = vrot.lane.b32.xlu1 %v640_v1, %s2397_s25  ;;  %v1164_v0 = vmul.f32 0.25, %v1163_v59  ;;  %v1185_v1 = vld [vmem:[#allocation3 + $0x1] sm:$0x1] }
 0x136   : > { %v1169_v5 = vrot.slane %v1164_v0, %v2578_v47 }
 0x138   : > { %721 = vrot.lane.b32.xlu0 %v717_v3, %s2396_s8  ;;  %659 = vrot.lane.b32.xlu1 %v654_v4, %s2398_s28  ;;  %v866_v4 = vmul.f32 %v864_v40, %v2814_v39 }
 0x13c   : > { %735 = vrot.lane.b32.xlu0 %v731_v6, %s2397_s25  ;;  %673 = vrot.lane.b32.xlu1 %v668_v7, %s2399_s6  ;;  %v1186_v6 = vmul.f32 0.25, %v1185_v1  ;;  %v1109_v7 = vmul.f32 0.25, %v1108_v2 }
 0x13e   : > { %v1114_v20 = vrot.slane %v1109_v7, %v2578_v47 }
 0x140   : > { %749 = vrot.lane.b32.xlu0 %v745_v9, %s2398_s28  ;;  %687 = vrot.lane.b32.xlu1 %v682_v10, %s2400_s7  ;;  %v1130_v9 = vld [vmem:[#allocation3] sm:$0x1] }
 0x144   : > { %763 = vrot.lane.b32.xlu0 %v759_v12, %s2399_s6  ;;  %701 = vrot.lane.b32.xlu1 %v696_v13, %s2401_s16  ;;  %v880_v12 = vmul.f32 %v878_v44, %v2814_v39  ;;  %v1191_v13 = vrot.slane %v1186_v6, %v2578_v47 }
 0x148   : > { %777 = vrot.lane.b32.xlu0 %v773_v21, %s2400_s7  ;;  %723 = vrot.lane.b32.xlu1 %v718_v22, %s2396_s8  ;;  %v1208_v21 = vmul.f32 0.25, %v1207_v8  ;;  %v1131_v22 = vmul.f32 0.25, %v1130_v9 }
 0x14c   : > { %791 = vrot.lane.b32.xlu0 %v787_v24, %s2401_s16  ;;  %737 = vrot.lane.b32.xlu1 %v732_v25, %s2397_s25  ;;  %v1152_v24 = vld [vmem:[#allocation3] sm:$0x1] }
 0x150   : > { %813 = vrot.lane.b32.xlu0 %v809_v27, %s2396_s8  ;;  %751 = vrot.lane.b32.xlu1 %v746_v28, %s2398_s28  ;;  %v1213_v27 = vrot.slane %v1208_v21, %v2578_v47  ;;  %v1136_v28 = vrot.slane %v1131_v22, %v2578_v47 }
 0x154   : > { %827 = vrot.lane.b32.xlu0 %v823_v30, %s2397_s25  ;;  %765 = vrot.lane.b32.xlu1 %v760_v31, %s2399_s6  ;;  %v1153_v30 = vmul.f32 0.25, %v1152_v24  ;;  %v1174_v31 = vld [vmem:[#allocation3 + $0x1] sm:$0x1]  ;;  %v970_v24 = vstv %s2920_s15  ;;  %s3132_s15 = sld [smem:[#allocation9 + $0x1c]] }
 0x156   : > { %v1158_v35 = vrot.slane %v1153_v30, %v2578_v47 }
 0x158   : > { %841 = vrot.lane.b32.xlu0 %v837_v33, %s2398_s28  ;;  %779 = vrot.lane.b32.xlu1 %v774_v34, %s2400_s7  ;;  %v1235_v34 = vrot.slane %v1230_v29, %v2578_v47 }
 0x15c   : > { %855 = vrot.lane.b32.xlu0 %v851_v36, %s2399_s6  ;;  %793 = vrot.lane.b32.xlu1 %v788_v37, %s2401_s16  ;;  %v1175_v36 = vmul.f32 0.25, %v1174_v31  ;;  %v1196_v37 = vld [vmem:[#allocation3 + $0x1] sm:$0x1] }
 0x15d   : > { %v1197_v44 = vmul.f32 0.25, %v1196_v37 }
 0x15f   : > { %v1202_v52 = vrot.slane %v1197_v44, %v2578_v47 }
 0x160   : > { %869 = vrot.lane.b32.xlu0 %v865_v42, %s2400_s7  ;;  %815 = vrot.lane.b32.xlu1 %v810_v43, %s2396_s8  ;;  %v2882_v42 = vld [vmem:[#allocation4 + $0xd] sm:$0xff]  ;;  %v1180_v43 = vrot.slane %v1175_v36, %v2578_v47 }
 0x162   : > { %v2824_v48 = vpop.permute.xlu0 %445 }
 0x164   : > { %883 = vrot.lane.b32.xlu0 %v879_v49, %s2401_s16  ;;  %829 = vrot.lane.b32.xlu1 %v824_v50, %s2397_s25 }
 0x166   : > { %v2831_v54 = vpop.permute.xlu0 %459 }
 0x168   : > { %1104 = vrot.lane.b32.xlu0 %v1103_v51, %s2388_s17  ;;  %843 = vrot.lane.b32.xlu1 %v838_v55, %s2398_s28 }
 0x16a   : > { %v2837_v60 = vpop.permute.xlu0 %473 }
 0x16c   : > { %1126 = vrot.lane.b32.xlu0 %v1125_v56, %s2393_s22  ;;  %857 = vrot.lane.b32.xlu1 %v852_v62, %s2399_s6  ;;  %v1224_v62 = vrot.slane %v1219_v53, %v2578_v47  ;;  %v1020_v53 = vstv %s2955_s27  ;;  %s3155_s27 = sld [smem:[#allocation9 + $0x34]] }
 0x16e   : > { %v2843_v3 = vpop.permute.xlu0 %487 }
 0x170   : > { %1148 = vrot.lane.b32.xlu0 %v1147_v63, %s2395_s29  ;;  %871 = vrot.lane.b32.xlu1 %v866_v4, %s2400_s7  ;;  %v2917_v4 = vld [vmem:[#allocation4 + $0x5] sm:$0xff] }
 0x171   : > { %v971_v30 = vmul.f32 %v970_v24, %v2917_v4 }
 0x172   : > { %v2849_v10 = vpop.permute.xlu1 %447  ;;  %v2851_v11 = vpop.permute.xlu0 %501 }
 0x174   : > { %1170 = vrot.lane.b32.xlu0 %v1169_v5, %s2389_s19  ;;  %885 = vrot.lane.b32.xlu1 %v880_v12, %s2401_s16  ;;  %s2866_s19 = sld [smem:[#allocation9 + $0x24]]  ;;  %v942_v5 = vstv %s2895_s30  ;;  %v956_v12 = vstv %s2906_s4  ;;  %s3023_s30 = sld [smem:[#allocation9 + $0x7]] }
 0x175   : > { %v943_v8 = vmul.f32 %v942_v5, %v2917_v4  ;;  %v957_v22 = vmul.f32 %v956_v12, %v2917_v4  ;;  %s3102_s4 = sld [smem:[#allocation9 + $0x15]] }
 0x176   : > { %v2858_v25 = vpop.permute.xlu1 %461  ;;  %v2860_v26 = vpop.permute.xlu0 %515 }
 0x178   : > { %1192 = vrot.lane.b32.xlu0 %v1191_v13, %s2388_s17  ;;  %1115 = vrot.lane.b32.xlu1 %v1114_v20, %s2390_s24  ;;  %s2876_s17 = sld [smem:[#allocation9 + $0x25]]  ;;  %v1240_v13 = vld [vmem:[#allocation3 + $0x1] sm:$0x1] }
 0x17a   : > { %v2868_v32 = vpop.permute.xlu1 %475  ;;  %v2870_v33 = vpop.permute.xlu0 %537  ;;  %v900_v45 = vstv %s2866_s19  ;;  %s2966_s19 = sld [smem:[#allocation9 + $0x2e]] }
 0x17b   : > { %v902_v51 = vmul.f32 %v900_v45, %v2882_v42  ;;  %v901_v9 = vmul.f32 %v900_v45, %v2917_v4 }
 0x17c   : > { %1214 = vrot.lane.b32.xlu0 %v1213_v27, %s2393_s22  ;;  %1137 = vrot.lane.b32.xlu1 %v1136_v28, %s2392_s18  ;;  %s2888_s22 = sld [smem:[#allocation9 + $0x26]]  ;;  %v1241_v27 = vmul.f32 0.25, %v1240_v13  ;;  %v972_v13 = vmul.f32 %v970_v24, %v2882_v42 }
 0x17e   : > { %v2878_v40 = vpop.permute.xlu1 %489  ;;  %v2880_v41 = vpop.permute.xlu0 %551  ;;  %v914_v55 = vstv %s2876_s17  ;;  %v1246_v36 = vrot.slane %v1241_v27, %v2578_v47  ;;  %s2977_s17 = sld [smem:[#allocation9 + $0x2f]] }
 0x17f   : > { %v916_v59 = vmul.f32 %v914_v55, %v2882_v42  ;;  %v915_v23 = vmul.f32 %v914_v55, %v2917_v4 }
 0x180   : > { %1236 = vrot.lane.b32.xlu0 %v1235_v34, %s2395_s29  ;;  %1159 = vrot.lane.b32.xlu1 %v1158_v35, %s2394_s23  ;;  %s3651_s29 = smov 115   ;;  %v2952_v34 = vld [vmem:[#allocation4 + $0x6] sm:$0xff] }
 0x182   : > { %v2890_v49 = vpop.permute.xlu1 %503  ;;  %v2892_v50 = vpop.permute.xlu0 %565  ;;  %v928_v63 = vstv %s2888_s22  ;;  %s2981_s22 = sld [smem:[#allocation9]] }
 0x183   : > { %v930_v2 = vmul.f32 %v928_v63, %v2882_v42  ;;  %v929_v31 = vmul.f32 %v928_v63, %v2917_v4  ;;  %v958_v63 = vmul.f32 %v956_v12, %v2882_v42 }
 0x184   : > { %907 = vrot.lane.b32.xlu0 %v902_v51, %s2396_s8  ;;  %1181 = vrot.lane.b32.xlu1 %v1180_v43, %s3651_s29  ;;  %s3065_s29 = sld [smem:[#allocation9 + $0xe]] }
 0x186   : > { %v2901_v56 = vpop.permute.xlu1 %517  ;;  %v2903_v57 = vpop.permute.xlu0 %579 }
 0x188   : > { %921 = vrot.lane.b32.xlu0 %v916_v59, %s2397_s25  ;;  %1203 = vrot.lane.b32.xlu1 %v1202_v52, %s2390_s24  ;;  %s2931_s24 = sld [smem:[#allocation9 + $0x2b]]  ;;  %v944_v52 = vmul.f32 %v942_v5, %v2882_v42  ;;  %v434_v12 = vstv %s2981_s22  ;;  %s3179_s22 = sld [smem:[#allocation9 + $0x36]] }
 0x189   : > { %v435_v24 = vmul.f32 %v434_v12, %v2603_v61 }
 0x18a   : > { %v2912_v0 = vpop.permute.xlu1 %539  ;;  %v2914_v1 = vpop.permute.xlu0 %593 }
 0x18c   : > { %935 = vrot.lane.b32.xlu0 %v930_v2, %s2398_s28  ;;  %1225 = vrot.lane.b32.xlu1 %v1224_v62, %s2392_s18  ;;  %s2942_s18 = sld [smem:[#allocation9 + $0x2c]]  ;;  %v1021_v62 = vmul.f32 %v1020_v53, %v2952_v34  ;;  %v1034_v2 = vstv %s2966_s19  ;;  %s3166_s19 = sld [smem:[#allocation9 + $0x35]] }
 0x18e   : > { %v2924_v6 = vpop.permute.xlu1 %553  ;;  %v2926_v7 = vpop.permute.xlu0 %607  ;;  %v992_v35 = vstv %s2931_s24  ;;  %s3139_s24 = sld [smem:[#allocation9 + $0x32]] }
 0x18f   : > { %v993_v44 = vmul.f32 %v992_v35, %v2952_v34 }
 0x190   : > { %947 = vrot.lane.b32.xlu0 %v943_v8, %s2399_s6  ;;  %905 = vrot.lane.b32.xlu1 %v901_v9, %s2396_s8  ;;  %v1035_v9 = vmul.f32 %v1034_v2, %v2952_v34 }
 0x192   : > { %v2935_v20 = vpop.permute.xlu1 %567  ;;  %v2937_v21 = vpop.permute.xlu0 %629  ;;  %v1006_v45 = vstv %s2942_s18  ;;  %s3146_s18 = sld [smem:[#allocation9 + $0x33]] }
 0x193   : > { %v1007_v47 = vmul.f32 %v1006_v45, %v2952_v34 }
 0x194   : > { %961 = vrot.lane.b32.xlu0 %v957_v22, %s2400_s7  ;;  %919 = vrot.lane.b32.xlu1 %v915_v23, %s2397_s25  ;;  %v3000_v22 = vld [vmem:[#allocation4 + $0xe] sm:$0xff]  ;;  %v1048_v23 = vstv %s2977_s17  ;;  %s3176_s17 = sld [smem:[#allocation9 + $0x23]] }
 0x196   : > { %v2946_v28 = vpop.permute.xlu1 %581  ;;  %v2948_v29 = vpop.permute.xlu0 %643 }
 0x198   : > { %975 = vrot.lane.b32.xlu0 %v971_v30, %s2401_s16  ;;  %933 = vrot.lane.b32.xlu1 %v929_v31, %s2398_s28  ;;  %v1049_v31 = vmul.f32 %v1048_v23, %v2952_v34 }
 0x19a   : > { %v2960_v37 = vpop.permute.xlu1 %595  ;;  %v2962_v43 = vpop.permute.xlu0 %657 }
 0x19c   : > { %997 = vrot.lane.b32.xlu0 %v993_v44, %s2396_s8  ;;  %1247 = vrot.lane.b32.xlu1 %v1246_v36, %s2394_s23  ;;  %s2990_s23 = sld [smem:[#allocation9 + $0x30]]  ;;  %v994_v36 = vmul.f32 %v992_v35, %v3000_v22 }
 0x19e   : > { %v2970_v46 = vpop.permute.xlu1 %609  ;;  %v2972_v51 = vpop.permute.xlu0 %671 }
 0x1a0   : > { %1011 = vrot.lane.b32.xlu0 %v1007_v47, %s2397_s25  ;;  %949 = vrot.lane.b32.xlu1 %v944_v52, %s2399_s6 }
 0x1a2   : > { %v2983_v55 = vpop.permute.xlu1 %631  ;;  %v2985_v59 = vpop.permute.xlu0 %685  ;;  %v1062_v44 = vstv %s2990_s23  ;;  %s3191_s23 = sld [smem:[#allocation9 + $0x37]] }
 0x1a4   : > { %1025 = vrot.lane.b32.xlu0 %v1021_v62, %s2398_s28  ;;  %963 = vrot.lane.b32.xlu1 %v958_v63, %s2400_s7  ;;  %v1008_v62 = vmul.f32 %v1006_v45, %v3000_v22  ;;  %v1063_v63 = vmul.f32 %v1062_v44, %v2952_v34 }
 0x1a6   : > { %v2994_v5 = vpop.permute.xlu1 %645  ;;  %v2996_v8 = vpop.permute.xlu0 %699 }
 0x1a8   : > { %1039 = vrot.lane.b32.xlu0 %v1035_v9, %s2399_s6  ;;  %977 = vrot.lane.b32.xlu1 %v972_v13, %s2401_s16  ;;  %v451_v9 = vadd.f32 %v2824_v48, %v435_v24 }
 0x1aa   : > { %v3006_v27 = vpop.permute.xlu1 %659  ;;  %v3008_v30 = vpop.permute.xlu0 %721  ;;  %v465_v35 = vadd.f32 %v2831_v54, %v451_v9  ;;  %v436_v54 = vmul.f32 %v434_v12, %v2641_v18  ;;  %v526_v9 = vstv %s3023_s30  ;;  %s3202_s30 = sld [smem:[#allocation9 + $0x39]] }
 0x1ac   : > { %1053 = vrot.lane.b32.xlu0 %v1049_v31, %s2400_s7  ;;  %999 = vrot.lane.b32.xlu1 %v994_v36, %s2396_s8  ;;  %v1022_v31 = vmul.f32 %v1020_v53, %v3000_v22  ;;  %v479_v45 = vadd.f32 %v2837_v60, %v465_v35  ;;  %v452_v53 = vadd.f32 %v2849_v10, %v436_v54 }
 0x1ae   : > { %v3016_v47 = vpop.permute.xlu1 %673  ;;  %v3018_v52 = vpop.permute.xlu0 %735  ;;  %v493_v48 = vadd.f32 %v2843_v3, %v479_v45  ;;  %v527_v45 = vmul.f32 %v526_v9, %v2632_v14 }
 0x1b0   : > { %1013 = vrot.lane.b32.xlu1 %v1008_v62, %s2397_s25  ;;  %1067 = vrot.lane.b32.xlu0 %v1063_v63, %s2401_s16  ;;  %v1036_v62 = vmul.f32 %v1034_v2, %v3000_v22  ;;  %v507_v63 = vadd.f32 %v2851_v11, %v493_v48  ;;  %v466_v2 = vadd.f32 %v2858_v25, %v452_v53 }
 0x1b2   : > { %v3028_v61 = vpop.permute.xlu1 %687  ;;  %v3030_v13 = vpop.permute.xlu0 %749  ;;  %v521_v60 = vadd.f32 %v2860_v26, %v507_v63  ;;  %v480_v11 = vadd.f32 %v2868_v32, %v466_v2  ;;  %v1064_v26 = vmul.f32 %v1062_v44, %v3000_v22  ;;  %v528_v44 = vmul.f32 %v526_v9, %v2682_v38 }
 0x1b4   : > { %1027 = vrot.lane.b32.xlu1 %v1022_v31, %s2398_s28  ;;  %v1050_v31 = vmul.f32 %v1048_v23, %v3000_v22  ;;  %v529_v18 = vadd.f32 %v527_v45, %v521_v60  ;;  %v494_v48 = vadd.f32 %v2878_v40, %v480_v11 }
 0x1b6   : > { %v3036_v36 = vpop.permute.xlu1 %701  ;;  %v3038_v24 = vpop.permute.xlu0 %763  ;;  %v543_v23 = vadd.f32 %v2870_v33, %v529_v18  ;;  %v508_v14 = vadd.f32 %v2890_v49, %v494_v48 }
 0x1b8   : > { %1041 = vrot.lane.b32.xlu1 %v1036_v62, %s2399_s6  ;;  %v557_v62 = vadd.f32 %v2880_v41, %v543_v23  ;;  %v522_v54 = vadd.f32 %v2901_v56, %v508_v14 }
 0x1ba   : > { %v3047_v35 = vpop.permute.xlu1 %723  ;;  %v3049_v3 = vpop.permute.xlu0 %777  ;;  %v571_v40 = vadd.f32 %v2892_v50, %v557_v62  ;;  %v530_v49 = vadd.f32 %v528_v44, %v522_v54 }
 0x1bc   : > { %1055 = vrot.lane.b32.xlu1 %v1050_v31, %s2400_s7  ;;  %v585_v53 = vadd.f32 %v2903_v57, %v571_v40  ;;  %v618_v31 = vstv %s3065_s29  ;;  %v544_v41 = vadd.f32 %v2912_v0, %v530_v49  ;;  %s3216_s29 = sld [smem:[#allocation9 + $0x3a]] }
 0x1bd   : > { %v619_v50 = vmul.f32 %v618_v31, %v2634_v15 }
 0x1be   : > { %v3056_v12 = vpop.permute.xlu1 %737  ;;  %v3058_v10 = vpop.permute.xlu0 %791  ;;  %v599_v60 = vadd.f32 %v2914_v1, %v585_v53  ;;  %v558_v56 = vadd.f32 %v2924_v6, %v544_v41 }
 0x1c0   : > { %1069 = vrot.lane.b32.xlu1 %v1064_v26, %s2401_s16  ;;  %v613_v38 = vadd.f32 %v2926_v7, %v599_v60  ;;  %v572_v1 = vadd.f32 %v2935_v20, %v558_v56 }
 0x1c2   : > { %v3067_v25 = vpop.permute.xlu1 %751  ;;  %v3069_v32 = vpop.permute.xlu0 %813  ;;  %v621_v57 = vadd.f32 %v619_v50, %v613_v38  ;;  %v586_v11 = vadd.f32 %v2946_v28, %v572_v1  ;;  %v620_v28 = vmul.f32 %v618_v31, %v2726_v58 }
 0x1c4   : > { %v635_v0 = vadd.f32 %v2937_v21, %v621_v57  ;;  %v600_v7 = vadd.f32 %v2960_v37, %v586_v11 }
 0x1c6   : > { %v3075_v63 = vpop.permute.xlu1 %765  ;;  %v3077_v33 = vpop.permute.xlu0 %827  ;;  %v649_v15 = vadd.f32 %v2948_v29, %v635_v0  ;;  %v614_v6 = vadd.f32 %v2970_v46, %v600_v7  ;;  %v710_v29 = vstv %s3102_s4  ;;  %s3221_s4 = sld [smem:[#allocation9 + $0x2a]] }
 0x1c8   : > { %v663_v14 = vadd.f32 %v2962_v43, %v649_v15  ;;  %v622_v62 = vadd.f32 %v620_v28, %v614_v6  ;;  %v711_v43 = vmul.f32 %v710_v29, %v2637_v16 }
 0x1ca   : > { %v3082_v45 = vpop.permute.xlu1 %779  ;;  %v3084_v2 = vpop.permute.xlu0 %841  ;;  %v677_v21 = vadd.f32 %v2972_v51, %v663_v14  ;;  %v636_v46 = vadd.f32 %v2983_v55, %v622_v62  ;;  %v1274_v14 = vstv %s3146_s18  ;;  %s3254_s18 = sld [smem:[#allocation9 + $0x3d]] }
 0x1cc   : > { %v691_v44 = vadd.f32 %v2985_v59, %v677_v21  ;;  %v650_v53 = vadd.f32 %v2994_v5, %v636_v46 }
 0x1ce   : > { %v3090_v9 = vpop.permute.xlu1 %793  ;;  %v3092_v18 = vpop.permute.xlu0 %855  ;;  %v705_v40 = vadd.f32 %v2996_v8, %v691_v44  ;;  %v664_v60 = vadd.f32 %v3006_v27, %v650_v53  ;;  %v1288_v44 = vstv %s3155_s27  ;;  %s3268_s27 = sld [smem:[#allocation9 + $0x3e]] }
 0x1d0   : > { %v713_v51 = vadd.f32 %v711_v43, %v705_v40  ;;  %v678_v41 = vadd.f32 %v3016_v47, %v664_v60  ;;  %v712_v47 = vmul.f32 %v710_v29, %v2770_v19  ;;  %v1302_v43 = vstv %s3166_s19  ;;  %s3273_s19 = sld [smem:[#allocation9 + $0x31]] }
 0x1d1   : > { %v894_v60 = vstv %s3176_s17  ;;  %s3282_s17 = sld [smem:[#allocation9 + $0x40]] }
 0x1d2   : > { %v3096_v26 = vpop.permute.xlu1 %815  ;;  %v3098_v48 = vpop.permute.xlu0 %869  ;;  %v727_v55 = vadd.f32 %v3008_v30, %v713_v51  ;;  %v692_v8 = vadd.f32 %v3028_v61, %v678_v41 }
 0x1d4   : > { %v741_v38 = vadd.f32 %v3018_v52, %v727_v55  ;;  %v706_v27 = vadd.f32 %v3036_v36, %v692_v8  ;;  %v802_v36 = vstv %s3132_s15  ;;  %s3231_s15 = sld [smem:[#allocation9 + $0x3b]] }
 0x1d5   : > { %v803_v7 = vmul.f32 %v802_v36, %v2639_v17  ;;  %v804_v40 = vmul.f32 %v802_v36, %v2814_v39 }
 0x1d6   : > { %v3106_v23 = vpop.permute.xlu1 %829  ;;  %v3108_v20 = vpop.permute.xlu0 %883  ;;  %v755_v30 = vadd.f32 %v3030_v13, %v741_v38  ;;  %v714_v56 = vadd.f32 %v712_v47, %v706_v27  ;;  %v895_v38 = vmul.f32 %v894_v60, %v2917_v4 }
 0x1d8   : > { %v769_v57 = vadd.f32 %v3038_v24, %v755_v30  ;;  %v728_v19 = vadd.f32 %v3047_v35, %v714_v56  ;;  %v1260_v24 = vstv %s3139_s24  ;;  %s3242_s24 = sld [smem:[#allocation9 + $0x3c]] }
 0x1da   : > { %v3113_v54 = vpop.permute.xlu1 %843  ;;  %v1105_v37 = vpop.permute.xlu0 %1104  ;;  %v783_v52 = vadd.f32 %v3049_v3, %v769_v57  ;;  %v742_v0 = vadd.f32 %v3056_v12, %v728_v19 }
 0x1db   : > { %1107 = vst.msk [vmem:[#allocation4 + $0x5] sm:$0x1] %vm279_vm4, %v1105_v37 }
 0x1dc   : > { %v797_v13 = vadd.f32 %v3058_v10, %v783_v52  ;;  %v756_v35 = vadd.f32 %v3067_v25, %v742_v0 }
 0x1de   : > { %v3120_v49 = vpop.permute.xlu1 %857  ;;  %v1127_v58 = vpop.permute.xlu0 %1126  ;;  %v805_v28 = vadd.f32 %v803_v7, %v797_v13  ;;  %v770_v12 = vadd.f32 %v3075_v63, %v756_v35  ;;  %v1366_v7 = vstv %s3216_s29  ;;  %s3323_s29 = sld [smem:[#allocation9 + $0x44]] }
 0x1df   : > { %1129 = vst.msk [vmem:[#allocation4 + $0x7] sm:$0x1] %vm279_vm4, %v1127_v58 }
 0x1e0   : > { %v819_v21 = vadd.f32 %v3069_v32, %v805_v28  ;;  %v784_v25 = vadd.f32 %v3082_v45, %v770_v12  ;;  %v1380_v12 = vstv %s3231_s15  ;;  %s3339_s15 = sld [smem:[#allocation9 + $0x47]] }
 0x1e2   : > { %v3126_v59 = vpop.permute.xlu1 %871  ;;  %v1149_v31 = vpop.permute.xlu0 %1148  ;;  %v833_v63 = vadd.f32 %v3077_v33, %v819_v21  ;;  %v798_v29 = vadd.f32 %v3090_v9, %v784_v25 }
 0x1e3   : > { %1151 = vst.msk [vmem:[#allocation4 + $0x9] sm:$0x1] %vm279_vm4, %v1149_v31  ;;  %v1316_v31 = vstv %s3179_s22  ;;  %s3292_s22 = sld [smem:[#allocation9 + $0x41]] }
 0x1e4   : > { %v847_v45 = vadd.f32 %v3084_v2, %v833_v63  ;;  %v806_v33 = vadd.f32 %v804_v40, %v798_v29 }
 0x1e6   : > { %v3134_v16 = vpop.permute.xlu1 %885  ;;  %v1171_v5 = vpop.permute.xlu0 %1170  ;;  %v861_v9 = vadd.f32 %v3092_v18, %v847_v45  ;;  %v820_v41 = vadd.f32 %v3096_v26, %v806_v33  ;;  %v1330_v26 = vstv %s3191_s23  ;;  %v1394_v45 = vstv %s3242_s24  ;;  %s3304_s23 = sld [smem:[#allocation9 + $0x42]]  ;;  %s3347_s24 = sld [smem:[#allocation9 + $0x48]] }
 0x1e7   : > { %1173 = vst.msk [vmem:[#allocation4 + $0xb] sm:$0x1] %vm279_vm4, %v1171_v5 }
 0x1e8   : > { %v875_v2 = vadd.f32 %v3098_v48, %v861_v9  ;;  %v834_v48 = vadd.f32 %v3106_v23, %v820_v41 }
 0x1ea   : > { %v1116_v61 = vpop.permute.xlu1 %1115  ;;  %v1193_v50 = vpop.permute.xlu0 %1192  ;;  %v889_v18 = vadd.f32 %v3108_v20, %v875_v2  ;;  %v848_v30 = vadd.f32 %v3113_v54, %v834_v48  ;;  %v1352_v54 = vstv %s3202_s30  ;;  %v1408_v2 = vstv %s3254_s18  ;;  %s3314_s30 = sld [smem:[#allocation9 + $0x43]]  ;;  %s3358_s18 = sld [smem:[#allocation9 + $0x49]] }
 0x1eb   : > { %1118 = vst.msk [vmem:[#allocation4 + $0x6] sm:$0x1] %vm279_vm4, %v1116_v61  ;;  %1195 = vst.msk [vmem:[#allocation4 + $0xd] sm:$0x1] %vm279_vm4, %v1193_v50 }
 0x1ec   : > { %v897_v20 = vadd.f32 %v895_v38, %v889_v18  ;;  %v862_v4 = vadd.f32 %v3120_v49, %v848_v30 }
 0x1ee   : > { %v1138_v1 = vpop.permute.xlu1 %1137  ;;  %v1215_v11 = vpop.permute.xlu0 %1214  ;;  %v876_v36 = vadd.f32 %v3126_v59, %v862_v4  ;;  %v896_v59 = vmul.f32 %v894_v60, %v2882_v42 }
 0x1ef   : > { %1140 = vst.msk [vmem:[#allocation4 + $0x8] sm:$0x1] %vm279_vm4, %v1138_v1  ;;  %1217 = vst.msk [vmem:[#allocation4 + $0xf] sm:$0x1] %vm279_vm4, %v1215_v11 }
 0x1f0   : > { %v890_v19 = vadd.f32 %v3134_v16, %v876_v36 }
 0x1f2   : > { %v1160_v3 = vpop.permute.xlu1 %1159  ;;  %v1237_v15 = vpop.permute.xlu0 %1236  ;;  %v3159_v6 = vld [vmem:[#allocation4] sm:$0xff]  ;;  %v898_v35 = vadd.f32 %v896_v59, %v890_v19 }
 0x1f3   : > { %1162 = vst.msk [vmem:[#allocation4 + $0xa] sm:$0x1] %vm279_vm4, %v1160_v3  ;;  %1239 = vst.msk [vmem:[#allocation4 + $0x11] sm:$0x1] %vm279_vm4, %v1237_v15  ;;  %v1261_v10 = vmul.f32 %v1260_v24, %v3159_v6  ;;  %v1275_v37 = vmul.f32 %v1274_v14, %v3159_v6  ;;  %v1289_v58 = vmul.f32 %v1288_v44, %v3159_v6  ;;  %v986_v15 = vstv %s3221_s4  ;;  %s3330_s4 = sld [smem:[#allocation9 + $0x45]] }
 0x1f4   : > { %v1303_v39 = vmul.f32 %v1302_v43, %v3159_v6  ;;  %v1317_v27 = vmul.f32 %v1316_v31, %v3159_v6  ;;  %v1331_v56 = vmul.f32 %v1330_v26, %v3159_v6  ;;  %v987_v21 = vmul.f32 %v986_v15, %v2952_v34 }
 0x1f5   : > { %1265 = vrot.lane.b32.xlu0 %v1261_v10, %s2396_s8 }
 0x1f6   : > { %v1182_v17 = vpop.permute.xlu1 %1181  ;;  %v3170_v62 = vpop.permute.xlu0 %907  ;;  %v3228_v52 = vld [vmem:[#allocation4 + $0x1] sm:$0xff] }
 0x1f7   : > { %1184 = vst.msk [vmem:[#allocation4 + $0xc] sm:$0x1] %vm279_vm4, %v1182_v17  ;;  %v912_v17 = vadd.f32 %v3170_v62, %v898_v35  ;;  %v1395_v9 = vmul.f32 %v1394_v45, %v3228_v52  ;;  %v1409_v48 = vmul.f32 %v1408_v2, %v3228_v52 }
 0x1f9   : > { %1279 = vrot.lane.b32.xlu0 %v1275_v37, %s2397_s25 }
 0x1fa   : > { %v1204_v46 = vpop.permute.xlu1 %1203  ;;  %v3184_v32 = vpop.permute.xlu0 %921 }
 0x1fb   : > { %1206 = vst.msk [vmem:[#allocation4 + $0xe] sm:$0x1] %vm279_vm4, %v1204_v46  ;;  %v926_v63 = vadd.f32 %v3184_v32, %v912_v17  ;;  %v1381_v46 = vmul.f32 %v1380_v12, %v3228_v52 }
 0x1fd   : > { %1293 = vrot.lane.b32.xlu0 %v1289_v58, %s2398_s28 }
 0x1fe   : > { %v1226_v53 = vpop.permute.xlu1 %1225  ;;  %v3195_v51 = vpop.permute.xlu0 %935 }
 0x1ff   : > { %1228 = vst.msk [vmem:[#allocation4 + $0x10] sm:$0x1] %vm279_vm4, %v1226_v53  ;;  %v940_v34 = vadd.f32 %v3195_v51, %v926_v63 }
 0x201   : > { %1307 = vrot.lane.b32.xlu0 %v1303_v39, %s2399_s6 }
 0x202   : > { %v906_v55 = vpop.permute.xlu1 %905  ;;  %v948_v8 = vpop.permute.xlu0 %947  ;;  %v3207_v5 = vld [vmem:[#allocation4 + $0x8] sm:$0xff] }
 0x203   : > { %v1262_v47 = vmul.f32 %v1260_v24, %v3207_v5  ;;  %v911_v50 = vadd.f32 %v906_v55, %v897_v20  ;;  %v1276_v57 = vmul.f32 %v1274_v14, %v3207_v5  ;;  %v1353_v24 = vmul.f32 %v1352_v54, %v3228_v52 }
 0x204   : > { %v1290_v0 = vmul.f32 %v1288_v44, %v3207_v5  ;;  %v1367_v14 = vmul.f32 %v1366_v7, %v3228_v52  ;;  %v1304_v42 = vmul.f32 %v1302_v43, %v3207_v5  ;;  %v1318_v62 = vmul.f32 %v1316_v31, %v3207_v5 }
 0x205   : > { %1321 = vrot.lane.b32.xlu0 %v1317_v27, %s2400_s7  ;;  %1267 = vrot.lane.b32.xlu1 %v1262_v47, %s2396_s8  ;;  %v1332_v53 = vmul.f32 %v1330_v26, %v3207_v5  ;;  %v988_v31 = vmul.f32 %v986_v15, %v3000_v22  ;;  %v1422_v27 = vstv %s3268_s27  ;;  %v1254_v20 = vstv %s3273_s19  ;;  %s3365_s27 = sld [smem:[#allocation9 + $0x4a]]  ;;  %s3372_s19 = sld [smem:[#allocation9 + $0x4b]] }
 0x206   : > { %v920_v61 = vpop.permute.xlu1 %919  ;;  %v962_v23 = vpop.permute.xlu0 %961  ;;  %v3280_v51 = vld [vmem:[#allocation4 + $0x9] sm:$0xff]  ;;  %v1256_v63 = vmul.f32 %v1254_v20, %v3207_v5  ;;  %v1536_v5 = vstv %s3339_s15  ;;  %s3425_s15 = sld [smem:[#allocation9 + $0x53]] }
 0x207   : > { %v925_v1 = vadd.f32 %v920_v61, %v911_v50  ;;  %v1354_v38 = vmul.f32 %v1352_v54, %v3280_v51  ;;  %v1368_v4 = vmul.f32 %v1366_v7, %v3280_v51  ;;  %v3301_v50 = vld [vmem:[#allocation4 + $0x2] sm:$0xff]  ;;  %v1255_v54 = vmul.f32 %v1254_v20, %v3159_v6 }
 0x208   : > { %v1382_v19 = vmul.f32 %v1380_v12, %v3280_v51  ;;  %v1396_v59 = vmul.f32 %v1394_v45, %v3280_v51  ;;  %v1410_v35 = vmul.f32 %v1408_v2, %v3280_v51  ;;  %v1424_v17 = vmul.f32 %v1422_v27, %v3280_v51 }
 0x209   : > { %1335 = vrot.lane.b32.xlu0 %v1331_v56, %s2401_s16  ;;  %1281 = vrot.lane.b32.xlu1 %v1276_v57, %s2397_s25  ;;  %v1444_v56 = vstv %s3282_s17  ;;  %v1564_v2 = vstv %s3358_s18  ;;  %s3379_s17 = sld [smem:[#allocation9 + $0x4c]]  ;;  %s3441_s18 = sld [smem:[#allocation9 + $0x56]] }
 0x20a   : > { %v934_v49 = vpop.permute.xlu1 %933  ;;  %v976_v11 = vpop.permute.xlu0 %975 }
 0x20b   : > { %v939_v13 = vadd.f32 %v934_v49, %v925_v1 }
 0x20d   : > { %v953_v3 = vadd.f32 %v948_v8, %v939_v13  ;;  %1357 = vrot.lane.b32.xlu0 %v1353_v24, %s2396_s8  ;;  %1295 = vrot.lane.b32.xlu1 %v1290_v0, %s2398_s28  ;;  %v1458_v13 = vstv %s3292_s22  ;;  %s3388_s22 = sld [smem:[#allocation9 + $0x4e]] }
 0x20e   : > { %v1248_v16 = vpop.permute.xlu1 %1247  ;;  %v998_v28 = vpop.permute.xlu0 %997  ;;  %v1459_v7 = vmul.f32 %v1458_v13, %v3301_v50 }
 0x20f   : > { %v967_v10 = vadd.f32 %v962_v23, %v953_v3  ;;  %1250 = vst.msk [vmem:[#allocation4 + $0x12] sm:$0x1] %vm279_vm4, %v1248_v16  ;;  %v1423_v23 = vmul.f32 %v1422_v27, %v3228_v52  ;;  %v1472_v3 = vstv %s3304_s23  ;;  %v1606_v27 = vstv %s3379_s17  ;;  %s3395_s23 = sld [smem:[#allocation9 + $0x4f]]  ;;  %s3465_s17 = sld [smem:[#allocation9 + $0x59]] }
 0x211   : > { %v981_v25 = vadd.f32 %v976_v11, %v967_v10  ;;  %1371 = vrot.lane.b32.xlu0 %v1367_v14, %s2397_s25  ;;  %1309 = vrot.lane.b32.xlu1 %v1304_v42, %s2399_s6  ;;  %v1445_v11 = vmul.f32 %v1444_v56, %v3301_v50  ;;  %v1486_v10 = vstv %s3314_s30  ;;  %s3404_s30 = sld [smem:[#allocation9 + $0x50]] }
 0x212   : > { %v950_v37 = vpop.permute.xlu1 %949  ;;  %v1012_v44 = vpop.permute.xlu0 %1011  ;;  %v1487_v12 = vmul.f32 %v1486_v10, %v3301_v50 }
 0x213   : > { %v989_v29 = vadd.f32 %v987_v21, %v981_v25  ;;  %v954_v43 = vadd.f32 %v950_v37, %v940_v34  ;;  %v1500_v21 = vstv %s3323_s29  ;;  %v3337_v25 = vld [vmem:[#allocation4 + $0xa] sm:$0xff]  ;;  %v1628_v20 = vstv %s3388_s22  ;;  %s3411_s29 = sld [smem:[#allocation9 + $0x51]]  ;;  %s3469_s22 = sld [smem:[#allocation9 + $0x38]] }
 0x215   : > { %v1003_v40 = vadd.f32 %v998_v28, %v989_v29  ;;  %1385 = vrot.lane.b32.xlu0 %v1381_v46, %s2398_s28  ;;  %1323 = vrot.lane.b32.xlu1 %v1318_v62, %s2400_s7  ;;  %v1473_v28 = vmul.f32 %v1472_v3, %v3301_v50  ;;  %v1501_v29 = vmul.f32 %v1500_v21, %v3301_v50  ;;  %v1514_v62 = vstv %s3330_s4  ;;  %s3418_s4 = sld [smem:[#allocation9 + $0x52]] }
 0x216   : > { %v964_v32 = vpop.permute.xlu1 %963  ;;  %v1026_v58 = vpop.permute.xlu0 %1025  ;;  %v1446_v46 = vmul.f32 %v1444_v56, %v3337_v25  ;;  %v1515_v34 = vmul.f32 %v1514_v62, %v3301_v50 }
 0x217   : > { %v1017_v33 = vadd.f32 %v1012_v44, %v1003_v40  ;;  %v968_v39 = vadd.f32 %v964_v32, %v954_v43  ;;  %v1460_v40 = vmul.f32 %v1458_v13, %v3337_v25  ;;  %v3355_v32 = vld [vmem:[#allocation4 + $0x3] sm:$0xff]  ;;  %v1474_v43 = vmul.f32 %v1472_v3, %v3337_v25  ;;  %v3432_v13 = vld [vmem:[#allocation4 + $0xc] sm:$0xff] }
 0x219   : > { %v1031_v60 = vadd.f32 %v1026_v58, %v1017_v33  ;;  %1399 = vrot.lane.b32.xlu0 %v1395_v9, %s2399_s6  ;;  %1337 = vrot.lane.b32.xlu1 %v1332_v53, %s2401_s16  ;;  %v1537_v58 = vmul.f32 %v1536_v5, %v3355_v32  ;;  %v1550_v33 = vstv %s3347_s24  ;;  %v1488_v53 = vmul.f32 %v1486_v10, %v3337_v25  ;;  %s3434_s24 = sld [smem:[#allocation9 + $0x55]] }
 0x21a   : > { %v978_v41 = vpop.permute.xlu1 %977  ;;  %v1040_v18 = vpop.permute.xlu0 %1039  ;;  %v1551_v9 = vmul.f32 %v1550_v33, %v3355_v32 }
 0x21b   : > { %v982_v55 = vadd.f32 %v978_v41, %v968_v39  ;;  %v1045_v8 = vadd.f32 %v1040_v18, %v1031_v60  ;;  %v1565_v39 = vmul.f32 %v1564_v2, %v3355_v32  ;;  %v1502_v60 = vmul.f32 %v1500_v21, %v3337_v25 }
 0x21c   : > { %v1516_v18 = vmul.f32 %v1514_v62, %v3337_v25 }
 0x21d   : > { %v990_v47 = vadd.f32 %v988_v31, %v982_v55  ;;  %1413 = vrot.lane.b32.xlu0 %v1409_v48, %s2400_s7  ;;  %1359 = vrot.lane.b32.xlu1 %v1354_v38, %s2396_s8  ;;  %v1578_v31 = vstv %s3365_s27  ;;  %v1592_v55 = vstv %s3372_s19  ;;  %s3451_s27 = sld [smem:[#allocation9 + $0x57]]  ;;  %s3458_s19 = sld [smem:[#allocation9 + $0x58]] }
 0x21e   : > { %v1000_v22 = vpop.permute.xlu1 %999  ;;  %v1054_v26 = vpop.permute.xlu0 %1053  ;;  %v1579_v41 = vmul.f32 %v1578_v31, %v3355_v32  ;;  %v1593_v48 = vmul.f32 %v1592_v55, %v3355_v32 }
 0x21f   : > { %v1004_v30 = vadd.f32 %v1000_v22, %v990_v47  ;;  %v1059_v61 = vadd.f32 %v1054_v26, %v1045_v8  ;;  %v3386_v8 = vld [vmem:[#allocation4 + $0xb] sm:$0xff]  ;;  %v1607_v47 = vmul.f32 %v1606_v27, %v3355_v32 }
 0x220   : > { %v1538_v38 = vmul.f32 %v1536_v5, %v3386_v8  ;;  %v1552_v22 = vmul.f32 %v1550_v33, %v3386_v8  ;;  %v3401_v26 = vld [vmem:[#allocation4 + $0x4] sm:$0xff]  ;;  %v1580_v56 = vmul.f32 %v1578_v31, %v3386_v8 }
 0x221   : > { %1427 = vrot.lane.b32.xlu0 %v1423_v23, %s2401_s16  ;;  %1373 = vrot.lane.b32.xlu1 %v1368_v4, %s2397_s25  ;;  %v1642_v23 = vstv %s3395_s23  ;;  %s3474_s23 = sld [smem:[#allocation9 + $0x5a]] }
 0x222   : > { %v1014_v57 = vpop.permute.xlu1 %1013  ;;  %v1068_v36 = vpop.permute.xlu0 %1067  ;;  %v1643_v4 = vmul.f32 %v1642_v23, %v3401_v26 }
 0x223   : > { %v1018_v1 = vadd.f32 %v1014_v57, %v1004_v30  ;;  %v1073_v49 = vadd.f32 %v1068_v36, %v1059_v61  ;;  %v1629_v30 = vmul.f32 %v1628_v20, %v3401_v26  ;;  %v1566_v61 = vmul.f32 %v1564_v2, %v3386_v8  ;;  %v3482_v2 = vld [vmem:[#allocation4 + $0xd] sm:$0xff] }
 0x224   : > { %v1656_v57 = vstv %s3404_s30  ;;  %v1594_v36 = vmul.f32 %v1592_v55, %v3386_v8  ;;  %s3484_s30 = sld [smem:[#allocation9 + $0x5c]] }
 0x225   : > { %v3316_v24 = vadd.f32 %v1255_v54, %v1073_v49  ;;  %1449 = vrot.lane.b32.xlu0 %v1445_v11, %s2396_s8  ;;  %1387 = vrot.lane.b32.xlu1 %v1382_v19, %s2398_s28  ;;  %v1657_v54 = vmul.f32 %v1656_v57, %v3401_v26  ;;  %v1608_v11 = vmul.f32 %v1606_v27, %v3386_v8  ;;  %v1684_v19 = vstv %s3418_s4  ;;  %s3502_s4 = sld [smem:[#allocation9 + $0x5e]] }
 0x226   : > { %v1028_v0 = vpop.permute.xlu1 %1027  ;;  %v1686_v62 = vmul.f32 %v1684_v19, %v3432_v13 }
 0x227   : > { %v1032_v6 = vadd.f32 %v1028_v0, %v1018_v1  ;;  %v1670_v1 = vstv %s3411_s29  ;;  %v1685_v0 = vmul.f32 %v1684_v19, %v3401_v26  ;;  %v1790_v27 = vstv %s3474_s23  ;;  %s3493_s29 = sld [smem:[#allocation9 + $0x5d]] }
 0x228   : > { %v1671_v49 = vmul.f32 %v1670_v1, %v3401_v26 }
 0x229   : > { %1463 = vrot.lane.b32.xlu0 %v1459_v7, %s2397_s25  ;;  %1401 = vrot.lane.b32.xlu1 %v1396_v59, %s2399_s6  ;;  %v1698_v7 = vstv %s3425_s15  ;;  %s3509_s15 = sld [smem:[#allocation9 + $0x5f]] }
 0x22a   : > { %v1042_v15 = vpop.permute.xlu1 %1041  ;;  %v1699_v3 = vmul.f32 %v1698_v7, %v3401_v26  ;;  %v1700_v33 = vmul.f32 %v1698_v7, %v3432_v13 }
 0x22b   : > { %v1046_v16 = vadd.f32 %v1042_v15, %v1032_v6  ;;  %v1630_v6 = vmul.f32 %v1628_v20, %v3432_v13  ;;  %v1644_v15 = vmul.f32 %v1642_v23, %v3432_v13  ;;  %v1840_v7 = vstv %s3502_s4 }
 0x22d   : > { %1477 = vrot.lane.b32.xlu0 %v1473_v28, %s2398_s28  ;;  %1415 = vrot.lane.b32.xlu1 %v1410_v35, %s2400_s7  ;;  %v3448_v28 = vld [vmem:[#allocation4 + $0x5] sm:$0xff]  ;;  %v1720_v35 = vstv %s3434_s24  ;;  %s3516_s24 = sld [smem:[#allocation9 + $0x60]] }
 0x22e   : > { %v1056_v14 = vpop.permute.xlu1 %1055  ;;  %v1722_v55 = vmul.f32 %v1720_v35, %v3482_v2 }
 0x22f   : > { %v1060_v42 = vadd.f32 %v1056_v14, %v1046_v16  ;;  %v1721_v14 = vmul.f32 %v1720_v35, %v3448_v28 }
 0x231   : > { %1491 = vrot.lane.b32.xlu0 %v1487_v12, %s2399_s6  ;;  %1429 = vrot.lane.b32.xlu1 %v1424_v17, %s2401_s16  ;;  %v1734_v17 = vstv %s3441_s18  ;;  %s3520_s18 = sld [smem:[#allocation9 + $0x3f]] }
 0x232   : > { %v1070_v37 = vpop.permute.xlu1 %1069  ;;  %v1735_v21 = vmul.f32 %v1734_v17, %v3448_v28 }
 0x233   : > { %v1074_v44 = vadd.f32 %v1070_v37, %v1060_v42  ;;  %v1658_v42 = vmul.f32 %v1656_v57, %v3432_v13  ;;  %v1672_v37 = vmul.f32 %v1670_v1, %v3432_v13 }
 0x235   : > { %v3349_v45 = vadd.f32 %v1256_v63, %v1074_v44  ;;  %1505 = vrot.lane.b32.xlu0 %v1501_v29, %s2400_s7  ;;  %1451 = vrot.lane.b32.xlu1 %v1446_v46, %s2396_s8  ;;  %v1748_v63 = vstv %s3451_s27  ;;  %s3526_s27 = sld [smem:[#allocation9 + $0x61]] }
 0x236   : > { %v1749_v46 = vmul.f32 %v1748_v63, %v3448_v28 }
 0x239   : > { %1519 = vrot.lane.b32.xlu0 %v1515_v34, %s2401_s16  ;;  %1465 = vrot.lane.b32.xlu1 %v1460_v40, %s2397_s25  ;;  %v1762_v40 = vstv %s3458_s19  ;;  %s2150_s19 = sshll.u32 %s2374_s12, 8  ;;  %s2402_s12 = smov [#allocation10]  }
 0x23d   : > { %1541 = vrot.lane.b32.xlu0 %v1537_v58, %s2396_s8  ;;  %1479 = vrot.lane.b32.xlu1 %v1474_v43, %s2398_s28  ;;  %v1763_v43 = vmul.f32 %v1762_v40, %v3448_v28 }
 0x241   : > { %1555 = vrot.lane.b32.xlu0 %v1551_v9, %s2397_s25  ;;  %1493 = vrot.lane.b32.xlu1 %v1488_v53, %s2399_s6  ;;  %v1776_v53 = vstv %s3465_s17 }
 0x242   : > { %v1778_v35 = vmul.f32 %v1776_v53, %v3482_v2 }
 0x245   : > { %1569 = vrot.lane.b32.xlu0 %v1565_v39, %s2398_s28  ;;  %1507 = vrot.lane.b32.xlu1 %v1502_v60, %s2400_s7  ;;  %v1346_v39 = vstv %s3469_s22 }
 0x249   : > { %1583 = vrot.lane.b32.xlu0 %v1579_v41, %s2399_s6  ;;  %1521 = vrot.lane.b32.xlu1 %v1516_v18, %s2401_s16  ;;  %v1777_v18 = vmul.f32 %v1776_v53, %v3448_v28 }
 0x24d   : > { %1597 = vrot.lane.b32.xlu0 %v1593_v48, %s2400_s7  ;;  %1543 = vrot.lane.b32.xlu1 %v1538_v38, %s2396_s8 }
 0x251   : > { %1611 = vrot.lane.b32.xlu0 %v1607_v47, %s2401_s16  ;;  %1557 = vrot.lane.b32.xlu1 %v1552_v22, %s2397_s25 }
 0x255   : > { %1633 = vrot.lane.b32.xlu0 %v1629_v30, %s2396_s8  ;;  %1571 = vrot.lane.b32.xlu1 %v1566_v61, %s2398_s28  ;;  %v1791_v30 = vmul.f32 %v1790_v27, %v3448_v28  ;;  %v1736_v61 = vmul.f32 %v1734_v17, %v3482_v2  ;;  %v1854_v17 = vstv %s3509_s15  ;;  %s2300_s15 = sshll.u32 %s2402_s12, 4  ;;  %s2301_s15 = int_to_ptr.vmem [resolvable:$false] %s2300_s15 }
 0x259   : > { %1647 = vrot.lane.b32.xlu0 %v1643_v4, %s2397_s25  ;;  %1585 = vrot.lane.b32.xlu1 %v1580_v56, %s2399_s6  ;;  %v3499_v4 = vld [vmem:[#allocation4 + $0x6] sm:$0xff] }
 0x25d   : > { %1661 = vrot.lane.b32.xlu0 %v1657_v54, %s2398_s28  ;;  %1599 = vrot.lane.b32.xlu1 %v1594_v36, %s2400_s7  ;;  %v1750_v54 = vmul.f32 %v1748_v63, %v3482_v2  ;;  %v1792_v63 = vmul.f32 %v1790_v27, %v3482_v2 }
 0x261   : > { %1675 = vrot.lane.b32.xlu0 %v1671_v49, %s2399_s6  ;;  %1613 = vrot.lane.b32.xlu1 %v1608_v11, %s2401_s16  ;;  %v1826_v49 = vstv %s3493_s29  ;;  %s1911_s29 = scalar_lea.sflag [#allocation7], %s2554_s21 }
 0x265   : > { %1689 = vrot.lane.b32.xlu0 %v1685_v0, %s2400_s7  ;;  %1635 = vrot.lane.b32.xlu1 %v1630_v6, %s2396_s8  ;;  %v1764_v0 = vmul.f32 %v1762_v40, %v3482_v2  ;;  %v1827_v6 = vmul.f32 %v1826_v49, %v3499_v4 }
 0x267   : > { %v1266_v59 = vpop.permute.xlu0 %1265 }
 0x268   : > { %v1271_v16 = vadd.f32 %v1266_v59, %v3316_v24 }
 0x269   : > { %1703 = vrot.lane.b32.xlu0 %v1699_v3, %s2401_s16  ;;  %1649 = vrot.lane.b32.xlu1 %v1644_v15, %s2397_s25 }
 0x26b   : > { %v1280_v10 = vpop.permute.xlu0 %1279 }
 0x26c   : > { %v1285_v12 = vadd.f32 %v1280_v10, %v1271_v16  ;;  %v1841_v10 = vmul.f32 %v1840_v7, %v3499_v4 }
 0x26d   : > { %1725 = vrot.lane.b32.xlu0 %v1721_v14, %s2396_s8  ;;  %1663 = vrot.lane.b32.xlu1 %v1658_v42, %s2398_s28  ;;  %v1348_v42 = vmul.f32 %v1346_v39, %v3280_v51  ;;  %v3532_v51 = vld [vmem:[#allocation4 + $0xe] sm:$0xff] }
 0x26f   : > { %v1294_v24 = vpop.permute.xlu0 %1293 }
 0x270   : > { %v1299_v44 = vadd.f32 %v1294_v24, %v1285_v12 }
 0x271   : > { %1739 = vrot.lane.b32.xlu0 %v1735_v21, %s2397_s25  ;;  %1677 = vrot.lane.b32.xlu1 %v1672_v37, %s2399_s6 }
 0x273   : > { %v1308_v29 = vpop.permute.xlu0 %1307 }
 0x274   : > { %v1313_v34 = vadd.f32 %v1308_v29, %v1299_v44  ;;  %v1855_v29 = vmul.f32 %v1854_v17, %v3499_v4 }
 0x275   : > { %1753 = vrot.lane.b32.xlu0 %v1749_v46, %s2398_s28  ;;  %1691 = vrot.lane.b32.xlu1 %v1686_v62, %s2400_s7  ;;  %v1868_v62 = vstv %s3516_s24  ;;  %s2302_s24 = scalar_lea.vmem %s2301_s15, 512 }
 0x277   : > { %v1268_v5 = vpop.permute.xlu1 %1267  ;;  %v1322_v58 = vpop.permute.xlu0 %1321 }
 0x278   : > { %v1272_v9 = vadd.f32 %v1268_v5, %v3349_v45  ;;  %v1327_v60 = vadd.f32 %v1322_v58, %v1313_v34  ;;  %v1347_v45 = vmul.f32 %v1346_v39, %v3228_v52  ;;  %v1812_v52 = vstv %s3484_s30  ;;  %s3582_s30 = scalar_lea.hbm %s3635_s2, %s2150_s19 }
 0x279   : > { %1767 = vrot.lane.b32.xlu0 %v1763_v43, %s2399_s6  ;;  %1705 = vrot.lane.b32.xlu1 %v1700_v33, %s2401_s16  ;;  %v1813_v36 = vmul.f32 %v1812_v52, %v3499_v4  ;;  %v1438_v34 = vstv %s3520_s18  ;;  %v1814_v43 = vmul.f32 %v1812_v52, %v3532_v51  ;;  %v1869_v33 = vmul.f32 %v1868_v62, %v3499_v4 }
 0x27a   : > { %v1882_v39 = vstv %s3526_s27 }
 0x27b   : > { %v1282_v31 = vpop.permute.xlu1 %1281  ;;  %v1336_v41 = vpop.permute.xlu0 %1335 }
 0x27c   : > { %v1286_v48 = vadd.f32 %v1282_v31, %v1272_v9  ;;  %v1341_v38 = vadd.f32 %v1336_v41, %v1327_v60  ;;  %v1439_v9 = vmul.f32 %v1438_v34, %v3301_v50 }
 0x27d   : > { %1781 = vrot.lane.b32.xlu0 %v1777_v18, %s2400_s7  ;;  %1727 = vrot.lane.b32.xlu1 %v1722_v55, %s2396_s8  ;;  %v1828_v18 = vmul.f32 %v1826_v49, %v3532_v51  ;;  %v1883_v55 = vmul.f32 %v1882_v39, %v3499_v4  ;;  %v1440_v49 = vmul.f32 %v1438_v34, %v3337_v25 }
 0x27e   : > { %v1349_v47 = vadd.f32 %v1347_v45, %v1341_v38  ;;  %v1842_v38 = vmul.f32 %v1840_v7, %v3532_v51  ;;  %v1884_v7 = vmul.f32 %v1882_v39, %v3532_v51 }
 0x27f   : > { %v1296_v22 = vpop.permute.xlu1 %1295  ;;  %v1358_v20 = vpop.permute.xlu0 %1357 }
 0x280   : > { %v1300_v23 = vadd.f32 %v1296_v22, %v1286_v48  ;;  %v1363_v59 = vadd.f32 %v1358_v20, %v1349_v47 }
 0x281   : > { %1795 = vrot.lane.b32.xlu0 %v1791_v30, %s2401_s16  ;;  %1741 = vrot.lane.b32.xlu1 %v1736_v61, %s2397_s25  ;;  %v1856_v30 = vmul.f32 %v1854_v17, %v3532_v51 }
 0x283   : > { %v1310_v56 = vpop.permute.xlu1 %1309  ;;  %v1372_v57 = vpop.permute.xlu0 %1371 }
 0x284   : > { %v1314_v1 = vadd.f32 %v1310_v56, %v1300_v23  ;;  %v1377_v14 = vadd.f32 %v1372_v57, %v1363_v59 }
 0x285   : > { %1755 = vrot.lane.b32.xlu1 %v1750_v54, %s2398_s28  ;;  %1817 = vrot.lane.b32.xlu0 %v1813_v36, %s2396_s8  ;;  %v1870_v54 = vmul.f32 %v1868_v62, %v3532_v51 }
 0x287   : > { %v1324_v11 = vpop.permute.xlu1 %1323  ;;  %v1386_v19 = vpop.permute.xlu0 %1385 }
 0x288   : > { %v1328_v3 = vadd.f32 %v1324_v11, %v1314_v1  ;;  %v1391_v24 = vadd.f32 %v1386_v19, %v1377_v14 }
 0x289   : > { %1769 = vrot.lane.b32.xlu1 %v1764_v0, %s2399_s6  ;;  %1831 = vrot.lane.b32.xlu0 %v1827_v6, %s2397_s25 }
 0x28b   : > { %v1338_v15 = vpop.permute.xlu1 %1337  ;;  %v1400_v16 = vpop.permute.xlu0 %1399 }
 0x28c   : > { %v1342_v12 = vadd.f32 %v1338_v15, %v1328_v3  ;;  %v1405_v46 = vadd.f32 %v1400_v16, %v1391_v24 }
 0x28d   : > { %1783 = vrot.lane.b32.xlu1 %v1778_v35, %s2400_s7  ;;  %1845 = vrot.lane.b32.xlu0 %v1841_v10, %s2398_s28 }
 0x28e   : > { %v1350_v21 = vadd.f32 %v1348_v42, %v1342_v12 }
 0x28f   : > { %v1360_v37 = vpop.permute.xlu1 %1359  ;;  %v1414_v44 = vpop.permute.xlu0 %1413 }
 0x290   : > { %v1419_v40 = vadd.f32 %v1414_v44, %v1405_v46  ;;  %v1364_v48 = vadd.f32 %v1360_v37, %v1350_v21 }
 0x291   : > { %1797 = vrot.lane.b32.xlu1 %v1792_v63, %s2401_s16  ;;  %1859 = vrot.lane.b32.xlu0 %v1855_v29, %s2399_s6 }
 0x293   : > { %v1374_v5 = vpop.permute.xlu1 %1373  ;;  %v1428_v58 = vpop.permute.xlu0 %1427 }
 0x294   : > { %v1433_v53 = vadd.f32 %v1428_v58, %v1419_v40  ;;  %v1378_v27 = vadd.f32 %v1374_v5, %v1364_v48 }
 0x295   : > { %1819 = vrot.lane.b32.xlu1 %v1814_v43, %s2396_s8  ;;  %1873 = vrot.lane.b32.xlu0 %v1869_v33, %s2400_s7  ;;  %s3552_s8 = sld [smem:[#allocation9 + $0x46]] }
 0x296   : > { %v1441_v60 = vadd.f32 %v1439_v9, %v1433_v53 }
 0x297   : > { %v1388_v31 = vpop.permute.xlu1 %1387  ;;  %v1450_v41 = vpop.permute.xlu0 %1449 }
 0x298   : > { %v1392_v47 = vadd.f32 %v1388_v31, %v1378_v27  ;;  %v1455_v23 = vadd.f32 %v1450_v41, %v1441_v60 }
 0x299   : > { %1833 = vrot.lane.b32.xlu1 %v1828_v18, %s2397_s25  ;;  %1887 = vrot.lane.b32.xlu0 %v1883_v55, %s2401_s16  ;;  %s3561_s25 = sld [smem:[#allocation9 + $0x4d]] }
 0x29b   : > { %v1402_v45 = vpop.permute.xlu1 %1401  ;;  %v1464_v50 = vpop.permute.xlu0 %1463  ;;  %v1530_v3 = vstv %s3552_s8 }
 0x29c   : > { %v1406_v61 = vadd.f32 %v1402_v45, %v1392_v47  ;;  %v1469_v36 = vadd.f32 %v1464_v50, %v1455_v23  ;;  %v1531_v14 = vmul.f32 %v1530_v3, %v3355_v32  ;;  %v1532_v43 = vmul.f32 %v1530_v3, %v3386_v8 }
 0x29d   : > { %1847 = vrot.lane.b32.xlu1 %v1842_v38, %s2398_s28  ;;  %s3571_s28 = sld [smem:[#allocation9 + $0x5b]] }
 0x29f   : > { %v1416_v22 = vpop.permute.xlu1 %1415  ;;  %v1478_v20 = vpop.permute.xlu0 %1477  ;;  %v1622_v31 = vstv %s3561_s25 }
 0x2a0   : > { %v1420_v52 = vadd.f32 %v1416_v22, %v1406_v61  ;;  %v1483_v11 = vadd.f32 %v1478_v20, %v1469_v36  ;;  %v1623_v45 = vmul.f32 %v1622_v31, %v3401_v26 }
 0x2a1   : > { %1861 = vrot.lane.b32.xlu1 %v1856_v30, %s2399_s6  ;;  %s2028_s6 = sshll.u32 %s2554_s21, 4 }
 0x2a3   : > { %v1430_v56 = vpop.permute.xlu1 %1429  ;;  %v1492_v57 = vpop.permute.xlu0 %1491 }
 0x2a4   : > { %v1434_v1 = vadd.f32 %v1430_v56, %v1420_v52  ;;  %v1497_v59 = vadd.f32 %v1492_v57, %v1483_v11 }
 0x2a5   : > { %1875 = vrot.lane.b32.xlu1 %v1870_v54, %s2400_s7  ;;  %s189_s7 = scalar_lea.vmem [#allocation10], %s2028_s6 }
 0x2a6   : > { %v1442_v19 = vadd.f32 %v1440_v49, %v1434_v1  ;;  %v1624_v49 = vmul.f32 %v1622_v31, %v3432_v13  ;;  %s1924_s17 = sshll.u32 %s189_s7, 4  ;;  %s3584_s17 = int_to_ptr.vmem [resolvable:$true] %s1924_s17 }
 0x2a7   : > { %v1452_v0 = vpop.permute.xlu1 %1451  ;;  %v1506_v6 = vpop.permute.xlu0 %1505  ;;  %s2296_s4 = scalar_lea.vmem %s3584_s17, 256  ;;  %p2303_p4 = scmp.lt.s32.totalorder %s3584_s17, %s2301_s15 }
 0x2a8   : > { %v1511_v15 = vadd.f32 %v1506_v6, %v1497_v59  ;;  %v1456_v17 = vadd.f32 %v1452_v0, %v1442_v19  ;;  %p2297_p8 = scmp.ne.s32.totalorder %s3584_s17, %s2296_s4  ;;  %p2304_p9 = scmp.lt.s32.totalorder %s2302_s24, %s2296_s4 }
 0x2a9   : > { %1889 = vrot.lane.b32.xlu1 %v1884_v7, %s2401_s16  ;;  %s3566_s16 = sld [smem:[#allocation9 + $0x54]] }
 0x2aa   : > { %p2298_p12 = pnand %p2297_p8, %p3652_p2  ;;  %p2305_p13 = por %p2304_p9, %p2303_p4 }
 0x2ab   : > { %v1466_v16 = vpop.permute.xlu1 %1465  ;;  %v1520_v35 = vpop.permute.xlu0 %1519 }
 0x2ac   : > { %v1525_v10 = vadd.f32 %v1520_v35, %v1511_v15  ;;  %v1470_v37 = vadd.f32 %v1466_v16, %v1456_v17  ;;  %p2299_p5 = pneg %p2298_p12 }
 0x2ae   : > { %v1533_v42 = vadd.f32 %v1531_v14, %v1525_v10  ;;  %p2306_p11 = pnand %p2305_p13, %p2299_p5 }
 0x2af   : > { %v1480_v25 = vpop.permute.xlu1 %1479  ;;  %v1542_v12 = vpop.permute.xlu0 %1541  ;;  %v1714_v59 = vstv %s3566_s16 }
 0x2b0   : > { %v1484_v44 = vadd.f32 %v1480_v25, %v1470_v37  ;;  %v1547_v62 = vadd.f32 %v1542_v12, %v1533_v42  ;;  %v1715_v10 = vmul.f32 %v1714_v59, %v3448_v28 }
 0x2b3   : > { %v1494_v24 = vpop.permute.xlu1 %1493  ;;  %v1556_v21 = vpop.permute.xlu0 %1555 }
 0x2b4   : > { %v1498_v46 = vadd.f32 %v1494_v24, %v1484_v44  ;;  %v1561_v58 = vadd.f32 %v1556_v21, %v1547_v62 }
 0x2b7   : > { %v1508_v63 = vpop.permute.xlu1 %1507  ;;  %v1570_v29 = vpop.permute.xlu0 %1569 }
 0x2b8   : > { %v1512_v34 = vadd.f32 %v1508_v63, %v1498_v46  ;;  %v1575_v33 = vadd.f32 %v1570_v29, %v1561_v58 }
 0x2bb   : > { %v1522_v40 = vpop.permute.xlu1 %1521  ;;  %v1584_v5 = vpop.permute.xlu0 %1583 }
 0x2bc   : > { %v1526_v32 = vadd.f32 %v1522_v40, %v1512_v34  ;;  %v1589_v60 = vadd.f32 %v1584_v5, %v1575_v33  ;;  %v1716_v5 = vmul.f32 %v1714_v59, %v3482_v2 }
 0x2be   : > { %v1534_v9 = vadd.f32 %v1532_v43, %v1526_v32 }
 0x2bf   : > { %v1544_v53 = vpop.permute.xlu1 %1543  ;;  %v1598_v39 = vpop.permute.xlu0 %1597 }
 0x2c0   : > { %v1603_v41 = vadd.f32 %v1598_v39, %v1589_v60  ;;  %v1548_v47 = vadd.f32 %v1544_v53, %v1534_v9  ;;  %v1806_v53 = vstv %s3571_s28 }
 0x2c3   : > { %v1558_v18 = vpop.permute.xlu1 %1557  ;;  %v1612_v55 = vpop.permute.xlu0 %1611 }
 0x2c4   : > { %v1617_v48 = vadd.f32 %v1612_v55, %v1603_v41  ;;  %v1562_v30 = vadd.f32 %v1558_v18, %v1548_v47  ;;  %v1807_v18 = vmul.f32 %v1806_v53, %v3499_v4 }
 0x2c6   : > { %v1625_v50 = vadd.f32 %v1623_v45, %v1617_v48 }
 0x2c7   : > { %v1572_v38 = vpop.permute.xlu1 %1571  ;;  %v1634_v27 = vpop.permute.xlu0 %1633 }
 0x2c8   : > { %v1576_v8 = vadd.f32 %v1572_v38, %v1562_v30  ;;  %v1639_v56 = vadd.f32 %v1634_v27, %v1625_v50 }
 0x2cb   : > { %v1586_v22 = vpop.permute.xlu1 %1585  ;;  %v1648_v20 = vpop.permute.xlu0 %1647 }
 0x2cc   : > { %v1590_v52 = vadd.f32 %v1586_v22, %v1576_v8  ;;  %v1653_v1 = vadd.f32 %v1648_v20, %v1639_v56 }
 0x2cf   : > { %v1600_v61 = vpop.permute.xlu1 %1599  ;;  %v1662_v23 = vpop.permute.xlu0 %1661 }
 0x2d0   : > { %v1604_v57 = vadd.f32 %v1600_v61, %v1590_v52  ;;  %v1667_v11 = vadd.f32 %v1662_v23, %v1653_v1 }
 0x2d3   : > { %v1614_v54 = vpop.permute.xlu1 %1613  ;;  %v1676_v36 = vpop.permute.xlu0 %1675 }
 0x2d4   : > { %v1618_v26 = vadd.f32 %v1614_v54, %v1604_v57  ;;  %v1681_v7 = vadd.f32 %v1676_v36, %v1667_v11  ;;  %v1808_v54 = vmul.f32 %v1806_v53, %v3532_v51 }
 0x2d6   : > { %v1626_v19 = vadd.f32 %v1624_v49, %v1618_v26 }
 0x2d7   : > { %v1636_v0 = vpop.permute.xlu1 %1635  ;;  %v1690_v6 = vpop.permute.xlu0 %1689 }
 0x2d8   : > { %v1695_v3 = vadd.f32 %v1690_v6, %v1681_v7  ;;  %v1640_v12 = vadd.f32 %v1636_v0, %v1626_v19 }
 0x2db   : > { %v1650_v15 = vpop.permute.xlu1 %1649  ;;  %v1704_v16 = vpop.permute.xlu0 %1703 }
 0x2dc   : > { %v1709_v35 = vadd.f32 %v1704_v16, %v1695_v3  ;;  %v1654_v21 = vadd.f32 %v1650_v15, %v1640_v12 }
 0x2de   : > { %v1717_v14 = vadd.f32 %v1715_v10, %v1709_v35 }
 0x2df   : > { %v1664_v42 = vpop.permute.xlu1 %1663  ;;  %v1726_v25 = vpop.permute.xlu0 %1725 }
 0x2e0   : > { %v1668_v13 = vadd.f32 %v1664_v42, %v1654_v21  ;;  %v1731_v29 = vadd.f32 %v1726_v25, %v1717_v14 }
 0x2e3   : > { %v1678_v17 = vpop.permute.xlu1 %1677  ;;  %v1740_v24 = vpop.permute.xlu0 %1739 }
 0x2e4   : > { %v1682_v63 = vadd.f32 %v1678_v17, %v1668_v13  ;;  %v1745_v40 = vadd.f32 %v1740_v24, %v1731_v29 }
 0x2e7   : > { %v1692_v37 = vpop.permute.xlu1 %1691  ;;  %v1754_v44 = vpop.permute.xlu0 %1753 }
 0x2e8   : > { %v1696_v46 = vadd.f32 %v1692_v37, %v1682_v63  ;;  %v1759_v58 = vadd.f32 %v1754_v44, %v1745_v40 }
 0x2eb   : > { %v1706_v62 = vpop.permute.xlu1 %1705  ;;  %v1768_v34 = vpop.permute.xlu0 %1767 }
 0x2ec   : > { %v1710_v28 = vadd.f32 %v1706_v62, %v1696_v46  ;;  %v1773_v9 = vadd.f32 %v1768_v34, %v1759_v58 }
 0x2ee   : > { %v1718_v32 = vadd.f32 %v1716_v5, %v1710_v28 }
 0x2ef   : > { %v1728_v43 = vpop.permute.xlu1 %1727  ;;  %v1782_v33 = vpop.permute.xlu0 %1781 }
 0x2f0   : > { %v1787_v39 = vadd.f32 %v1782_v33, %v1773_v9  ;;  %v1732_v50 = vadd.f32 %v1728_v43, %v1718_v32 }
 0x2f3   : > { %v1742_v60 = vpop.permute.xlu1 %1741  ;;  %v1796_v31 = vpop.permute.xlu0 %1795 }
 0x2f4   : > { %v1801_v41 = vadd.f32 %v1796_v31, %v1787_v39  ;;  %v1746_v47 = vadd.f32 %v1742_v60, %v1732_v50 }
 0x2f6   : > { %v1809_v55 = vadd.f32 %v1807_v18, %v1801_v41 }
 0x2f7   : > { %v1756_v48 = vpop.permute.xlu1 %1755  ;;  %v1818_v45 = vpop.permute.xlu0 %1817 }
 0x2f8   : > { %v1760_v2 = vadd.f32 %v1756_v48, %v1746_v47  ;;  %v1823_v8 = vadd.f32 %v1818_v45, %v1809_v55 }
 0x2fb   : > { %v1770_v38 = vpop.permute.xlu1 %1769  ;;  %v1832_v27 = vpop.permute.xlu0 %1831 }
 0x2fc   : > { %v1774_v30 = vadd.f32 %v1770_v38, %v1760_v2  ;;  %v1837_v56 = vadd.f32 %v1832_v27, %v1823_v8 }
 0x2ff   : > { %v1784_v22 = vpop.permute.xlu1 %1783  ;;  %v1846_v20 = vpop.permute.xlu0 %1845 }
 0x300   : > { %v1788_v61 = vadd.f32 %v1784_v22, %v1774_v30  ;;  %v1851_v4 = vadd.f32 %v1846_v20, %v1837_v56 }
 0x303   : > { %v1798_v23 = vpop.permute.xlu1 %1797  ;;  %v1860_v52 = vpop.permute.xlu0 %1859 }
 0x304   : > { %v1802_v57 = vadd.f32 %v1798_v23, %v1788_v61  ;;  %v1865_v49 = vadd.f32 %v1860_v52, %v1851_v4 }
 0x306   : > { %v1810_v36 = vadd.f32 %v1808_v54, %v1802_v57 }
 0x307   : > { %v1820_v1 = vpop.permute.xlu1 %1819  ;;  %v1874_v26 = vpop.permute.xlu0 %1873 }
 0x308   : > { %v1879_v11 = vadd.f32 %v1874_v26, %v1865_v49  ;;  %v1824_v3 = vadd.f32 %v1820_v1, %v1810_v36 }
 0x30b   : > { %v1834_v19 = vpop.permute.xlu1 %1833  ;;  %v1888_v0 = vpop.permute.xlu0 %1887 }
 0x30c   : > { %v1893_v6 = vadd.f32 %v1888_v0, %v1879_v11  ;;  %v1838_v16 = vadd.f32 %v1834_v19, %v1824_v3 }
 0x30e   : > { %v2142_v7 = vmul.f32 -1.442695, %v1893_v6 }
 0x30f   : > { %v1848_v59 = vpop.permute.xlu1 %1847 }
 0x310   : > { %2243 = vpow2.f32 %v2142_v7  ;;  %v1852_v35 = vadd.f32 %v1848_v59, %v1838_v16 }
 0x313   : > { %v1862_v15 = vpop.permute.xlu1 %1861 }
 0x314   : > { %v1866_v14 = vadd.f32 %v1862_v15, %v1852_v35 }
 0x317   : > { %v1876_v10 = vpop.permute.xlu1 %1875 }
 0x318   : > { %v1880_v42 = vadd.f32 %v1876_v10, %v1866_v14 }
 0x31a   : > { %v2244_v51 = vpop.eup %2243 }
 0x31b   : > { %v1901_v25 = vadd.f32 1.0, %v2244_v51  ;;  %v1890_v12 = vpop.permute.xlu1 %1889 }
 0x31c   : > { %v1894_v17 = vadd.f32 %v1890_v12, %v1880_v42 }
 0x31d   : > { %2245 = vrcp.f32 %v1901_v25 }
 0x31e   : > { %v2143_v24 = vmul.f32 -1.442695, %v1894_v17 }
 0x320   : > { %2247 = vpow2.f32 %v2143_v24 }
 0x327   : > { %v2246_v21 = vpop.eup %2245 }
 0x328   : > { %1908 = vst.msk [vmem:[%s189_s7] sm:$0xff] %vm1907_vm5, %v2246_v21 }
 0x32a   : > { %v2248_v13 = vpop.eup %2247 }
 0x32b   : > { %v1902_v37 = vadd.f32 1.0, %v2248_v13 }
 0x32d   : > { %2249 = vrcp.f32 %v1902_v37 }
 0x337   : > { %v2250_v44 = vpop.eup %2249 }
 0x338   : > { %1909 = vst.msk [vmem:[%s189_s7 + $0x8] sm:$0xff] %vm1907_vm5, %v2250_v44 }
 0x339   : > { %2309 = shalt.err (!%p2306_p11)
}
 0x33a   : > { %s2310_s18 = scalar_lea.hbm %s3582_s30, 256  ;;  %s2314_s25 = scalar_lea.hbm %s3635_s2, 512 }
 0x33b   : > { %p2311_p3 = scmp.ne.s32.totalorder %s3582_s30, %s2310_s18  ;;  %p2315_p6 = scmp.lt.u32.totalorder %s3582_s30, %s3635_s2 }
 0x33c   : > { %p2316_p1 = scmp.lt.u32.totalorder %s2314_s25, %s2310_s18  ;;  %p2318_p8 = scmp.lt.u32.totalorder %s2310_s18, %s3582_s30 }
 0x33d   : > { %p2312_p7 = pnand %p2311_p3, %p3652_p2 }
 0x33e   : > { %p2317_p0 = por %p2316_p1, %p2315_p6 }
 0x33f   : > { %p2313_p10 = pneg %p2312_p7 }
 0x340   : > { %p2319_p12 = por %p2318_p8, %p2317_p0 }
 0x342   : > { %p2320_p5 = pnand %p2319_p12, %p2313_p10 }
 0x344   : > { %2323 = shalt.err (!%p2320_p5)
}
 0x345   : > { %s2403_s6 = smov 128   ;;  %s2404_s7 = smov 8  }
 0x346   : > { %2157 = dma.vmem_to_hbm [thread:$0]  (%p3652_p2), %s3584_s17, 256, %s3582_s30, %s1911_s29, %s2403_s6, %s2403_s6, %s2404_s7  }
 0x347 PF: > { %s1939_s19 = sand.u32 1, %s2362_s9   ;;  %p3653_p4 = scmp.ne.s32.totalorder %s3644_s20, 0 }
 0x348   : > { %p3654_p9 = scmp.ge.s32.totalorder %s2382_s14, 2  ;;  %s1940_s22 = scalar_lea.sflag [#allocation7], %s1939_s19 }
 0x34a   : > { %p2168_p13 = pnand %p3654_p9, %p3653_p4 }
 0x34c   : > { %2357 = dma.done.wait (!%p2168_p13), %s1940_s22, 256  }
 0x34d   : > { %2359 = vsyncadd (!%p2168_p13), %s1940_s22, 4294967040  ;;  %s19_s14 = sadd.s32 1, %s2382_s14   ;;  %s3655_s9 = smov %s2366_s10 }
 0x34e   : > { %p16_p11 = scmp.ge.s32.totalorder %s19_s14, 4   ;;  %s3656_s10 = smov %s2370_s11 }
 0x34f   : > { %s3657_s11 = smov %s2512_s5  ;;  %s3658_s12 = smov %s2378_s13 }
 0x350   : > { %s3659_s13 = smov %s3661_s26  ;;  %18 = sbr.rel (!%p16_p11) target bundleno = 7 (0x7), region = 78 }
 0x357   :  { %1945 = vsyncpa [#allocation6], 1 }
 0x358   :  { %1947 = vsyncpa [#allocation6 + $0x1], 1 }
 0x359   :  { %1948 = vsyncpa [#allocation7], 1 }
 0x35a   :  { %1950 = vsyncpa [#allocation7 + $0x1], 1 }
 0x35b   :  { %1951 = vsyncpa [#allocation8], 1 }
 0x35c   :  { %1953 = vsyncpa [#allocation8 + $0x1], 1 }

</bundles_post_ra>
